<compile_context>
chip_gen: v6e
topology: v6e:2x2x1
jax: 0.10.0
libtpu: 0.0.40
codegen_flags: <defaults>
</compile_context>

<pallas_src>
import jax
import jax.numpy as jnp
from jax.experimental import pallas as pl
from jax.experimental.pallas import tpu as pltpu

# Module hyperparameters (from the PyTorch source)
HIDDEN_SIZE = 50
INPUT_SIZE = 1
NUM_LAYERS = 2
OUTPUT_SIZE = 1

HP = 128            # per-gate lane padding (one lane tile)
GATES = 4 * HP      # 512 padded gate columns, gate order [i, f, g, o] like PyTorch

# Row layout of the small f32 slab (single (8, GATES) tile -> one DMA):
_ROW_WIH0 = 0       # layer-0 input->gate row (gate-padded)
_ROW_B0 = 1         # b_ih_l0 + b_hh_l0 (gate-padded)
_ROW_B1 = 2         # b_ih_l1 + b_hh_l1 (gate-padded)
_ROW_WFC = 3        # fc weight row in lanes 0:H
_ROW_BFC = 4        # fc bias scalar in lane 0


def _lstm_kernel(x_ref,     # (B, T)            f32   input sequence (input_size==1 squeezed)
                 w_ref,     # (2*HP, 2*GATES)   bf16  fused [[Whh0 | Wih1], [0 | Whh1]]
                 slab_ref,  # (8, GATES)        f32   wih0 / b0 / b1 / wfc / bfc rows
                 out_ref):  # (B, 1)            f32
    B, T = x_ref.shape
    f32 = jnp.float32
    bf16 = jnp.bfloat16

    xv = x_ref[...]                                              # (B, T)
    slab = slab_ref[...]                                         # (8, GATES)

    # Hoisted broadcasts (JAX does not CSE broadcast_in_dim -> do them exactly once).
    wih0_b = jnp.broadcast_to(slab[_ROW_WIH0:_ROW_WIH0 + 1, :], (B, GATES))
    b0_b = jnp.broadcast_to(slab[_ROW_B0:_ROW_B0 + 1, :], (B, GATES))
    b1_b = jnp.broadcast_to(slab[_ROW_B1:_ROW_B1 + 1, :], (B, GATES))
    wfc = slab[_ROW_WFC:_ROW_WFC + 1, 0:HP]                      # (1, HP)
    bfc = slab[_ROW_BFC:_ROW_BFC + 1, 0:1]                       # (1, 1)

    # Prologue: all x-dependent layer-0 gate inputs.  No dependence on h/c, so the
    # scheduler can overlap this work with the serial matmul chain.
    g0_in = [xv[:, t:t + 1] * wih0_b + b0_b for t in range(T)]   # each (B, GATES)

    def gate_math(gates, c_prev):
        # Lane-aligned 128-wide slices (no relayout).  f32 throughout (v5e-safe).
        i = jax.nn.sigmoid(gates[:, 0 * HP:1 * HP])
        f = jax.nn.sigmoid(gates[:, 1 * HP:2 * HP])
        g = jnp.tanh(gates[:, 2 * HP:3 * HP])
        o = jax.nn.sigmoid(gates[:, 3 * HP:4 * HP])
        c_new = f * c_prev + i * g
        h_new = o * jnp.tanh(c_new)
        return h_new, c_new

    c0 = jnp.zeros((B, HP), f32)
    c1 = jnp.zeros((B, HP), f32)
    h1 = jnp.zeros((B, HP), f32)
    h1_bf = jnp.zeros((B, HP), bf16)            # persistent bf16 copy of h1
    g0_rec = jnp.zeros((B, GATES), f32)         # h0(-1) == 0  =>  recurrent term is 0

    for t in range(T):  # T is static: fully unrolled recurrence
        # Layer-0 gates for step t (input term precomputed, recurrent term from the
        # previous step's fused matmul).
        h0, c0 = gate_math(g0_in[t] + g0_rec, c0)

        # One fused wavefront matmul per step:
        #   [h0(t) | h1(t-1)] @ [[Whh0 | Wih1], [0 | Whh1]]
        # -> first 512 lanes: recurrent part of g0(t+1); last 512 lanes: g1(t) pre-bias.
        lhs = jnp.concatenate([h0.astype(bf16), h1_bf], axis=1)  # (B, 2*HP), 128-aligned
        big = jnp.dot(lhs, w_ref[...], preferred_element_type=f32)  # (B, 2*GATES)
        g0_rec = big[:, 0:GATES]

        h1, c1 = gate_math(big[:, GATES:2 * GATES] + b1_b, c1)
        h1_bf = h1.astype(bf16)

    # fc head (H -> 1): VPU multiply + lane reduce; padded lanes of h1/wfc are zero.
    out = jnp.sum(h1 * wfc, axis=1, keepdims=True) + bfc
    out_ref[...] = out.astype(out_ref.dtype)


def _pad_gate_cols(w):
    """(rows, 4*H) PyTorch-order gate matrix -> (rows, 4*HP), each gate in its own
    128-lane slot; extra columns are zero."""
    H = HIDDEN_SIZE
    out = jnp.zeros((w.shape[0], GATES), w.dtype)
    for g in range(4):
        out = out.at[:, g * HP:g * HP + H].set(w[:, g * H:(g + 1) * H])
    return out


def pack_params(params):
    """One-time weight layout (call at parameter-load time, NOT per forward).

    Returns:
      w_fused : (2*HP, 2*GATES) bf16  — rows 0:H = [Whh0 | Wih1], rows HP:HP+H = [0 | Whh1]
      slab    : (8, GATES) f32        — wih0 / b0 / b1 / wfc / bfc rows (see _ROW_*).
    """
    H = HIDDEN_SIZE
    f32 = jnp.float32

    w = jnp.zeros((2 * HP, 2 * GATES), f32)
    w = w.at[0:H, 0:GATES].set(_pad_gate_cols(params["whh0"].astype(f32)))
    w = w.at[0:H, GATES:2 * GATES].set(_pad_gate_cols(params["wih1"].astype(f32)))
    w = w.at[HP:HP + H, GATES:2 * GATES].set(_pad_gate_cols(params["whh1"].astype(f32)))
    w_fused = w.astype(jnp.bfloat16)

    slab = jnp.zeros((8, GATES), f32)
    slab = slab.at[_ROW_WIH0:_ROW_WIH0 + 1, :].set(_pad_gate_cols(params["wih0"].astype(f32)))
    slab = slab.at[_ROW_B0:_ROW_B0 + 1, :].set(_pad_gate_cols(params["b0"].astype(f32)))
    slab = slab.at[_ROW_B1:_ROW_B1 + 1, :].set(_pad_gate_cols(params["b1"].astype(f32)))
    slab = slab.at[_ROW_WFC, 0:H].set(params["wfc"][:, 0].astype(f32))
    slab = slab.at[_ROW_BFC, 0].set(params["bfc"].astype(f32).reshape(()))
    return w_fused, slab


@jax.jit
def lstm_model_forward(x, edge_index, edge_attr, w_fused, slab):
    """Pallas equivalent of LSTMModel.forward. edge_index / edge_attr are unused
    (exactly as in the PyTorch module).  w_fused / slab come from pack_params()."""
    del edge_index, edge_attr
    B, T, IS = x.shape
    assert IS == INPUT_SIZE

    x2d = x[:, :, 0].astype(jnp.float32)            # (B, T); input_size == 1
    vmem = pl.BlockSpec(memory_space=pltpu.MemorySpace.VMEM)
    return pl.pallas_call(
        _lstm_kernel,
        out_shape=jax.ShapeDtypeStruct((B, OUTPUT_SIZE), jnp.float32),
        in_specs=[vmem, vmem, vmem],
        out_specs=vmem,
    )(x2d, w_fused, slab)


def init_params(key):
    """Deterministic init matching PyTorch's default uniform(-1/sqrt(H), 1/sqrt(H)).
    Weights are stored pre-transposed (so math is x @ W) and the two per-layer LSTM
    biases are pre-summed."""
    H, IS, OUT = HIDDEN_SIZE, INPUT_SIZE, OUTPUT_SIZE
    k = 1.0 / jnp.sqrt(jnp.float32(H))
    keys = jax.random.split(key, 10)

    def u(kk, shape, bound):
        return jax.random.uniform(kk, shape, jnp.float32, -bound, bound)

    wih0 = u(keys[0], (IS, 4 * H), k)                              # = W_ih_l0.T
    whh0 = u(keys[1], (H, 4 * H), k)                               # = W_hh_l0.T
    b0 = u(keys[2], (1, 4 * H), k) + u(keys[3], (1, 4 * H), k)     # b_ih_l0 + b_hh_l0
    wih1 = u(keys[4], (H, 4 * H), k)                               # = W_ih_l1.T
    whh1 = u(keys[5], (H, 4 * H), k)                               # = W_hh_l1.T
    b1 = u(keys[6], (1, 4 * H), k) + u(keys[7], (1, 4 * H), k)
    wfc = u(keys[8], (H, OUT), k)                                  # = fc.weight.T
    bfc = u(keys[9], (1, OUT), k)
    return dict(wih0=wih0, whh0=whh0, b0=b0,
                wih1=wih1, whh1=whh1, b1=b1,
                wfc=wfc, bfc=bfc)


def _reference_forward(x, params, bf16_matmuls=True):
    """Pure-JAX reference. With bf16_matmuls=True it mirrors the kernel's numerics
    (bf16 recurrent-matmul operands, f32 accumulation, f32 gate math); with False it is
    the exact f32 math of the PyTorch module."""
    H = HIDDEN_SIZE
    B, T, _ = x.shape
    f32 = jnp.float32

    def mm(a, w):
        if bf16_matmuls:
            return jnp.dot(a.astype(jnp.bfloat16), w.astype(jnp.bfloat16),
                           preferred_element_type=f32)
        return jnp.dot(a, w, preferred_element_type=f32)

    def gate_math(g, c_prev):
        i = jax.nn.sigmoid(g[:, 0 * H:1 * H])
        f = jax.nn.sigmoid(g[:, 1 * H:2 * H])
        gg = jnp.tanh(g[:, 2 * H:3 * H])
        o = jax.nn.sigmoid(g[:, 3 * H:4 * H])
        c_new = f * c_prev + i * gg
        return o * jnp.tanh(c_new), c_new

    x = x.astype(f32)
    h0 = jnp.zeros((B, H), f32)
    c0 = jnp.zeros((B, H), f32)
    h1 = jnp.zeros((B, H), f32)
    c1 = jnp.zeros((B, H), f32)
    for t in range(T):
        x_t = x[:, t, :]                                              # (B, 1)
        g0 = x_t * params["wih0"] + mm(h0, params["whh0"]) + params["b0"]
        h0, c0 = gate_math(g0, c0)
        g1 = mm(h0, params["wih1"]) + mm(h1, params["whh1"]) + params["b1"]
        h1, c1 = gate_math(g1, c1)
    return h1 @ params["wfc"] + params["bfc"]


if __name__ == "__main__":
    key = jax.random.PRNGKey(0)
    k_param, k_x, k_ea = jax.random.split(key, 3)

    B, T = 2, 8
    x = jax.random.normal(k_x, (B, T, INPUT_SIZE), jnp.float32)
    # Unused by the forward pass (present only to mirror the PyTorch signature).
    edge_index = jnp.zeros((2, 4), jnp.int32)
    edge_attr = jax.random.normal(k_ea, (4, 1), jnp.float32)

    params = init_params(k_param)
    # One-time layout (hoisted out of the forward path per the performance review).
    w_fused, slab = jax.block_until_ready(pack_params(params))

    out = lstm_model_forward(x, edge_index, edge_attr, w_fused, slab)
    out = jax.block_until_ready(out)
    assert out.shape == (B, OUTPUT_SIZE)

    # Check against a reference that mirrors the kernel's math (bf16 MXU operands,
    # f32 accumulation, f32 gate/state math).  Tiny slack for f32 accumulation-order
    # differences introduced by the fused K=256 matmul.
    ref_bf16 = _reference_forward(x, params, bf16_matmuls=True)
    assert jnp.allclose(out, ref_bf16, atol=5e-4, rtol=5e-4), (out, ref_bf16)

    # Sanity check against the exact-f32 PyTorch-equivalent math (bf16 matmul operands
    # only perturb the result at the ~1e-2 level at this size / T=8).
    ref_f32 = _reference_forward(x, params, bf16_matmuls=False)
    assert jnp.allclose(out, ref_f32, atol=5e-2, rtol=5e-2), (out, ref_f32)

    print("KERNEL_OK")
</pallas_src>

<mosaic_0001>
module attributes {stable_mosaic.version = 11 : i64} {
  func.func @_lstm_kernel(%arg0: memref<2x8xf32, #tpu.memory_space<vmem>>, %arg1: memref<256x1024xbf16, #tpu.memory_space<vmem>>, %arg2: memref<8x512xf32, #tpu.memory_space<vmem>>, %arg3: memref<2x1xf32, #tpu.memory_space<vmem>>) attributes {dimension_semantics = [], scalar_prefetch = 0 : i64, scratch_operands = 0 : i64, tpu.core_type = #tpu.core_type<tc>} {
    %c0 = arith.constant 0 : index
    %c0_0 = arith.constant 0 : index
    %0 = vector.load %arg0[%c0, %c0_0] : memref<2x8xf32, #tpu.memory_space<vmem>>, vector<2x8xf32>
    %c0_1 = arith.constant 0 : index
    %c0_2 = arith.constant 0 : index
    %1 = vector.load %arg2[%c0_1, %c0_2] : memref<8x512xf32, #tpu.memory_space<vmem>>, vector<8x512xf32>
    %2 = vector.extract_strided_slice %1 {offsets = [0, 0], sizes = [1, 512], strides = [1, 1]} : vector<8x512xf32> to vector<1x512xf32>
    %3 = vector.shape_cast %2 : vector<1x512xf32> to vector<1x512xf32>
    %4 = vector.broadcast %3 : vector<1x512xf32> to vector<2x512xf32>
    %5 = vector.extract_strided_slice %1 {offsets = [1, 0], sizes = [1, 512], strides = [1, 1]} : vector<8x512xf32> to vector<1x512xf32>
    %6 = vector.shape_cast %5 : vector<1x512xf32> to vector<1x512xf32>
    %7 = vector.broadcast %6 : vector<1x512xf32> to vector<2x512xf32>
    %8 = vector.extract_strided_slice %1 {offsets = [2, 0], sizes = [1, 512], strides = [1, 1]} : vector<8x512xf32> to vector<1x512xf32>
    %9 = vector.shape_cast %8 : vector<1x512xf32> to vector<1x512xf32>
    %10 = vector.broadcast %9 : vector<1x512xf32> to vector<2x512xf32>
    %11 = vector.extract_strided_slice %1 {offsets = [3, 0], sizes = [1, 128], strides = [1, 1]} : vector<8x512xf32> to vector<1x128xf32>
    %12 = vector.extract_strided_slice %1 {offsets = [4, 0], sizes = [1, 1], strides = [1, 1]} : vector<8x512xf32> to vector<1x1xf32>
    %13 = vector.extract_strided_slice %0 {offsets = [0, 0], sizes = [2, 1], strides = [1, 1]} : vector<2x8xf32> to vector<2x1xf32>
    %14 = vector.broadcast %13 : vector<2x1xf32> to vector<2x512xf32>
    %15 = arith.mulf %14, %4 : vector<2x512xf32>
    %16 = arith.addf %15, %7 : vector<2x512xf32>
    %17 = vector.extract_strided_slice %0 {offsets = [0, 1], sizes = [2, 1], strides = [1, 1]} : vector<2x8xf32> to vector<2x1xf32>
    %18 = vector.broadcast %17 : vector<2x1xf32> to vector<2x512xf32>
    %19 = arith.mulf %18, %4 : vector<2x512xf32>
    %20 = arith.addf %19, %7 : vector<2x512xf32>
    %21 = vector.extract_strided_slice %0 {offsets = [0, 2], sizes = [2, 1], strides = [1, 1]} : vector<2x8xf32> to vector<2x1xf32>
    %22 = vector.broadcast %21 : vector<2x1xf32> to vector<2x512xf32>
    %23 = arith.mulf %22, %4 : vector<2x512xf32>
    %24 = arith.addf %23, %7 : vector<2x512xf32>
    %25 = vector.extract_strided_slice %0 {offsets = [0, 3], sizes = [2, 1], strides = [1, 1]} : vector<2x8xf32> to vector<2x1xf32>
    %26 = vector.broadcast %25 : vector<2x1xf32> to vector<2x512xf32>
    %27 = arith.mulf %26, %4 : vector<2x512xf32>
    %28 = arith.addf %27, %7 : vector<2x512xf32>
    %29 = vector.extract_strided_slice %0 {offsets = [0, 4], sizes = [2, 1], strides = [1, 1]} : vector<2x8xf32> to vector<2x1xf32>
    %30 = vector.broadcast %29 : vector<2x1xf32> to vector<2x512xf32>
    %31 = arith.mulf %30, %4 : vector<2x512xf32>
    %32 = arith.addf %31, %7 : vector<2x512xf32>
    %33 = vector.extract_strided_slice %0 {offsets = [0, 5], sizes = [2, 1], strides = [1, 1]} : vector<2x8xf32> to vector<2x1xf32>
    %34 = vector.broadcast %33 : vector<2x1xf32> to vector<2x512xf32>
    %35 = arith.mulf %34, %4 : vector<2x512xf32>
    %36 = arith.addf %35, %7 : vector<2x512xf32>
    %37 = vector.extract_strided_slice %0 {offsets = [0, 6], sizes = [2, 1], strides = [1, 1]} : vector<2x8xf32> to vector<2x1xf32>
    %38 = vector.broadcast %37 : vector<2x1xf32> to vector<2x512xf32>
    %39 = arith.mulf %38, %4 : vector<2x512xf32>
    %40 = arith.addf %39, %7 : vector<2x512xf32>
    %41 = vector.extract_strided_slice %0 {offsets = [0, 7], sizes = [2, 1], strides = [1, 1]} : vector<2x8xf32> to vector<2x1xf32>
    %42 = vector.broadcast %41 : vector<2x1xf32> to vector<2x512xf32>
    %43 = arith.mulf %42, %4 : vector<2x512xf32>
    %44 = arith.addf %43, %7 : vector<2x512xf32>
    %cst = arith.constant 0.000000e+00 : f32
    %45 = vector.broadcast %cst : f32 to vector<2x128xf32>
    %cst_3 = arith.constant 0.000000e+00 : f32
    %46 = vector.broadcast %cst_3 : f32 to vector<2x128xf32>
    %cst_4 = arith.constant 0.000000e+00 : bf16
    %47 = vector.broadcast %cst_4 : bf16 to vector<2x128xbf16>
    %cst_5 = arith.constant 0.000000e+00 : f32
    %48 = vector.broadcast %cst_5 : f32 to vector<2x512xf32>
    %49 = arith.addf %16, %48 : vector<2x512xf32>
    %50 = vector.extract_strided_slice %49 {offsets = [0, 0], sizes = [2, 128], strides = [1, 1]} : vector<2x512xf32> to vector<2x128xf32>
    %51 = arith.negf %50 : vector<2x128xf32>
    %52 = math.exp %51 : vector<2x128xf32>
    %cst_6 = arith.constant 1.000000e+00 : f32
    %53 = vector.broadcast %cst_6 : f32 to vector<2x128xf32>
    %54 = arith.addf %53, %52 : vector<2x128xf32>
    %55 = arith.divf %53, %54 : vector<2x128xf32>
    %56 = vector.extract_strided_slice %49 {offsets = [0, 128], sizes = [2, 128], strides = [1, 1]} : vector<2x512xf32> to vector<2x128xf32>
    %57 = arith.negf %56 : vector<2x128xf32>
    %58 = math.exp %57 : vector<2x128xf32>
    %cst_7 = arith.constant 1.000000e+00 : f32
    %59 = vector.broadcast %cst_7 : f32 to vector<2x128xf32>
    %60 = arith.addf %59, %58 : vector<2x128xf32>
    %61 = arith.divf %59, %60 : vector<2x128xf32>
    %62 = vector.extract_strided_slice %49 {offsets = [0, 256], sizes = [2, 128], strides = [1, 1]} : vector<2x512xf32> to vector<2x128xf32>
    %63 = math.tanh %62 : vector<2x128xf32>
    %64 = vector.extract_strided_slice %49 {offsets = [0, 384], sizes = [2, 128], strides = [1, 1]} : vector<2x512xf32> to vector<2x128xf32>
    %65 = arith.negf %64 : vector<2x128xf32>
    %66 = math.exp %65 : vector<2x128xf32>
    %cst_8 = arith.constant 1.000000e+00 : f32
    %67 = vector.broadcast %cst_8 : f32 to vector<2x128xf32>
    %68 = arith.addf %67, %66 : vector<2x128xf32>
    %69 = arith.divf %67, %68 : vector<2x128xf32>
    %70 = arith.mulf %61, %45 : vector<2x128xf32>
    %71 = arith.mulf %55, %63 : vector<2x128xf32>
    %72 = arith.addf %70, %71 : vector<2x128xf32>
    %73 = math.tanh %72 : vector<2x128xf32>
    %74 = arith.mulf %69, %73 : vector<2x128xf32>
    %75 = arith.truncf %74 : vector<2x128xf32> to vector<2x128xbf16>
    %76 = tpu.concatenate %75, %47 in 1 : vector<2x128xbf16>, vector<2x128xbf16> -> vector<2x256xbf16>
    %c0_9 = arith.constant 0 : index
    %c0_10 = arith.constant 0 : index
    %77 = vector.load %arg1[%c0_9, %c0_10] : memref<256x1024xbf16, #tpu.memory_space<vmem>>, vector<256x1024xbf16>
    %cst_11 = arith.constant dense<0.000000e+00> : vector<2x1024xf32>
    %78 = tpu.matmul %76, %77, %cst_11 {dimension_numbers = #tpu.dot_dimension_numbers<[1], [0], [0], [1], [0, 0, 1, 1], [], []>} : vector<2x256xbf16>, vector<256x1024xbf16>, vector<2x1024xf32> -> vector<2x1024xf32>
    %79 = vector.extract_strided_slice %78 {offsets = [0, 0], sizes = [2, 512], strides = [1, 1]} : vector<2x1024xf32> to vector<2x512xf32>
    %80 = vector.extract_strided_slice %78 {offsets = [0, 512], sizes = [2, 512], strides = [1, 1]} : vector<2x1024xf32> to vector<2x512xf32>
    %81 = arith.addf %80, %10 : vector<2x512xf32>
    %82 = vector.extract_strided_slice %81 {offsets = [0, 0], sizes = [2, 128], strides = [1, 1]} : vector<2x512xf32> to vector<2x128xf32>
    %83 = arith.negf %82 : vector<2x128xf32>
    %84 = math.exp %83 : vector<2x128xf32>
    %cst_12 = arith.constant 1.000000e+00 : f32
    %85 = vector.broadcast %cst_12 : f32 to vector<2x128xf32>
    %86 = arith.addf %85, %84 : vector<2x128xf32>
    %87 = arith.divf %85, %86 : vector<2x128xf32>
    %88 = vector.extract_strided_slice %81 {offsets = [0, 128], sizes = [2, 128], strides = [1, 1]} : vector<2x512xf32> to vector<2x128xf32>
    %89 = arith.negf %88 : vector<2x128xf32>
    %90 = math.exp %89 : vector<2x128xf32>
    %cst_13 = arith.constant 1.000000e+00 : f32
    %91 = vector.broadcast %cst_13 : f32 to vector<2x128xf32>
    %92 = arith.addf %91, %90 : vector<2x128xf32>
    %93 = arith.divf %91, %92 : vector<2x128xf32>
    %94 = vector.extract_strided_slice %81 {offsets = [0, 256], sizes = [2, 128], strides = [1, 1]} : vector<2x512xf32> to vector<2x128xf32>
    %95 = math.tanh %94 : vector<2x128xf32>
    %96 = vector.extract_strided_slice %81 {offsets = [0, 384], sizes = [2, 128], strides = [1, 1]} : vector<2x512xf32> to vector<2x128xf32>
    %97 = arith.negf %96 : vector<2x128xf32>
    %98 = math.exp %97 : vector<2x128xf32>
    %cst_14 = arith.constant 1.000000e+00 : f32
    %99 = vector.broadcast %cst_14 : f32 to vector<2x128xf32>
    %100 = arith.addf %99, %98 : vector<2x128xf32>
    %101 = arith.divf %99, %100 : vector<2x128xf32>
    %102 = arith.mulf %93, %46 : vector<2x128xf32>
    %103 = arith.mulf %87, %95 : vector<2x128xf32>
    %104 = arith.addf %102, %103 : vector<2x128xf32>
    %105 = math.tanh %104 : vector<2x128xf32>
    %106 = arith.mulf %101, %105 : vector<2x128xf32>
    %107 = arith.truncf %106 : vector<2x128xf32> to vector<2x128xbf16>
    %108 = arith.addf %20, %79 : vector<2x512xf32>
    %109 = vector.extract_strided_slice %108 {offsets = [0, 0], sizes = [2, 128], strides = [1, 1]} : vector<2x512xf32> to vector<2x128xf32>
    %110 = arith.negf %109 : vector<2x128xf32>
    %111 = math.exp %110 : vector<2x128xf32>
    %cst_15 = arith.constant 1.000000e+00 : f32
    %112 = vector.broadcast %cst_15 : f32 to vector<2x128xf32>
    %113 = arith.addf %112, %111 : vector<2x128xf32>
    %114 = arith.divf %112, %113 : vector<2x128xf32>
    %115 = vector.extract_strided_slice %108 {offsets = [0, 128], sizes = [2, 128], strides = [1, 1]} : vector<2x512xf32> to vector<2x128xf32>
    %116 = arith.negf %115 : vector<2x128xf32>
    %117 = math.exp %116 : vector<2x128xf32>
    %cst_16 = arith.constant 1.000000e+00 : f32
    %118 = vector.broadcast %cst_16 : f32 to vector<2x128xf32>
    %119 = arith.addf %118, %117 : vector<2x128xf32>
    %120 = arith.divf %118, %119 : vector<2x128xf32>
    %121 = vector.extract_strided_slice %108 {offsets = [0, 256], sizes = [2, 128], strides = [1, 1]} : vector<2x512xf32> to vector<2x128xf32>
    %122 = math.tanh %121 : vector<2x128xf32>
    %123 = vector.extract_strided_slice %108 {offsets = [0, 384], sizes = [2, 128], strides = [1, 1]} : vector<2x512xf32> to vector<2x128xf32>
    %124 = arith.negf %123 : vector<2x128xf32>
    %125 = math.exp %124 : vector<2x128xf32>
    %cst_17 = arith.constant 1.000000e+00 : f32
    %126 = vector.broadcast %cst_17 : f32 to vector<2x128xf32>
    %127 = arith.addf %126, %125 : vector<2x128xf32>
    %128 = arith.divf %126, %127 : vector<2x128xf32>
    %129 = arith.mulf %120, %72 : vector<2x128xf32>
    %130 = arith.mulf %114, %122 : vector<2x128xf32>
    %131 = arith.addf %129, %130 : vector<2x128xf32>
    %132 = math.tanh %131 : vector<2x128xf32>
    %133 = arith.mulf %128, %132 : vector<2x128xf32>
    %134 = arith.truncf %133 : vector<2x128xf32> to vector<2x128xbf16>
    %135 = tpu.concatenate %134, %107 in 1 : vector<2x128xbf16>, vector<2x128xbf16> -> vector<2x256xbf16>
    %c0_18 = arith.constant 0 : index
    %c0_19 = arith.constant 0 : index
    %136 = vector.load %arg1[%c0_18, %c0_19] : memref<256x1024xbf16, #tpu.memory_space<vmem>>, vector<256x1024xbf16>
    %cst_20 = arith.constant dense<0.000000e+00> : vector<2x1024xf32>
    %137 = tpu.matmul %135, %136, %cst_20 {dimension_numbers = #tpu.dot_dimension_numbers<[1], [0], [0], [1], [0, 0, 1, 1], [], []>} : vector<2x256xbf16>, vector<256x1024xbf16>, vector<2x1024xf32> -> vector<2x1024xf32>
    %138 = vector.extract_strided_slice %137 {offsets = [0, 0], sizes = [2, 512], strides = [1, 1]} : vector<2x1024xf32> to vector<2x512xf32>
    %139 = vector.extract_strided_slice %137 {offsets = [0, 512], sizes = [2, 512], strides = [1, 1]} : vector<2x1024xf32> to vector<2x512xf32>
    %140 = arith.addf %139, %10 : vector<2x512xf32>
    %141 = vector.extract_strided_slice %140 {offsets = [0, 0], sizes = [2, 128], strides = [1, 1]} : vector<2x512xf32> to vector<2x128xf32>
    %142 = arith.negf %141 : vector<2x128xf32>
    %143 = math.exp %142 : vector<2x128xf32>
    %cst_21 = arith.constant 1.000000e+00 : f32
    %144 = vector.broadcast %cst_21 : f32 to vector<2x128xf32>
    %145 = arith.addf %144, %143 : vector<2x128xf32>
    %146 = arith.divf %144, %145 : vector<2x128xf32>
    %147 = vector.extract_strided_slice %140 {offsets = [0, 128], sizes = [2, 128], strides = [1, 1]} : vector<2x512xf32> to vector<2x128xf32>
    %148 = arith.negf %147 : vector<2x128xf32>
    %149 = math.exp %148 : vector<2x128xf32>
    %cst_22 = arith.constant 1.000000e+00 : f32
    %150 = vector.broadcast %cst_22 : f32 to vector<2x128xf32>
    %151 = arith.addf %150, %149 : vector<2x128xf32>
    %152 = arith.divf %150, %151 : vector<2x128xf32>
    %153 = vector.extract_strided_slice %140 {offsets = [0, 256], sizes = [2, 128], strides = [1, 1]} : vector<2x512xf32> to vector<2x128xf32>
    %154 = math.tanh %153 : vector<2x128xf32>
    %155 = vector.extract_strided_slice %140 {offsets = [0, 384], sizes = [2, 128], strides = [1, 1]} : vector<2x512xf32> to vector<2x128xf32>
    %156 = arith.negf %155 : vector<2x128xf32>
    %157 = math.exp %156 : vector<2x128xf32>
    %cst_23 = arith.constant 1.000000e+00 : f32
    %158 = vector.broadcast %cst_23 : f32 to vector<2x128xf32>
    %159 = arith.addf %158, %157 : vector<2x128xf32>
    %160 = arith.divf %158, %159 : vector<2x128xf32>
    %161 = arith.mulf %152, %104 : vector<2x128xf32>
    %162 = arith.mulf %146, %154 : vector<2x128xf32>
    %163 = arith.addf %161, %162 : vector<2x128xf32>
    %164 = math.tanh %163 : vector<2x128xf32>
    %165 = arith.mulf %160, %164 : vector<2x128xf32>
    %166 = arith.truncf %165 : vector<2x128xf32> to vector<2x128xbf16>
    %167 = arith.addf %24, %138 : vector<2x512xf32>
    %168 = vector.extract_strided_slice %167 {offsets = [0, 0], sizes = [2, 128], strides = [1, 1]} : vector<2x512xf32> to vector<2x128xf32>
    %169 = arith.negf %168 : vector<2x128xf32>
    %170 = math.exp %169 : vector<2x128xf32>
    %cst_24 = arith.constant 1.000000e+00 : f32
    %171 = vector.broadcast %cst_24 : f32 to vector<2x128xf32>
    %172 = arith.addf %171, %170 : vector<2x128xf32>
    %173 = arith.divf %171, %172 : vector<2x128xf32>
    %174 = vector.extract_strided_slice %167 {offsets = [0, 128], sizes = [2, 128], strides = [1, 1]} : vector<2x512xf32> to vector<2x128xf32>
    %175 = arith.negf %174 : vector<2x128xf32>
    %176 = math.exp %175 : vector<2x128xf32>
    %cst_25 = arith.constant 1.000000e+00 : f32
    %177 = vector.broadcast %cst_25 : f32 to vector<2x128xf32>
    %178 = arith.addf %177, %176 : vector<2x128xf32>
    %179 = arith.divf %177, %178 : vector<2x128xf32>
    %180 = vector.extract_strided_slice %167 {offsets = [0, 256], sizes = [2, 128], strides = [1, 1]} : vector<2x512xf32> to vector<2x128xf32>
    %181 = math.tanh %180 : vector<2x128xf32>
    %182 = vector.extract_strided_slice %167 {offsets = [0, 384], sizes = [2, 128], strides = [1, 1]} : vector<2x512xf32> to vector<2x128xf32>
    %183 = arith.negf %182 : vector<2x128xf32>
    %184 = math.exp %183 : vector<2x128xf32>
    %cst_26 = arith.constant 1.000000e+00 : f32
    %185 = vector.broadcast %cst_26 : f32 to vector<2x128xf32>
    %186 = arith.addf %185, %184 : vector<2x128xf32>
    %187 = arith.divf %185, %186 : vector<2x128xf32>
    %188 = arith.mulf %179, %131 : vector<2x128xf32>
    %189 = arith.mulf %173, %181 : vector<2x128xf32>
    %190 = arith.addf %188, %189 : vector<2x128xf32>
    %191 = math.tanh %190 : vector<2x128xf32>
    %192 = arith.mulf %187, %191 : vector<2x128xf32>
    %193 = arith.truncf %192 : vector<2x128xf32> to vector<2x128xbf16>
    %194 = tpu.concatenate %193, %166 in 1 : vector<2x128xbf16>, vector<2x128xbf16> -> vector<2x256xbf16>
    %c0_27 = arith.constant 0 : index
    %c0_28 = arith.constant 0 : index
    %195 = vector.load %arg1[%c0_27, %c0_28] : memref<256x1024xbf16, #tpu.memory_space<vmem>>, vector<256x1024xbf16>
    %cst_29 = arith.constant dense<0.000000e+00> : vector<2x1024xf32>
    %196 = tpu.matmul %194, %195, %cst_29 {dimension_numbers = #tpu.dot_dimension_numbers<[1], [0], [0], [1], [0, 0, 1, 1], [], []>} : vector<2x256xbf16>, vector<256x1024xbf16>, vector<2x1024xf32> -> vector<2x1024xf32>
    %197 = vector.extract_strided_slice %196 {offsets = [0, 0], sizes = [2, 512], strides = [1, 1]} : vector<2x1024xf32> to vector<2x512xf32>
    %198 = vector.extract_strided_slice %196 {offsets = [0, 512], sizes = [2, 512], strides = [1, 1]} : vector<2x1024xf32> to vector<2x512xf32>
    %199 = arith.addf %198, %10 : vector<2x512xf32>
    %200 = vector.extract_strided_slice %199 {offsets = [0, 0], sizes = [2, 128], strides = [1, 1]} : vector<2x512xf32> to vector<2x128xf32>
    %201 = arith.negf %200 : vector<2x128xf32>
    %202 = math.exp %201 : vector<2x128xf32>
    %cst_30 = arith.constant 1.000000e+00 : f32
    %203 = vector.broadcast %cst_30 : f32 to vector<2x128xf32>
    %204 = arith.addf %203, %202 : vector<2x128xf32>
    %205 = arith.divf %203, %204 : vector<2x128xf32>
    %206 = vector.extract_strided_slice %199 {offsets = [0, 128], sizes = [2, 128], strides = [1, 1]} : vector<2x512xf32> to vector<2x128xf32>
    %207 = arith.negf %206 : vector<2x128xf32>
    %208 = math.exp %207 : vector<2x128xf32>
    %cst_31 = arith.constant 1.000000e+00 : f32
    %209 = vector.broadcast %cst_31 : f32 to vector<2x128xf32>
    %210 = arith.addf %209, %208 : vector<2x128xf32>
    %211 = arith.divf %209, %210 : vector<2x128xf32>
    %212 = vector.extract_strided_slice %199 {offsets = [0, 256], sizes = [2, 128], strides = [1, 1]} : vector<2x512xf32> to vector<2x128xf32>
    %213 = math.tanh %212 : vector<2x128xf32>
    %214 = vector.extract_strided_slice %199 {offsets = [0, 384], sizes = [2, 128], strides = [1, 1]} : vector<2x512xf32> to vector<2x128xf32>
    %215 = arith.negf %214 : vector<2x128xf32>
    %216 = math.exp %215 : vector<2x128xf32>
    %cst_32 = arith.constant 1.000000e+00 : f32
    %217 = vector.broadcast %cst_32 : f32 to vector<2x128xf32>
    %218 = arith.addf %217, %216 : vector<2x128xf32>
    %219 = arith.divf %217, %218 : vector<2x128xf32>
    %220 = arith.mulf %211, %163 : vector<2x128xf32>
    %221 = arith.mulf %205, %213 : vector<2x128xf32>
    %222 = arith.addf %220, %221 : vector<2x128xf32>
    %223 = math.tanh %222 : vector<2x128xf32>
    %224 = arith.mulf %219, %223 : vector<2x128xf32>
    %225 = arith.truncf %224 : vector<2x128xf32> to vector<2x128xbf16>
    %226 = arith.addf %28, %197 : vector<2x512xf32>
    %227 = vector.extract_strided_slice %226 {offsets = [0, 0], sizes = [2, 128], strides = [1, 1]} : vector<2x512xf32> to vector<2x128xf32>
    %228 = arith.negf %227 : vector<2x128xf32>
    %229 = math.exp %228 : vector<2x128xf32>
    %cst_33 = arith.constant 1.000000e+00 : f32
    %230 = vector.broadcast %cst_33 : f32 to vector<2x128xf32>
    %231 = arith.addf %230, %229 : vector<2x128xf32>
    %232 = arith.divf %230, %231 : vector<2x128xf32>
    %233 = vector.extract_strided_slice %226 {offsets = [0, 128], sizes = [2, 128], strides = [1, 1]} : vector<2x512xf32> to vector<2x128xf32>
    %234 = arith.negf %233 : vector<2x128xf32>
    %235 = math.exp %234 : vector<2x128xf32>
    %cst_34 = arith.constant 1.000000e+00 : f32
    %236 = vector.broadcast %cst_34 : f32 to vector<2x128xf32>
    %237 = arith.addf %236, %235 : vector<2x128xf32>
    %238 = arith.divf %236, %237 : vector<2x128xf32>
    %239 = vector.extract_strided_slice %226 {offsets = [0, 256], sizes = [2, 128], strides = [1, 1]} : vector<2x512xf32> to vector<2x128xf32>
    %240 = math.tanh %239 : vector<2x128xf32>
    %241 = vector.extract_strided_slice %226 {offsets = [0, 384], sizes = [2, 128], strides = [1, 1]} : vector<2x512xf32> to vector<2x128xf32>
    %242 = arith.negf %241 : vector<2x128xf32>
    %243 = math.exp %242 : vector<2x128xf32>
    %cst_35 = arith.constant 1.000000e+00 : f32
    %244 = vector.broadcast %cst_35 : f32 to vector<2x128xf32>
    %245 = arith.addf %244, %243 : vector<2x128xf32>
    %246 = arith.divf %244, %245 : vector<2x128xf32>
    %247 = arith.mulf %238, %190 : vector<2x128xf32>
    %248 = arith.mulf %232, %240 : vector<2x128xf32>
    %249 = arith.addf %247, %248 : vector<2x128xf32>
    %250 = math.tanh %249 : vector<2x128xf32>
    %251 = arith.mulf %246, %250 : vector<2x128xf32>
    %252 = arith.truncf %251 : vector<2x128xf32> to vector<2x128xbf16>
    %253 = tpu.concatenate %252, %225 in 1 : vector<2x128xbf16>, vector<2x128xbf16> -> vector<2x256xbf16>
    %c0_36 = arith.constant 0 : index
    %c0_37 = arith.constant 0 : index
    %254 = vector.load %arg1[%c0_36, %c0_37] : memref<256x1024xbf16, #tpu.memory_space<vmem>>, vector<256x1024xbf16>
    %cst_38 = arith.constant dense<0.000000e+00> : vector<2x1024xf32>
    %255 = tpu.matmul %253, %254, %cst_38 {dimension_numbers = #tpu.dot_dimension_numbers<[1], [0], [0], [1], [0, 0, 1, 1], [], []>} : vector<2x256xbf16>, vector<256x1024xbf16>, vector<2x1024xf32> -> vector<2x1024xf32>
    %256 = vector.extract_strided_slice %255 {offsets = [0, 0], sizes = [2, 512], strides = [1, 1]} : vector<2x1024xf32> to vector<2x512xf32>
    %257 = vector.extract_strided_slice %255 {offsets = [0, 512], sizes = [2, 512], strides = [1, 1]} : vector<2x1024xf32> to vector<2x512xf32>
    %258 = arith.addf %257, %10 : vector<2x512xf32>
    %259 = vector.extract_strided_slice %258 {offsets = [0, 0], sizes = [2, 128], strides = [1, 1]} : vector<2x512xf32> to vector<2x128xf32>
    %260 = arith.negf %259 : vector<2x128xf32>
    %261 = math.exp %260 : vector<2x128xf32>
    %cst_39 = arith.constant 1.000000e+00 : f32
    %262 = vector.broadcast %cst_39 : f32 to vector<2x128xf32>
    %263 = arith.addf %262, %261 : vector<2x128xf32>
    %264 = arith.divf %262, %263 : vector<2x128xf32>
    %265 = vector.extract_strided_slice %258 {offsets = [0, 128], sizes = [2, 128], strides = [1, 1]} : vector<2x512xf32> to vector<2x128xf32>
    %266 = arith.negf %265 : vector<2x128xf32>
    %267 = math.exp %266 : vector<2x128xf32>
    %cst_40 = arith.constant 1.000000e+00 : f32
    %268 = vector.broadcast %cst_40 : f32 to vector<2x128xf32>
    %269 = arith.addf %268, %267 : vector<2x128xf32>
    %270 = arith.divf %268, %269 : vector<2x128xf32>
    %271 = vector.extract_strided_slice %258 {offsets = [0, 256], sizes = [2, 128], strides = [1, 1]} : vector<2x512xf32> to vector<2x128xf32>
    %272 = math.tanh %271 : vector<2x128xf32>
    %273 = vector.extract_strided_slice %258 {offsets = [0, 384], sizes = [2, 128], strides = [1, 1]} : vector<2x512xf32> to vector<2x128xf32>
    %274 = arith.negf %273 : vector<2x128xf32>
    %275 = math.exp %274 : vector<2x128xf32>
    %cst_41 = arith.constant 1.000000e+00 : f32
    %276 = vector.broadcast %cst_41 : f32 to vector<2x128xf32>
    %277 = arith.addf %276, %275 : vector<2x128xf32>
    %278 = arith.divf %276, %277 : vector<2x128xf32>
    %279 = arith.mulf %270, %222 : vector<2x128xf32>
    %280 = arith.mulf %264, %272 : vector<2x128xf32>
    %281 = arith.addf %279, %280 : vector<2x128xf32>
    %282 = math.tanh %281 : vector<2x128xf32>
    %283 = arith.mulf %278, %282 : vector<2x128xf32>
    %284 = arith.truncf %283 : vector<2x128xf32> to vector<2x128xbf16>
    %285 = arith.addf %32, %256 : vector<2x512xf32>
    %286 = vector.extract_strided_slice %285 {offsets = [0, 0], sizes = [2, 128], strides = [1, 1]} : vector<2x512xf32> to vector<2x128xf32>
    %287 = arith.negf %286 : vector<2x128xf32>
    %288 = math.exp %287 : vector<2x128xf32>
    %cst_42 = arith.constant 1.000000e+00 : f32
    %289 = vector.broadcast %cst_42 : f32 to vector<2x128xf32>
    %290 = arith.addf %289, %288 : vector<2x128xf32>
    %291 = arith.divf %289, %290 : vector<2x128xf32>
    %292 = vector.extract_strided_slice %285 {offsets = [0, 128], sizes = [2, 128], strides = [1, 1]} : vector<2x512xf32> to vector<2x128xf32>
    %293 = arith.negf %292 : vector<2x128xf32>
    %294 = math.exp %293 : vector<2x128xf32>
    %cst_43 = arith.constant 1.000000e+00 : f32
    %295 = vector.broadcast %cst_43 : f32 to vector<2x128xf32>
    %296 = arith.addf %295, %294 : vector<2x128xf32>
    %297 = arith.divf %295, %296 : vector<2x128xf32>
    %298 = vector.extract_strided_slice %285 {offsets = [0, 256], sizes = [2, 128], strides = [1, 1]} : vector<2x512xf32> to vector<2x128xf32>
    %299 = math.tanh %298 : vector<2x128xf32>
    %300 = vector.extract_strided_slice %285 {offsets = [0, 384], sizes = [2, 128], strides = [1, 1]} : vector<2x512xf32> to vector<2x128xf32>
    %301 = arith.negf %300 : vector<2x128xf32>
    %302 = math.exp %301 : vector<2x128xf32>
    %cst_44 = arith.constant 1.000000e+00 : f32
    %303 = vector.broadcast %cst_44 : f32 to vector<2x128xf32>
    %304 = arith.addf %303, %302 : vector<2x128xf32>
    %305 = arith.divf %303, %304 : vector<2x128xf32>
    %306 = arith.mulf %297, %249 : vector<2x128xf32>
    %307 = arith.mulf %291, %299 : vector<2x128xf32>
    %308 = arith.addf %306, %307 : vector<2x128xf32>
    %309 = math.tanh %308 : vector<2x128xf32>
    %310 = arith.mulf %305, %309 : vector<2x128xf32>
    %311 = arith.truncf %310 : vector<2x128xf32> to vector<2x128xbf16>
    %312 = tpu.concatenate %311, %284 in 1 : vector<2x128xbf16>, vector<2x128xbf16> -> vector<2x256xbf16>
    %c0_45 = arith.constant 0 : index
    %c0_46 = arith.constant 0 : index
    %313 = vector.load %arg1[%c0_45, %c0_46] : memref<256x1024xbf16, #tpu.memory_space<vmem>>, vector<256x1024xbf16>
    %cst_47 = arith.constant dense<0.000000e+00> : vector<2x1024xf32>
    %314 = tpu.matmul %312, %313, %cst_47 {dimension_numbers = #tpu.dot_dimension_numbers<[1], [0], [0], [1], [0, 0, 1, 1], [], []>} : vector<2x256xbf16>, vector<256x1024xbf16>, vector<2x1024xf32> -> vector<2x1024xf32>
    %315 = vector.extract_strided_slice %314 {offsets = [0, 0], sizes = [2, 512], strides = [1, 1]} : vector<2x1024xf32> to vector<2x512xf32>
    %316 = vector.extract_strided_slice %314 {offsets = [0, 512], sizes = [2, 512], strides = [1, 1]} : vector<2x1024xf32> to vector<2x512xf32>
    %317 = arith.addf %316, %10 : vector<2x512xf32>
    %318 = vector.extract_strided_slice %317 {offsets = [0, 0], sizes = [2, 128], strides = [1, 1]} : vector<2x512xf32> to vector<2x128xf32>
    %319 = arith.negf %318 : vector<2x128xf32>
    %320 = math.exp %319 : vector<2x128xf32>
    %cst_48 = arith.constant 1.000000e+00 : f32
    %321 = vector.broadcast %cst_48 : f32 to vector<2x128xf32>
    %322 = arith.addf %321, %320 : vector<2x128xf32>
    %323 = arith.divf %321, %322 : vector<2x128xf32>
    %324 = vector.extract_strided_slice %317 {offsets = [0, 128], sizes = [2, 128], strides = [1, 1]} : vector<2x512xf32> to vector<2x128xf32>
    %325 = arith.negf %324 : vector<2x128xf32>
    %326 = math.exp %325 : vector<2x128xf32>
    %cst_49 = arith.constant 1.000000e+00 : f32
    %327 = vector.broadcast %cst_49 : f32 to vector<2x128xf32>
    %328 = arith.addf %327, %326 : vector<2x128xf32>
    %329 = arith.divf %327, %328 : vector<2x128xf32>
    %330 = vector.extract_strided_slice %317 {offsets = [0, 256], sizes = [2, 128], strides = [1, 1]} : vector<2x512xf32> to vector<2x128xf32>
    %331 = math.tanh %330 : vector<2x128xf32>
    %332 = vector.extract_strided_slice %317 {offsets = [0, 384], sizes = [2, 128], strides = [1, 1]} : vector<2x512xf32> to vector<2x128xf32>
    %333 = arith.negf %332 : vector<2x128xf32>
    %334 = math.exp %333 : vector<2x128xf32>
    %cst_50 = arith.constant 1.000000e+00 : f32
    %335 = vector.broadcast %cst_50 : f32 to vector<2x128xf32>
    %336 = arith.addf %335, %334 : vector<2x128xf32>
    %337 = arith.divf %335, %336 : vector<2x128xf32>
    %338 = arith.mulf %329, %281 : vector<2x128xf32>
    %339 = arith.mulf %323, %331 : vector<2x128xf32>
    %340 = arith.addf %338, %339 : vector<2x128xf32>
    %341 = math.tanh %340 : vector<2x128xf32>
    %342 = arith.mulf %337, %341 : vector<2x128xf32>
    %343 = arith.truncf %342 : vector<2x128xf32> to vector<2x128xbf16>
    %344 = arith.addf %36, %315 : vector<2x512xf32>
    %345 = vector.extract_strided_slice %344 {offsets = [0, 0], sizes = [2, 128], strides = [1, 1]} : vector<2x512xf32> to vector<2x128xf32>
    %346 = arith.negf %345 : vector<2x128xf32>
    %347 = math.exp %346 : vector<2x128xf32>
    %cst_51 = arith.constant 1.000000e+00 : f32
    %348 = vector.broadcast %cst_51 : f32 to vector<2x128xf32>
    %349 = arith.addf %348, %347 : vector<2x128xf32>
    %350 = arith.divf %348, %349 : vector<2x128xf32>
    %351 = vector.extract_strided_slice %344 {offsets = [0, 128], sizes = [2, 128], strides = [1, 1]} : vector<2x512xf32> to vector<2x128xf32>
    %352 = arith.negf %351 : vector<2x128xf32>
    %353 = math.exp %352 : vector<2x128xf32>
    %cst_52 = arith.constant 1.000000e+00 : f32
    %354 = vector.broadcast %cst_52 : f32 to vector<2x128xf32>
    %355 = arith.addf %354, %353 : vector<2x128xf32>
    %356 = arith.divf %354, %355 : vector<2x128xf32>
    %357 = vector.extract_strided_slice %344 {offsets = [0, 256], sizes = [2, 128], strides = [1, 1]} : vector<2x512xf32> to vector<2x128xf32>
    %358 = math.tanh %357 : vector<2x128xf32>
    %359 = vector.extract_strided_slice %344 {offsets = [0, 384], sizes = [2, 128], strides = [1, 1]} : vector<2x512xf32> to vector<2x128xf32>
    %360 = arith.negf %359 : vector<2x128xf32>
    %361 = math.exp %360 : vector<2x128xf32>
    %cst_53 = arith.constant 1.000000e+00 : f32
    %362 = vector.broadcast %cst_53 : f32 to vector<2x128xf32>
    %363 = arith.addf %362, %361 : vector<2x128xf32>
    %364 = arith.divf %362, %363 : vector<2x128xf32>
    %365 = arith.mulf %356, %308 : vector<2x128xf32>
    %366 = arith.mulf %350, %358 : vector<2x128xf32>
    %367 = arith.addf %365, %366 : vector<2x128xf32>
    %368 = math.tanh %367 : vector<2x128xf32>
    %369 = arith.mulf %364, %368 : vector<2x128xf32>
    %370 = arith.truncf %369 : vector<2x128xf32> to vector<2x128xbf16>
    %371 = tpu.concatenate %370, %343 in 1 : vector<2x128xbf16>, vector<2x128xbf16> -> vector<2x256xbf16>
    %c0_54 = arith.constant 0 : index
    %c0_55 = arith.constant 0 : index
    %372 = vector.load %arg1[%c0_54, %c0_55] : memref<256x1024xbf16, #tpu.memory_space<vmem>>, vector<256x1024xbf16>
    %cst_56 = arith.constant dense<0.000000e+00> : vector<2x1024xf32>
    %373 = tpu.matmul %371, %372, %cst_56 {dimension_numbers = #tpu.dot_dimension_numbers<[1], [0], [0], [1], [0, 0, 1, 1], [], []>} : vector<2x256xbf16>, vector<256x1024xbf16>, vector<2x1024xf32> -> vector<2x1024xf32>
    %374 = vector.extract_strided_slice %373 {offsets = [0, 0], sizes = [2, 512], strides = [1, 1]} : vector<2x1024xf32> to vector<2x512xf32>
    %375 = vector.extract_strided_slice %373 {offsets = [0, 512], sizes = [2, 512], strides = [1, 1]} : vector<2x1024xf32> to vector<2x512xf32>
    %376 = arith.addf %375, %10 : vector<2x512xf32>
    %377 = vector.extract_strided_slice %376 {offsets = [0, 0], sizes = [2, 128], strides = [1, 1]} : vector<2x512xf32> to vector<2x128xf32>
    %378 = arith.negf %377 : vector<2x128xf32>
    %379 = math.exp %378 : vector<2x128xf32>
    %cst_57 = arith.constant 1.000000e+00 : f32
    %380 = vector.broadcast %cst_57 : f32 to vector<2x128xf32>
    %381 = arith.addf %380, %379 : vector<2x128xf32>
    %382 = arith.divf %380, %381 : vector<2x128xf32>
    %383 = vector.extract_strided_slice %376 {offsets = [0, 128], sizes = [2, 128], strides = [1, 1]} : vector<2x512xf32> to vector<2x128xf32>
    %384 = arith.negf %383 : vector<2x128xf32>
    %385 = math.exp %384 : vector<2x128xf32>
    %cst_58 = arith.constant 1.000000e+00 : f32
    %386 = vector.broadcast %cst_58 : f32 to vector<2x128xf32>
    %387 = arith.addf %386, %385 : vector<2x128xf32>
    %388 = arith.divf %386, %387 : vector<2x128xf32>
    %389 = vector.extract_strided_slice %376 {offsets = [0, 256], sizes = [2, 128], strides = [1, 1]} : vector<2x512xf32> to vector<2x128xf32>
    %390 = math.tanh %389 : vector<2x128xf32>
    %391 = vector.extract_strided_slice %376 {offsets = [0, 384], sizes = [2, 128], strides = [1, 1]} : vector<2x512xf32> to vector<2x128xf32>
    %392 = arith.negf %391 : vector<2x128xf32>
    %393 = math.exp %392 : vector<2x128xf32>
    %cst_59 = arith.constant 1.000000e+00 : f32
    %394 = vector.broadcast %cst_59 : f32 to vector<2x128xf32>
    %395 = arith.addf %394, %393 : vector<2x128xf32>
    %396 = arith.divf %394, %395 : vector<2x128xf32>
    %397 = arith.mulf %388, %340 : vector<2x128xf32>
    %398 = arith.mulf %382, %390 : vector<2x128xf32>
    %399 = arith.addf %397, %398 : vector<2x128xf32>
    %400 = math.tanh %399 : vector<2x128xf32>
    %401 = arith.mulf %396, %400 : vector<2x128xf32>
    %402 = arith.truncf %401 : vector<2x128xf32> to vector<2x128xbf16>
    %403 = arith.addf %40, %374 : vector<2x512xf32>
    %404 = vector.extract_strided_slice %403 {offsets = [0, 0], sizes = [2, 128], strides = [1, 1]} : vector<2x512xf32> to vector<2x128xf32>
    %405 = arith.negf %404 : vector<2x128xf32>
    %406 = math.exp %405 : vector<2x128xf32>
    %cst_60 = arith.constant 1.000000e+00 : f32
    %407 = vector.broadcast %cst_60 : f32 to vector<2x128xf32>
    %408 = arith.addf %407, %406 : vector<2x128xf32>
    %409 = arith.divf %407, %408 : vector<2x128xf32>
    %410 = vector.extract_strided_slice %403 {offsets = [0, 128], sizes = [2, 128], strides = [1, 1]} : vector<2x512xf32> to vector<2x128xf32>
    %411 = arith.negf %410 : vector<2x128xf32>
    %412 = math.exp %411 : vector<2x128xf32>
    %cst_61 = arith.constant 1.000000e+00 : f32
    %413 = vector.broadcast %cst_61 : f32 to vector<2x128xf32>
    %414 = arith.addf %413, %412 : vector<2x128xf32>
    %415 = arith.divf %413, %414 : vector<2x128xf32>
    %416 = vector.extract_strided_slice %403 {offsets = [0, 256], sizes = [2, 128], strides = [1, 1]} : vector<2x512xf32> to vector<2x128xf32>
    %417 = math.tanh %416 : vector<2x128xf32>
    %418 = vector.extract_strided_slice %403 {offsets = [0, 384], sizes = [2, 128], strides = [1, 1]} : vector<2x512xf32> to vector<2x128xf32>
    %419 = arith.negf %418 : vector<2x128xf32>
    %420 = math.exp %419 : vector<2x128xf32>
    %cst_62 = arith.constant 1.000000e+00 : f32
    %421 = vector.broadcast %cst_62 : f32 to vector<2x128xf32>
    %422 = arith.addf %421, %420 : vector<2x128xf32>
    %423 = arith.divf %421, %422 : vector<2x128xf32>
    %424 = arith.mulf %415, %367 : vector<2x128xf32>
    %425 = arith.mulf %409, %417 : vector<2x128xf32>
    %426 = arith.addf %424, %425 : vector<2x128xf32>
    %427 = math.tanh %426 : vector<2x128xf32>
    %428 = arith.mulf %423, %427 : vector<2x128xf32>
    %429 = arith.truncf %428 : vector<2x128xf32> to vector<2x128xbf16>
    %430 = tpu.concatenate %429, %402 in 1 : vector<2x128xbf16>, vector<2x128xbf16> -> vector<2x256xbf16>
    %c0_63 = arith.constant 0 : index
    %c0_64 = arith.constant 0 : index
    %431 = vector.load %arg1[%c0_63, %c0_64] : memref<256x1024xbf16, #tpu.memory_space<vmem>>, vector<256x1024xbf16>
    %cst_65 = arith.constant dense<0.000000e+00> : vector<2x1024xf32>
    %432 = tpu.matmul %430, %431, %cst_65 {dimension_numbers = #tpu.dot_dimension_numbers<[1], [0], [0], [1], [0, 0, 1, 1], [], []>} : vector<2x256xbf16>, vector<256x1024xbf16>, vector<2x1024xf32> -> vector<2x1024xf32>
    %433 = vector.extract_strided_slice %432 {offsets = [0, 0], sizes = [2, 512], strides = [1, 1]} : vector<2x1024xf32> to vector<2x512xf32>
    %434 = vector.extract_strided_slice %432 {offsets = [0, 512], sizes = [2, 512], strides = [1, 1]} : vector<2x1024xf32> to vector<2x512xf32>
    %435 = arith.addf %434, %10 : vector<2x512xf32>
    %436 = vector.extract_strided_slice %435 {offsets = [0, 0], sizes = [2, 128], strides = [1, 1]} : vector<2x512xf32> to vector<2x128xf32>
    %437 = arith.negf %436 : vector<2x128xf32>
    %438 = math.exp %437 : vector<2x128xf32>
    %cst_66 = arith.constant 1.000000e+00 : f32
    %439 = vector.broadcast %cst_66 : f32 to vector<2x128xf32>
    %440 = arith.addf %439, %438 : vector<2x128xf32>
    %441 = arith.divf %439, %440 : vector<2x128xf32>
    %442 = vector.extract_strided_slice %435 {offsets = [0, 128], sizes = [2, 128], strides = [1, 1]} : vector<2x512xf32> to vector<2x128xf32>
    %443 = arith.negf %442 : vector<2x128xf32>
    %444 = math.exp %443 : vector<2x128xf32>
    %cst_67 = arith.constant 1.000000e+00 : f32
    %445 = vector.broadcast %cst_67 : f32 to vector<2x128xf32>
    %446 = arith.addf %445, %444 : vector<2x128xf32>
    %447 = arith.divf %445, %446 : vector<2x128xf32>
    %448 = vector.extract_strided_slice %435 {offsets = [0, 256], sizes = [2, 128], strides = [1, 1]} : vector<2x512xf32> to vector<2x128xf32>
    %449 = math.tanh %448 : vector<2x128xf32>
    %450 = vector.extract_strided_slice %435 {offsets = [0, 384], sizes = [2, 128], strides = [1, 1]} : vector<2x512xf32> to vector<2x128xf32>
    %451 = arith.negf %450 : vector<2x128xf32>
    %452 = math.exp %451 : vector<2x128xf32>
    %cst_68 = arith.constant 1.000000e+00 : f32
    %453 = vector.broadcast %cst_68 : f32 to vector<2x128xf32>
    %454 = arith.addf %453, %452 : vector<2x128xf32>
    %455 = arith.divf %453, %454 : vector<2x128xf32>
    %456 = arith.mulf %447, %399 : vector<2x128xf32>
    %457 = arith.mulf %441, %449 : vector<2x128xf32>
    %458 = arith.addf %456, %457 : vector<2x128xf32>
    %459 = math.tanh %458 : vector<2x128xf32>
    %460 = arith.mulf %455, %459 : vector<2x128xf32>
    %461 = arith.truncf %460 : vector<2x128xf32> to vector<2x128xbf16>
    %462 = arith.addf %44, %433 : vector<2x512xf32>
    %463 = vector.extract_strided_slice %462 {offsets = [0, 0], sizes = [2, 128], strides = [1, 1]} : vector<2x512xf32> to vector<2x128xf32>
    %464 = arith.negf %463 : vector<2x128xf32>
    %465 = math.exp %464 : vector<2x128xf32>
    %cst_69 = arith.constant 1.000000e+00 : f32
    %466 = vector.broadcast %cst_69 : f32 to vector<2x128xf32>
    %467 = arith.addf %466, %465 : vector<2x128xf32>
    %468 = arith.divf %466, %467 : vector<2x128xf32>
    %469 = vector.extract_strided_slice %462 {offsets = [0, 128], sizes = [2, 128], strides = [1, 1]} : vector<2x512xf32> to vector<2x128xf32>
    %470 = arith.negf %469 : vector<2x128xf32>
    %471 = math.exp %470 : vector<2x128xf32>
    %cst_70 = arith.constant 1.000000e+00 : f32
    %472 = vector.broadcast %cst_70 : f32 to vector<2x128xf32>
    %473 = arith.addf %472, %471 : vector<2x128xf32>
    %474 = arith.divf %472, %473 : vector<2x128xf32>
    %475 = vector.extract_strided_slice %462 {offsets = [0, 256], sizes = [2, 128], strides = [1, 1]} : vector<2x512xf32> to vector<2x128xf32>
    %476 = math.tanh %475 : vector<2x128xf32>
    %477 = vector.extract_strided_slice %462 {offsets = [0, 384], sizes = [2, 128], strides = [1, 1]} : vector<2x512xf32> to vector<2x128xf32>
    %478 = arith.negf %477 : vector<2x128xf32>
    %479 = math.exp %478 : vector<2x128xf32>
    %cst_71 = arith.constant 1.000000e+00 : f32
    %480 = vector.broadcast %cst_71 : f32 to vector<2x128xf32>
    %481 = arith.addf %480, %479 : vector<2x128xf32>
    %482 = arith.divf %480, %481 : vector<2x128xf32>
    %483 = arith.mulf %474, %426 : vector<2x128xf32>
    %484 = arith.mulf %468, %476 : vector<2x128xf32>
    %485 = arith.addf %483, %484 : vector<2x128xf32>
    %486 = math.tanh %485 : vector<2x128xf32>
    %487 = arith.mulf %482, %486 : vector<2x128xf32>
    %488 = arith.truncf %487 : vector<2x128xf32> to vector<2x128xbf16>
    %489 = tpu.concatenate %488, %461 in 1 : vector<2x128xbf16>, vector<2x128xbf16> -> vector<2x256xbf16>
    %c0_72 = arith.constant 0 : index
    %c0_73 = arith.constant 0 : index
    %490 = vector.load %arg1[%c0_72, %c0_73] : memref<256x1024xbf16, #tpu.memory_space<vmem>>, vector<256x1024xbf16>
    %cst_74 = arith.constant dense<0.000000e+00> : vector<2x1024xf32>
    %491 = tpu.matmul %489, %490, %cst_74 {dimension_numbers = #tpu.dot_dimension_numbers<[1], [0], [0], [1], [0, 0, 1, 1], [], []>} : vector<2x256xbf16>, vector<256x1024xbf16>, vector<2x1024xf32> -> vector<2x1024xf32>
    %492 = vector.extract_strided_slice %491 {offsets = [0, 512], sizes = [2, 512], strides = [1, 1]} : vector<2x1024xf32> to vector<2x512xf32>
    %493 = arith.addf %492, %10 : vector<2x512xf32>
    %494 = vector.extract_strided_slice %493 {offsets = [0, 0], sizes = [2, 128], strides = [1, 1]} : vector<2x512xf32> to vector<2x128xf32>
    %495 = arith.negf %494 : vector<2x128xf32>
    %496 = math.exp %495 : vector<2x128xf32>
    %cst_75 = arith.constant 1.000000e+00 : f32
    %497 = vector.broadcast %cst_75 : f32 to vector<2x128xf32>
    %498 = arith.addf %497, %496 : vector<2x128xf32>
    %499 = arith.divf %497, %498 : vector<2x128xf32>
    %500 = vector.extract_strided_slice %493 {offsets = [0, 128], sizes = [2, 128], strides = [1, 1]} : vector<2x512xf32> to vector<2x128xf32>
    %501 = arith.negf %500 : vector<2x128xf32>
    %502 = math.exp %501 : vector<2x128xf32>
    %cst_76 = arith.constant 1.000000e+00 : f32
    %503 = vector.broadcast %cst_76 : f32 to vector<2x128xf32>
    %504 = arith.addf %503, %502 : vector<2x128xf32>
    %505 = arith.divf %503, %504 : vector<2x128xf32>
    %506 = vector.extract_strided_slice %493 {offsets = [0, 256], sizes = [2, 128], strides = [1, 1]} : vector<2x512xf32> to vector<2x128xf32>
    %507 = math.tanh %506 : vector<2x128xf32>
    %508 = vector.extract_strided_slice %493 {offsets = [0, 384], sizes = [2, 128], strides = [1, 1]} : vector<2x512xf32> to vector<2x128xf32>
    %509 = arith.negf %508 : vector<2x128xf32>
    %510 = math.exp %509 : vector<2x128xf32>
    %cst_77 = arith.constant 1.000000e+00 : f32
    %511 = vector.broadcast %cst_77 : f32 to vector<2x128xf32>
    %512 = arith.addf %511, %510 : vector<2x128xf32>
    %513 = arith.divf %511, %512 : vector<2x128xf32>
    %514 = arith.mulf %505, %458 : vector<2x128xf32>
    %515 = arith.mulf %499, %507 : vector<2x128xf32>
    %516 = arith.addf %514, %515 : vector<2x128xf32>
    %517 = math.tanh %516 : vector<2x128xf32>
    %518 = arith.mulf %513, %517 : vector<2x128xf32>
    %519 = vector.broadcast %11 : vector<1x128xf32> to vector<2x128xf32>
    %520 = arith.mulf %518, %519 : vector<2x128xf32>
    %cst_78 = arith.constant dense<0.000000e+00> : vector<2xf32>
    %521 = vector.multi_reduction <add>, %520, %cst_78 [1] : vector<2x128xf32> to vector<2xf32>
    %522 = vector.shape_cast %521 : vector<2xf32> to vector<2x1xf32>
    %523 = vector.broadcast %12 : vector<1x1xf32> to vector<2x1xf32>
    %524 = arith.addf %522, %523 : vector<2x1xf32>
    %c0_79 = arith.constant 0 : index
    %c0_80 = arith.constant 0 : index
    %525 = vector.load %arg3[%c0_79, %c0_80] : memref<2x1xf32, #tpu.memory_space<vmem>>, vector<2x1xf32>
    tpu.vector_store %arg3[%c0_79, %c0_80], %524 {strides = array<i32>} : memref<2x1xf32, #tpu.memory_space<vmem>>, vector<2x1xf32>,
    return
  }
}

</mosaic_0001>

<bundles_post_ra>
// kernel: lstm_model_forward.1
= control target key start
LH: loop header
LB: loop body
LE: loop exit
PB: predicated region body
PF: predicated region fallthrough
CT: control target
= control target key end

     0   :  { %8 = vsyncpa [#allocation3], 0  ;;  %s4727_s0 = inlined_call_operand.hbm [shape: f32[2,8], index: 0, kind: input, shape index: {}]   ;;  %s4728_s1 = inlined_call_operand.hbm [shape: bf16[256,1024], index: 1, kind: input, shape index: {}]   ;;  %s4729_s2 = inlined_call_operand.hbm [shape: f32[8,512], index: 2, kind: input, shape index: {}]   ;;  %s4730_s3 = inlined_call_operand.vmem [shape: f32[2,1], index: 3, kind: output, shape index: {}]  }
   0x1   :  { %9 = vsyncpa [#allocation5], 0  ;;  %s3206_s12 = smov [#allocation4]  }
   0x2   :  { %s25_s13 = sshll.u32 %s3206_s12, 4  ;;  %s26_s13 = int_to_ptr.vmem [resolvable:$true] %s25_s13 }
   0x3   :  { %s3150_s14 = scalar_lea.vmem %s26_s13, 16384  ;;  %p3155_p1 = scmp.lt.s32.totalorder %s26_s13, %s26_s13 }
   0x4   :  { %p3151_p0 = scmp.ne.s32.totalorder %s26_s13, %s3150_s14  ;;  %p3156_p2 = scmp.lt.s32.totalorder %s3150_s14, %s3150_s14 }
   0x6   :  { %p3157_p3 = por %p3156_p2, %p3155_p1 }
   0x8   :  { %p3158_p4 = pnand %p3157_p3, %p3151_p0 }
   0xa   :  { %3161 = shalt.err (!%p3158_p4)
}
   0xb   :  { %s3207_s15 = smov 512   ;;  %s3208_s16 = smov 32  }
   0xc   :  { %31 = dma.hbm_to_vmem [thread:$0]  %s4728_s1, 16384, %s26_s13, [#allocation5], %s3207_s15, %s3207_s15, %s3208_s16  }
   0xd   :  { %s3209_s19 = smov [#allocation2]   ;;  %s3210_s21 = smov [#allocation6]  }
   0xe   :  { %s16_s20 = sshll.u32 %s3209_s19, 4  ;;  %s38_s22 = sshll.u32 %s3210_s21, 4  ;;  %s17_s20 = int_to_ptr.vmem [resolvable:$true] %s16_s20  ;;  %s39_s22 = int_to_ptr.vmem [resolvable:$true] %s38_s22 }
   0xf   :  { %s3170_s23 = scalar_lea.vmem %s17_s20, 32  ;;  %p3175_p6 = scmp.lt.s32.totalorder %s17_s20, %s17_s20 }
  0x10   :  { %p3171_p5 = scmp.ne.s32.totalorder %s17_s20, %s3170_s23  ;;  %p3176_p7 = scmp.lt.s32.totalorder %s3170_s23, %s3170_s23 }
  0x12   :  { %p3177_p8 = por %p3176_p7, %p3175_p6 }
  0x14   :  { %p3178_p9 = pnand %p3177_p8, %p3171_p5 }
  0x16   :  { %3181 = shalt.err (!%p3178_p9)
}
  0x17   :  { %19 = dma.hbm_to_vmem [thread:$0]  %s4727_s0, 32, %s17_s20, [#allocation3]  }
  0x18   :  { %s3190_s26 = scalar_lea.vmem %s39_s22, 512  ;;  %p3195_p11 = scmp.lt.s32.totalorder %s39_s22, %s39_s22 }
  0x19   :  { %p3191_p10 = scmp.ne.s32.totalorder %s39_s22, %s3190_s26  ;;  %p3196_p12 = scmp.lt.s32.totalorder %s3190_s26, %s3190_s26 }
  0x1b   :  { %p3197_p13 = por %p3196_p12, %p3195_p11 }
  0x1d   :  { %p3198_p0 = pnand %p3197_p13, %p3191_p10 }
  0x1f   :  { %3201 = shalt.err (!%p3198_p0)
}
  0x20   :  { %41 = dma.hbm_to_vmem [thread:$0]  %s4729_s2, 512, %s39_s22, [#allocation5]  }
  0x21   :  { %3202 = dma.done.wait [#allocation3], 32  }
  0x22   :  { %3203 = vsyncadd [#allocation3], 4294967264 }
  0x23   :  { %3204 = dma.done.wait [#allocation5], 16896  }
  0x24   :  { %3205 = vsyncadd [#allocation5], 4294950400  ;;  %v4731_v0 = vmov 0   ;;  %v3251_v1 = vld [vmem:[#allocation2] sm:$0x3]  ;;  %v287_v2 = vld [vmem:[#allocation4 + $0x1c0] sm:$0xff] }
  0x25   :  { %2874 = vset.pattern.permute.xlu0 %v4731_v0  ;;  %1031 = vmatprep.mubr.bf16.mxu0 %v4731_v0  ;;  %v291_v3 = vld [vmem:[#allocation4 + $0x1e0] sm:$0xff]  ;;  %v288_v5 = vld [vmem:[#allocation4 + $0x1c8] sm:$0xff]  ;;  %vm2668_vm0 = vcmask 1041408   ;;  %vm2677_vm1 = vcmask 1024  }
  0x26   :  { %1072 = vmatprep.mubr.bf16.mxu1 %v4731_v0  ;;  %107 = vperm.xlu0 %2874, %v3251_v1   ;;  %v3254_v4 = vcombine.high %v287_v2, %v291_v3  ;;  %v292_v6 = vld [vmem:[#allocation4 + $0x1e8] sm:$0xff]  ;;  %v3256_v7 = vcombine.low %v287_v2, %v291_v3  ;;  %v279_v8 = vld [vmem:[#allocation4 + $0x180] sm:$0xff] }
  0x27   :  { %v3258_v9 = vcombine.high %v288_v5, %v292_v6  ;;  %v3260_v10 = vcombine.low %v288_v5, %v292_v6  ;;  %v283_v11 = vld [vmem:[#allocation4 + $0x1a0] sm:$0xff]  ;;  %v280_v12 = vld [vmem:[#allocation4 + $0x188] sm:$0xff] }
  0x28   :  { %5045 = vst [vmem:[#allocation9_spill] sm:$0xff] %v3254_v4  ;;  %5046 = vst [vmem:[#allocation10_spill] sm:$0xff] %v3256_v7  ;;  %v284_v13 = vld [vmem:[#allocation4 + $0x1a8] sm:$0xff]  ;;  %999 = vmatprep.subr.bf16.mxu0 %v3254_v4  ;;  %v3263_v14 = vcombine.high %v279_v8, %v283_v11  ;;  %v3269_v16 = vcombine.low %v279_v8, %v283_v11  ;;  %v271_v17 = vld [vmem:[#allocation4 + $0x140] sm:$0xff] }
  0x29   :  { %5047 = vst [vmem:[#allocation11_spill] sm:$0xff] %v3258_v9  ;;  %5048 = vst [vmem:[#allocation12_spill] sm:$0xff] %v3260_v10  ;;  %v3265_v15 = vcombine.high %v280_v12, %v284_v13  ;;  %1040 = vmatprep.subr.bf16.mxu1 %v3258_v9  ;;  %1000 = vmatpush1.bf16.msra.mxu0 %v3256_v7  ;;  %v275_v18 = vld [vmem:[#allocation4 + $0x160] sm:$0xff]  ;;  %v3273_v19 = vcombine.low %v280_v12, %v284_v13  ;;  %v272_v20 = vld [vmem:[#allocation4 + $0x148] sm:$0xff] }
  0x2a   :  { %5049 = vst [vmem:[#allocation13_spill] sm:$0xff] %v3263_v14  ;;  %5051 = vst [vmem:[#allocation15_spill] sm:$0xff] %v3269_v16  ;;  %1041 = vmatpush1.bf16.msra.mxu1 %v3260_v10  ;;  %1001 = vmatprep.subr.bf16.mxu0 %v3263_v14  ;;  %v276_v21 = vld [vmem:[#allocation4 + $0x168] sm:$0xff]  ;;  %v3276_v22 = vcombine.high %v271_v17, %v275_v18  ;;  %v263_v24 = vld [vmem:[#allocation4 + $0x100] sm:$0xff]  ;;  %v3281_v28 = vcombine.low %v271_v17, %v275_v18 }
  0x2b   :  { %5050 = vst [vmem:[#allocation14_spill] sm:$0xff] %v3265_v15  ;;  %5052 = vst [vmem:[#allocation16_spill] sm:$0xff] %v3273_v19  ;;  %1042 = vmatprep.subr.bf16.mxu1 %v3265_v15  ;;  %v3278_v23 = vcombine.high %v272_v20, %v276_v21  ;;  %v267_v25 = vld [vmem:[#allocation4 + $0x120] sm:$0xff]  ;;  %v264_v26 = vld [vmem:[#allocation4 + $0x108] sm:$0xff]  ;;  %v3285_v29 = vcombine.low %v272_v20, %v276_v21 }
  0x2c   :  { %5053 = vst [vmem:[#allocation17_spill] sm:$0xff] %v3276_v22  ;;  %v268_v27 = vld [vmem:[#allocation4 + $0x128] sm:$0xff]  ;;  %5055 = vst [vmem:[#allocation19_spill] sm:$0xff] %v3281_v28  ;;  %v3287_v30 = vcombine.high %v263_v24, %v267_v25  ;;  %v255_v32 = vld [vmem:[#allocation4 + $0xc0] sm:$0xff]  ;;  %v3293_v36 = vcombine.low %v263_v24, %v267_v25 }
  0x2d   :  { %5054 = vst [vmem:[#allocation18_spill] sm:$0xff] %v3278_v23  ;;  %1002 = vmatpush1.bf16.msra.mxu0 %v3269_v16  ;;  %5056 = vst [vmem:[#allocation20_spill] sm:$0xff] %v3285_v29  ;;  %v3290_v31 = vcombine.high %v264_v26, %v268_v27  ;;  %v259_v33 = vld [vmem:[#allocation4 + $0xe0] sm:$0xff]  ;;  %v256_v34 = vld [vmem:[#allocation4 + $0xc8] sm:$0xff]  ;;  %v3297_v37 = vcombine.low %v264_v26, %v268_v27 }
  0x2e   :  { %1043 = vmatpush1.bf16.msra.mxu1 %v3273_v19  ;;  %1003 = vmatprep.subr.bf16.mxu0 %v3276_v22  ;;  %5057 = vst [vmem:[#allocation21_spill] sm:$0xff] %v3287_v30  ;;  %v260_v35 = vld [vmem:[#allocation4 + $0xe8] sm:$0xff]  ;;  %5059 = vst [vmem:[#allocation23_spill] sm:$0xff] %v3293_v36  ;;  %v3299_v38 = vcombine.high %v255_v32, %v259_v33  ;;  %v247_v40 = vld [vmem:[#allocation4 + $0x80] sm:$0xff]  ;;  %v3305_v44 = vcombine.low %v255_v32, %v259_v33 }
  0x2f   :  { %1044 = vmatprep.subr.bf16.mxu1 %v3278_v23  ;;  %5058 = vst [vmem:[#allocation22_spill] sm:$0xff] %v3290_v31  ;;  %5060 = vst [vmem:[#allocation24_spill] sm:$0xff] %v3297_v37  ;;  %v3302_v39 = vcombine.high %v256_v34, %v260_v35  ;;  %v251_v41 = vld [vmem:[#allocation4 + $0xa0] sm:$0xff]  ;;  %v248_v42 = vld [vmem:[#allocation4 + $0x88] sm:$0xff]  ;;  %v3309_v45 = vcombine.low %v256_v34, %v260_v35 }
  0x30   :  { %5061 = vst [vmem:[#allocation25_spill] sm:$0xff] %v3299_v38  ;;  %v252_v43 = vld [vmem:[#allocation4 + $0xa8] sm:$0xff]  ;;  %5063 = vst [vmem:[#allocation27_spill] sm:$0xff] %v3305_v44  ;;  %v3311_v46 = vcombine.high %v247_v40, %v251_v41  ;;  %v239_v48 = vld [vmem:[#allocation4 + $0x40] sm:$0xff]  ;;  %v3317_v52 = vcombine.low %v247_v40, %v251_v41 }
  0x31   :  { %1004 = vmatpush1.bf16.msra.mxu0 %v3281_v28  ;;  %5062 = vst [vmem:[#allocation26_spill] sm:$0xff] %v3302_v39  ;;  %5064 = vst [vmem:[#allocation28_spill] sm:$0xff] %v3309_v45  ;;  %v3314_v47 = vcombine.high %v248_v42, %v252_v43  ;;  %v243_v49 = vld [vmem:[#allocation4 + $0x60] sm:$0xff]  ;;  %v240_v50 = vld [vmem:[#allocation4 + $0x48] sm:$0xff]  ;;  %v3321_v53 = vcombine.low %v248_v42, %v252_v43 }
  0x32   :  { %1045 = vmatpush1.bf16.msra.mxu1 %v3285_v29  ;;  %1005 = vmatprep.subr.bf16.mxu0 %v3287_v30  ;;  %5065 = vst [vmem:[#allocation29_spill] sm:$0xff] %v3311_v46  ;;  %v244_v51 = vld [vmem:[#allocation4 + $0x68] sm:$0xff]  ;;  %5067 = vst [vmem:[#allocation31_spill] sm:$0xff] %v3317_v52  ;;  %v3323_v54 = vcombine.high %v239_v48, %v243_v49  ;;  %v231_v56 = vld [vmem:[#allocation4] sm:$0xff]  ;;  %v3329_v60 = vcombine.low %v239_v48, %v243_v49 }
  0x33   :  { %1046 = vmatprep.subr.bf16.mxu1 %v3290_v31  ;;  %5066 = vst [vmem:[#allocation30_spill] sm:$0xff] %v3314_v47  ;;  %5068 = vst [vmem:[#allocation32_spill] sm:$0xff] %v3321_v53  ;;  %v3326_v55 = vcombine.high %v240_v50, %v244_v51  ;;  %v235_v57 = vld [vmem:[#allocation4 + $0x20] sm:$0xff]  ;;  %v232_v58 = vld [vmem:[#allocation4 + $0x8] sm:$0xff]  ;;  %v3333_v61 = vcombine.low %v240_v50, %v244_v51 }
  0x34   :  { %5069 = vst [vmem:[#allocation33_spill] sm:$0xff] %v3323_v54  ;;  %v236_v59 = vld [vmem:[#allocation4 + $0x28] sm:$0xff]  ;;  %5071 = vst [vmem:[#allocation35_spill] sm:$0xff] %v3329_v60  ;;  %v3335_v62 = vcombine.high %v231_v56, %v235_v57  ;;  %v351_v2 = vld [vmem:[#allocation4 + $0x3c0] sm:$0xff]  ;;  %v3341_v8 = vcombine.low %v231_v56, %v235_v57 }
  0x35   :  { %1006 = vmatpush1.bf16.msra.mxu0 %v3293_v36  ;;  %5070 = vst [vmem:[#allocation34_spill] sm:$0xff] %v3326_v55  ;;  %5072 = vst [vmem:[#allocation36_spill] sm:$0xff] %v3333_v61  ;;  %v3338_v63 = vcombine.high %v232_v58, %v236_v59  ;;  %v355_v3 = vld [vmem:[#allocation4 + $0x3e0] sm:$0xff]  ;;  %v352_v5 = vld [vmem:[#allocation4 + $0x3c8] sm:$0xff]  ;;  %v3345_v11 = vcombine.low %v232_v58, %v236_v59 }
  0x36   :  { %1047 = vmatpush1.bf16.msra.mxu1 %v3297_v37  ;;  %1007 = vmatprep.subr.bf16.mxu0 %v3299_v38  ;;  %5073 = vst [vmem:[#allocation37_spill] sm:$0xff] %v3335_v62  ;;  %v356_v6 = vld [vmem:[#allocation4 + $0x3e8] sm:$0xff]  ;;  %5075 = vst [vmem:[#allocation39_spill] sm:$0xff] %v3341_v8  ;;  %v3347_v12 = vcombine.high %v351_v2, %v355_v3  ;;  %v343_v17 = vld [vmem:[#allocation4 + $0x380] sm:$0xff]  ;;  %v3353_v24 = vcombine.low %v351_v2, %v355_v3 }
  0x37   :  { %1048 = vmatprep.subr.bf16.mxu1 %v3302_v39  ;;  %5074 = vst [vmem:[#allocation38_spill] sm:$0xff] %v3338_v63  ;;  %5076 = vst [vmem:[#allocation40_spill] sm:$0xff] %v3345_v11  ;;  %v3350_v13 = vcombine.high %v352_v5, %v356_v6  ;;  %v347_v18 = vld [vmem:[#allocation4 + $0x3a0] sm:$0xff]  ;;  %v344_v20 = vld [vmem:[#allocation4 + $0x388] sm:$0xff]  ;;  %v3357_v25 = vcombine.low %v352_v5, %v356_v6 }
  0x38   :  { %5077 = vst [vmem:[#allocation41_spill] sm:$0xff] %v3347_v12  ;;  %v348_v21 = vld [vmem:[#allocation4 + $0x3a8] sm:$0xff]  ;;  %5079 = vst [vmem:[#allocation43_spill] sm:$0xff] %v3353_v24  ;;  %v3359_v26 = vcombine.high %v343_v17, %v347_v18  ;;  %v335_v32 = vld [vmem:[#allocation4 + $0x340] sm:$0xff]  ;;  %v3365_v40 = vcombine.low %v343_v17, %v347_v18 }
  0x39   :  { %1008 = vmatpush1.bf16.msra.mxu0 %v3305_v44  ;;  %5078 = vst [vmem:[#allocation42_spill] sm:$0xff] %v3350_v13  ;;  %5080 = vst [vmem:[#allocation44_spill] sm:$0xff] %v3357_v25  ;;  %v3362_v27 = vcombine.high %v344_v20, %v348_v21  ;;  %v339_v33 = vld [vmem:[#allocation4 + $0x360] sm:$0xff]  ;;  %v336_v34 = vld [vmem:[#allocation4 + $0x348] sm:$0xff]  ;;  %v3369_v41 = vcombine.low %v344_v20, %v348_v21 }
  0x3a   :  { %1049 = vmatpush1.bf16.msra.mxu1 %v3309_v45  ;;  %1009 = vmatprep.subr.bf16.mxu0 %v3311_v46  ;;  %5081 = vst [vmem:[#allocation45_spill] sm:$0xff] %v3359_v26  ;;  %v340_v35 = vld [vmem:[#allocation4 + $0x368] sm:$0xff]  ;;  %5083 = vst [vmem:[#allocation47_spill] sm:$0xff] %v3365_v40  ;;  %v3371_v42 = vcombine.high %v335_v32, %v339_v33  ;;  %v327_v48 = vld [vmem:[#allocation4 + $0x300] sm:$0xff]  ;;  %v3377_v56 = vcombine.low %v335_v32, %v339_v33 }
  0x3b   :  { %1050 = vmatprep.subr.bf16.mxu1 %v3314_v47  ;;  %5082 = vst [vmem:[#allocation46_spill] sm:$0xff] %v3362_v27  ;;  %5084 = vst [vmem:[#allocation48_spill] sm:$0xff] %v3369_v41  ;;  %v3374_v43 = vcombine.high %v336_v34, %v340_v35  ;;  %v331_v49 = vld [vmem:[#allocation4 + $0x320] sm:$0xff]  ;;  %v328_v50 = vld [vmem:[#allocation4 + $0x308] sm:$0xff]  ;;  %v3381_v57 = vcombine.low %v336_v34, %v340_v35 }
  0x3c   :  { %5085 = vst [vmem:[#allocation49_spill] sm:$0xff] %v3371_v42  ;;  %v332_v51 = vld [vmem:[#allocation4 + $0x328] sm:$0xff]  ;;  %5087 = vst [vmem:[#allocation51_spill] sm:$0xff] %v3377_v56  ;;  %v3383_v58 = vcombine.high %v327_v48, %v331_v49  ;;  %v319_v2 = vld [vmem:[#allocation4 + $0x2c0] sm:$0xff]  ;;  %v3389_v17 = vcombine.low %v327_v48, %v331_v49 }
  0x3d   :  { %1010 = vmatpush1.bf16.msra.mxu0 %v3317_v52  ;;  %5086 = vst [vmem:[#allocation50_spill] sm:$0xff] %v3374_v43  ;;  %5088 = vst [vmem:[#allocation52_spill] sm:$0xff] %v3381_v57  ;;  %v3386_v59 = vcombine.high %v328_v50, %v332_v51  ;;  %v323_v3 = vld [vmem:[#allocation4 + $0x2e0] sm:$0xff]  ;;  %v320_v5 = vld [vmem:[#allocation4 + $0x2c8] sm:$0xff]  ;;  %v3393_v18 = vcombine.low %v328_v50, %v332_v51 }
  0x3e   :  { %1051 = vmatpush1.bf16.msra.mxu1 %v3321_v53  ;;  %1011 = vmatprep.subr.bf16.mxu0 %v3323_v54  ;;  %5089 = vst [vmem:[#allocation53_spill] sm:$0xff] %v3383_v58  ;;  %v324_v6 = vld [vmem:[#allocation4 + $0x2e8] sm:$0xff]  ;;  %5091 = vst [vmem:[#allocation55_spill] sm:$0xff] %v3389_v17  ;;  %v3395_v20 = vcombine.high %v319_v2, %v323_v3  ;;  %v311_v32 = vld [vmem:[#allocation4 + $0x280] sm:$0xff]  ;;  %v3401_v48 = vcombine.low %v319_v2, %v323_v3 }
  0x3f   :  { %1052 = vmatprep.subr.bf16.mxu1 %v3326_v55  ;;  %5090 = vst [vmem:[#allocation54_spill] sm:$0xff] %v3386_v59  ;;  %5092 = vst [vmem:[#allocation56_spill] sm:$0xff] %v3393_v18  ;;  %v3398_v21 = vcombine.high %v320_v5, %v324_v6  ;;  %v315_v33 = vld [vmem:[#allocation4 + $0x2a0] sm:$0xff]  ;;  %v312_v34 = vld [vmem:[#allocation4 + $0x288] sm:$0xff]  ;;  %v3405_v49 = vcombine.low %v320_v5, %v324_v6 }
  0x40   :  { %5093 = vst [vmem:[#allocation57_spill] sm:$0xff] %v3395_v20  ;;  %v316_v35 = vld [vmem:[#allocation4 + $0x2a8] sm:$0xff]  ;;  %5095 = vst [vmem:[#allocation59_spill] sm:$0xff] %v3401_v48  ;;  %v3407_v50 = vcombine.high %v311_v32, %v315_v33  ;;  %v303_v0 = vld [vmem:[#allocation4 + $0x240] sm:$0xff]  ;;  %v3413_v2 = vcombine.low %v311_v32, %v315_v33 }
  0x41   :  { %1012 = vmatpush1.bf16.msra.mxu0 %v3329_v60  ;;  %5094 = vst [vmem:[#allocation58_spill] sm:$0xff] %v3398_v21  ;;  %5096 = vst [vmem:[#allocation60_spill] sm:$0xff] %v3405_v49  ;;  %v3410_v51 = vcombine.high %v312_v34, %v316_v35  ;;  %v293_v3 = vld [vmem:[#allocation4 + $0x1f0] sm:$0xff]  ;;  %v3417_v5 = vcombine.low %v312_v34, %v316_v35  ;;  %v300_v32 = vld [vmem:[#allocation4 + $0x228] sm:$0xff] }
  0x42   :  { %1053 = vmatpush1.bf16.msra.mxu1 %v3333_v61  ;;  %1013 = vmatprep.subr.bf16.mxu0 %v3335_v62  ;;  %5097 = vst [vmem:[#allocation61_spill] sm:$0xff] %v3407_v50  ;;  %5099 = vst [vmem:[#allocation63_spill] sm:$0xff] %v3413_v2 }
  0x43   :  { %1054 = vmatprep.subr.bf16.mxu1 %v3338_v63  ;;  %5098 = vst [vmem:[#allocation62_spill] sm:$0xff] %v3410_v51  ;;  %5100 = vst [vmem:[#allocation64_spill] sm:$0xff] %v3417_v5 }
  0x45   :  { %1014 = vmatpush1.bf16.msra.mxu0 %v3341_v8 }
  0x46   :  { %1055 = vmatpush1.bf16.msra.mxu1 %v3345_v11  ;;  %1015 = vmatprep.subr.bf16.mxu0 %v3347_v12 }
  0x47   :  { %1056 = vmatprep.subr.bf16.mxu1 %v3350_v13 }
  0x49   :  { %1016 = vmatpush2.bf16.msra.mxu0 %v3353_v24 }
  0x4a   :  { %1057 = vmatpush2.bf16.msra.mxu1 %v3357_v25  ;;  %1017 = vmatprep.subr.bf16.mxu0 %v3359_v26 }
  0x4b   :  { %1058 = vmatprep.subr.bf16.mxu1 %v3362_v27 }
  0x4d   :  { %1018 = vmatpush2.bf16.msra.mxu0 %v3365_v40 }
  0x4e   :  { %1059 = vmatpush2.bf16.msra.mxu1 %v3369_v41  ;;  %1019 = vmatprep.subr.bf16.mxu0 %v3371_v42 }
  0x4f   :  { %1060 = vmatprep.subr.bf16.mxu1 %v3374_v43  ;;  %v299_v43 = vld [vmem:[#allocation4 + $0x220] sm:$0xff] }
  0x51   :  { %1020 = vmatpush2.bf16.msra.mxu0 %v3377_v56  ;;  %v289_v56 = vld [vmem:[#allocation4 + $0x1d0] sm:$0xff] }
  0x52   :  { %1061 = vmatpush2.bf16.msra.mxu1 %v3381_v57  ;;  %1021 = vmatprep.subr.bf16.mxu0 %v3383_v58  ;;  %v304_v58 = vld [vmem:[#allocation4 + $0x248] sm:$0xff]  ;;  %v3424_v33 = vcombine.low %v289_v56, %v293_v3 }
  0x53   :  { %1062 = vmatprep.subr.bf16.mxu1 %v3386_v59  ;;  %v307_v59 = vld [vmem:[#allocation4 + $0x260] sm:$0xff]  ;;  %v308_v57 = vld [vmem:[#allocation4 + $0x268] sm:$0xff] }
  0x54   :  { %v3419_v6 = vcombine.high %v303_v0, %v307_v59  ;;  %v3433_v34 = vcombine.low %v304_v58, %v308_v57 }
  0x55   :  { %1022 = vmatpush2.bf16.msra.mxu0 %v3389_v17  ;;  %v295_v17 = vld [vmem:[#allocation4 + $0x200] sm:$0xff] }
  0x56   :  { %1063 = vmatpush2.bf16.msra.mxu1 %v3393_v18  ;;  %1023 = vmatprep.subr.bf16.mxu0 %v3395_v20  ;;  %v290_v18 = vld [vmem:[#allocation4 + $0x1d8] sm:$0xff]  ;;  %5101 = vst [vmem:[#allocation65_spill] sm:$0xff] %v3419_v6  ;;  %5105 = vst [vmem:[#allocation69_spill] sm:$0xff] %v3433_v34  ;;  %v3435_v35 = vcombine.high %v295_v17, %v299_v43 }
  0x57   :  { %1064 = vmatprep.subr.bf16.mxu1 %v3398_v21  ;;  %v294_v20 = vld [vmem:[#allocation4 + $0x1f8] sm:$0xff]  ;;  %v3422_v21 = vcombine.high %v304_v58, %v308_v57 }
  0x58   :  { %v3426_v42 = vcombine.low %v290_v18, %v294_v20  ;;  %5106 = vst [vmem:[#allocation70_spill] sm:$0xff] %v3435_v35  ;;  %v3450_v57 = vcombine.high %v290_v18, %v294_v20 }
  0x59   :  { %1024 = vmatpush2.bf16.msra.mxu0 %v3401_v48  ;;  %5102 = vst [vmem:[#allocation66_spill] sm:$0xff] %v3422_v21  ;;  %v296_v48 = vld [vmem:[#allocation4 + $0x208] sm:$0xff] }
  0x5a   :  { %1065 = vmatpush2.bf16.msra.mxu1 %v3405_v49  ;;  %1025 = vmatprep.subr.bf16.mxu0 %v3407_v50  ;;  %5103 = vst [vmem:[#allocation67_spill] sm:$0xff] %v3426_v42  ;;  %v3429_v49 = vcombine.low %v303_v0, %v307_v59  ;;  %v3441_v50 = vcombine.low %v295_v17, %v299_v43  ;;  %5111 = vst [vmem:[#allocation75_spill] sm:$0xff] %v3450_v57  ;;  %v57_v43 = vlaneseq }
  0x5b   :  { %1066 = vmatprep.subr.bf16.mxu1 %v3410_v51  ;;  %v3438_v51 = vcombine.high %v296_v48, %v300_v32  ;;  %v3445_v0 = vcombine.low %v296_v48, %v300_v32  ;;  %v3447_v59 = vcombine.high %v289_v56, %v293_v3  ;;  %v3459_v48 = vld [vmem:[#allocation6] sm:$0xff]  ;;  %v3461_v56 = vld [vmem:[#allocation6 + $0x8] sm:$0xff]  ;;  %v3212_v32 = vmov 1  }
  0x5c   :  { %5104 = vst [vmem:[#allocation68_spill] sm:$0xff] %v3429_v49  ;;  %5108 = vst [vmem:[#allocation72_spill] sm:$0xff] %v3441_v50  ;;  %v3456_v58 = vshrl.u32 %v57_v43, 7  ;;  %2875 = vset.pattern.permute.xlu0 %v3212_v32 }
  0x5d   :  { %1026 = vmatpush2.bf16.msra.mxu0 %v3413_v2  ;;  %5107 = vst [vmem:[#allocation71_spill] sm:$0xff] %v3438_v51  ;;  %5109 = vst [vmem:[#allocation73_spill] sm:$0xff] %v3445_v0  ;;  %119 = vperm.xlu0 %2875, %v3251_v1  }
  0x5e   :  { %1067 = vmatpush2.bf16.msra.mxu1 %v3417_v5  ;;  %1027 = vmatprep.subr.bf16.mxu0 %v3419_v6  ;;  %5110 = vst [vmem:[#allocation74_spill] sm:$0xff] %v3447_v59  ;;  %5112 = vst [vmem:[#allocation76_spill] sm:$0xff] %v3456_v58  ;;  %v59_v17 = vsub.s32 0, %v3456_v58  ;;  %v75_v18 = vsub.s32 1, %v3456_v58  ;;  %v5132_v6 = vmov 0  }
  0x5f   :  { %1068 = vmatprep.subr.bf16.mxu1 %v3422_v21  ;;  %5113 = vst [vmem:[#allocation77_spill] sm:$0xff] %v3459_v48  ;;  %5114 = vst [vmem:[#allocation78_spill] sm:$0xff] %v3461_v56 }
  0x60   :  { %v3465_v20 = vrot.slane %v3459_v48, %v59_v17  ;;  %v3468_v3 = vrot.slane %v3461_v56, %v59_v17  ;;  %v3472_v43 = vrot.slane %v3459_v48, %v75_v18 }
  0x61   :  { %1028 = vmatpush2.bf16.msra.mxu0 %v3429_v49 }
  0x62   :  { %1069 = vmatpush2.bf16.msra.mxu1 %v3433_v34  ;;  %1029 = vmatprep.subr.bf16.mxu0 %v3435_v35  ;;  %5115 = vst [vmem:[#allocation79_spill] sm:$0xff] %v3465_v20  ;;  %5116 = vst [vmem:[#allocation80_spill] sm:$0xff] %v3468_v3  ;;  %v3486_v34 = vld [vmem:[#allocation6 + $0x10] sm:$0xff] }
  0x63   :  { %1070 = vmatprep.subr.bf16.mxu1 %v3438_v51  ;;  %5117 = vst [vmem:[#allocation81_spill] sm:$0xff] %v3472_v43  ;;  %5121 = vst [vmem:[#allocation85_spill] sm:$0xff] %v3486_v34 }
  0x65   :  { %1030 = vmatpush2.bf16.msra.mxu0 %v3441_v50  ;;  %v3479_v50 = vld [vmem:[#allocation6 + $0x18] sm:$0xff] }
  0x66   :  { %1071 = vmatpush2.bf16.msra.mxu1 %v3445_v0  ;;  %1081 = vmatprep.subr.bf16.mxu0 %v3447_v59  ;;  %5119 = vst [vmem:[#allocation83_spill] sm:$0xff] %v3479_v50  ;;  %v3484_v32 = vrot.slane %v3479_v50, %v59_v17 }
  0x67   :  { %1122 = vmatprep.subr.bf16.mxu1 %v3450_v57  ;;  %v3475_v57 = vrot.slane %v3461_v56, %v75_v18  ;;  %v3489_v56 = vrot.slane %v3479_v50, %v75_v18 }
  0x68   :  { %5120 = vst [vmem:[#allocation84_spill] sm:$0xff] %v3484_v32 }
  0x69   :  { %5118 = vst [vmem:[#allocation82_spill] sm:$0xff] %v3475_v57  ;;  %5122 = vst [vmem:[#allocation86_spill] sm:$0xff] %v3489_v56 }
  0xa1   :  { %v108_v59 = vpop.permute.xlu0 %107 }
  0xa2   :  { %v110_v0 = vmul.f32 %v108_v59, %v3465_v20  ;;  %v111_v58 = vmul.f32 %v108_v59, %v3468_v3  ;;  %v113_v3 = vmul.f32 %v108_v59, %v3484_v32  ;;  %v3493_v20 = vrot.slane %v3486_v34, %v59_v17 }
  0xa4   :  { %v114_v51 = vadd.f32 %v110_v0, %v3472_v43  ;;  %v115_v35 = vadd.f32 %v111_v58, %v3475_v57  ;;  %5123 = vst [vmem:[#allocation87_spill] sm:$0xff] %v3493_v20  ;;  %v117_v0 = vadd.f32 %v113_v3, %v3489_v56  ;;  %v3497_v58 = vrot.slane %v3486_v34, %v75_v18 }
  0xa6   :  { %v2685_v1 = vmul.f32 -1.442695, %v114_v51  ;;  %v2686_v48 = vmul.f32 -1.442695, %v115_v35  ;;  %5124 = vst [vmem:[#allocation88_spill] sm:$0xff] %v3497_v58  ;;  %v112_v51 = vmul.f32 %v108_v59, %v3493_v20  ;;  %v270_v20 = vld [vmem:[#allocation4 + $0x138] sm:$0xff] }
  0xa7   :  { %v2687_v35 = vmul.f32 -1.442695, %v117_v0  ;;  %v281_v0 = vld [vmem:[#allocation4 + $0x190] sm:$0xff] }
  0xa8   :  { %2883 = vpow2.f32 %v2685_v1  ;;  %v116_v57 = vadd.f32 %v112_v51, %v3497_v58 }
  0xa9   :  { %2885 = vpow2.f32 %v2686_v48 }
  0xaa   :  { %2887 = vpow2.f32 %v2687_v35  ;;  %v285_v35 = vld [vmem:[#allocation4 + $0x1b0] sm:$0xff] }
  0xab   :  { %2889 = vtanh.f32 %v116_v57  ;;  %v286_v57 = vld [vmem:[#allocation4 + $0x1b8] sm:$0xff] }
  0xb5   :  { %v2884_v1 = vpop.eup %2883 }
  0xb6   :  { %v2886_v48 = vpop.eup %2885  ;;  %v209_v43 = vadd.f32 1.0, %v2884_v1  ;;  %v282_v1 = vld [vmem:[#allocation4 + $0x198] sm:$0xff] }
  0xb7   :  { %v215_v50 = vadd.f32 1.0, %v2886_v48  ;;  %v2888_v17 = vpop.eup %2887  ;;  %v3506_v48 = vcombine.high %v281_v0, %v285_v35  ;;  %v3508_v58 = vcombine.high %v282_v1, %v286_v57 }
  0xb8   :  { %2891 = vrcp.f32 %v209_v43  ;;  %v2890_v32 = vpop.eup %2889  ;;  %v222_v56 = vadd.f32 1.0, %v2888_v17  ;;  %v278_v17 = vld [vmem:[#allocation4 + $0x178] sm:$0xff] }
  0xb9   :  { %2893 = vrcp.f32 %v215_v50  ;;  %5126 = vst [vmem:[#allocation90_spill] sm:$0xff] %v3506_v48  ;;  %5127 = vst [vmem:[#allocation91_spill] sm:$0xff] %v3508_v58 }
  0xba   :  { %2895 = vrcp.f32 %v222_v56  ;;  %v3514_v56 = vcombine.low %v281_v0, %v285_v35 }
  0xbc   :  { %5128 = vst [vmem:[#allocation92_spill] sm:$0xff] %v3514_v56 }
  0xc5   :  { %v2892_v49 = vpop.eup %2891 }
  0xc6   :  { %v2894_v3 = vpop.eup %2893  ;;  %v226_v18 = vmul.f32 %v2892_v49, %v2890_v32  ;;  %v273_v49 = vld [vmem:[#allocation4 + $0x150] sm:$0xff] }
  0xc7   :  { %v225_v34 = vmul.f32 0.0, %v2894_v3  ;;  %v2896_v59 = vpop.eup %2895  ;;  %v277_v32 = vld [vmem:[#allocation4 + $0x170] sm:$0xff]  ;;  %v3516_v3 = vcombine.low %v282_v1, %v286_v57 }
  0xc8   :  { %v3528_v0 = vcombine.low %v273_v49, %v277_v32 }
  0xc9   :  { %v3501_v21 = vadd.f32 %v226_v18, %v225_v34  ;;  %v274_v34 = vld [vmem:[#allocation4 + $0x158] sm:$0xff]  ;;  %5129 = vst [vmem:[#allocation93_spill] sm:$0xff] %v3516_v3  ;;  %v3520_v18 = vcombine.high %v273_v49, %v277_v32 }
  0xca   :  { %5133 = vst [vmem:[#allocation96_spill] sm:$0xff] %v3528_v0  ;;  %v3530_v35 = vcombine.low %v274_v34, %v278_v17 }
  0xcb   :  { %5125 = vst [vmem:[#allocation89_spill] sm:$0xff] %v3501_v21  ;;  %2897 = vtanh.f32 %v3501_v21  ;;  %5130 = vst [vmem:[#allocation94_spill] sm:$0xff] %v3520_v18  ;;  %v266_v21 = vld [vmem:[#allocation4 + $0x118] sm:$0xff] }
  0xcc   :  { %5134 = vst [vmem:[#allocation97_spill] sm:$0xff] %v3530_v35  ;;  %v3536_v57 = vcombine.high %v266_v21, %v270_v20  ;;  %v3542_v32 = vcombine.low %v266_v21, %v270_v20 }
  0xce   :  { %5136 = vst [vmem:[#allocation99_spill] sm:$0xff] %v3536_v57  ;;  %5138 = vst [vmem:[#allocation101_spill] sm:$0xff] %v3542_v32 }
  0xd8   :  { %v2898_v51 = vpop.eup %2897 }
  0xd9   :  { %v229_v43 = vmul.f32 %v2898_v51, %v2896_v59  ;;  %v3522_v59 = vcombine.high %v274_v34, %v278_v17  ;;  %v265_v51 = vld [vmem:[#allocation4 + $0x110] sm:$0xff] }
  0xdb   :  { %v3504_v50 = vpack.c.bf16 %v229_v43, %v229_v43  ;;  %5131 = vst [vmem:[#allocation95_spill] sm:$0xff] %v3522_v59  ;;  %v269_v43 = vld [vmem:[#allocation4 + $0x130] sm:$0xff] }
  0xdc   :  { %v3534_v1 = vcombine.high %v265_v51, %v269_v43  ;;  %v3540_v49 = vcombine.low %v265_v51, %v269_v43 }
  0xdd   :  { %1032 = vmatmul.mubr.bf16.vlgmr.msra.gmra.mxu0 %v3504_v50  ;;  %1073 = vmatmul.mubr.bf16.vlgmr.msra.gmra.mxu1 %v3504_v50 }
  0xde   :  { %1082 = vmatpush1.bf16.msra.mxu0 %v3424_v33  ;;  %1123 = vmatpush1.bf16.msra.mxu1 %v3426_v42  ;;  %5135 = vst [vmem:[#allocation98_spill] sm:$0xff] %v3534_v1  ;;  %v258_v42 = vld [vmem:[#allocation4 + $0xd8] sm:$0xff]  ;;  %5137 = vst [vmem:[#allocation100_spill] sm:$0xff] %v3540_v49 }
  0xdf   :  { %1083 = vmatprep.subr.bf16.mxu0 %v3506_v48  ;;  %1124 = vmatprep.subr.bf16.mxu1 %v3508_v58  ;;  %v257_v58 = vld [vmem:[#allocation4 + $0xd0] sm:$0xff] }
  0xe0   :  { %1113 = vmatprep.mubr.bf16.mxu0 %v5132_v6  ;;  %1154 = vmatprep.mubr.bf16.mxu1 %v5132_v6  ;;  %v261_v48 = vld [vmem:[#allocation4 + $0xf0] sm:$0xff]  ;;  %v262_v6 = vld [vmem:[#allocation4 + $0xf8] sm:$0xff] }
  0xe1   :  { %v3546_v34 = vcombine.high %v257_v58, %v261_v48  ;;  %v3548_v17 = vcombine.high %v258_v42, %v262_v6  ;;  %v3552_v51 = vcombine.low %v257_v58, %v261_v48  ;;  %v3554_v21 = vcombine.low %v258_v42, %v262_v6 }
  0xe2   :  { %1084 = vmatpush1.bf16.msra.mxu0 %v3514_v56  ;;  %1125 = vmatpush1.bf16.msra.mxu1 %v3516_v3  ;;  %v250_v3 = vld [vmem:[#allocation4 + $0x98] sm:$0xff] }
  0xe3   :  { %1085 = vmatprep.subr.bf16.mxu0 %v3520_v18  ;;  %1126 = vmatprep.subr.bf16.mxu1 %v3522_v59  ;;  %5139 = vst [vmem:[#allocation102_spill] sm:$0xff] %v3546_v34  ;;  %5140 = vst [vmem:[#allocation103_spill] sm:$0xff] %v3548_v17  ;;  %v249_v59 = vld [vmem:[#allocation4 + $0x90] sm:$0xff]  ;;  %v254_v56 = vld [vmem:[#allocation4 + $0xb8] sm:$0xff] }
  0xe4   :  { %v253_v18 = vld [vmem:[#allocation4 + $0xb0] sm:$0xff]  ;;  %5141 = vst [vmem:[#allocation104_spill] sm:$0xff] %v3552_v51  ;;  %5142 = vst [vmem:[#allocation105_spill] sm:$0xff] %v3554_v21  ;;  %v3560_v43 = vcombine.high %v250_v3, %v254_v56  ;;  %v3566_v42 = vcombine.low %v250_v3, %v254_v56 }
  0xe5   :  { %v3558_v20 = vcombine.high %v249_v59, %v253_v18  ;;  %v3564_v58 = vcombine.low %v249_v59, %v253_v18 }
  0xe6   :  { %1086 = vmatpush1.bf16.msra.mxu0 %v3528_v0  ;;  %1127 = vmatpush1.bf16.msra.mxu1 %v3530_v35  ;;  %5144 = vst [vmem:[#allocation107_spill] sm:$0xff] %v3560_v43  ;;  %v242_v35 = vld [vmem:[#allocation4 + $0x58] sm:$0xff]  ;;  %5146 = vst [vmem:[#allocation109_spill] sm:$0xff] %v3566_v42 }
  0xe7   :  { %1087 = vmatprep.subr.bf16.mxu0 %v3534_v1  ;;  %1128 = vmatprep.subr.bf16.mxu1 %v3536_v57  ;;  %5143 = vst [vmem:[#allocation106_spill] sm:$0xff] %v3558_v20  ;;  %v241_v57 = vld [vmem:[#allocation4 + $0x50] sm:$0xff]  ;;  %v246_v0 = vld [vmem:[#allocation4 + $0x78] sm:$0xff]  ;;  %5145 = vst [vmem:[#allocation108_spill] sm:$0xff] %v3564_v58 }
  0xe8   :  { %v245_v1 = vld [vmem:[#allocation4 + $0x70] sm:$0xff]  ;;  %v3572_v6 = vcombine.high %v242_v35, %v246_v0  ;;  %v3578_v56 = vcombine.low %v242_v35, %v246_v0 }
  0xe9   :  { %v3570_v48 = vcombine.high %v241_v57, %v245_v1  ;;  %v3576_v18 = vcombine.low %v241_v57, %v245_v1 }
  0xea   :  { %1088 = vmatpush1.bf16.msra.mxu0 %v3540_v49  ;;  %1129 = vmatpush1.bf16.msra.mxu1 %v3542_v32  ;;  %5148 = vst [vmem:[#allocation111_spill] sm:$0xff] %v3572_v6  ;;  %v234_v32 = vld [vmem:[#allocation4 + $0x18] sm:$0xff]  ;;  %5150 = vst [vmem:[#allocation113_spill] sm:$0xff] %v3578_v56 }
  0xeb   :  { %1089 = vmatprep.subr.bf16.mxu0 %v3546_v34  ;;  %1130 = vmatprep.subr.bf16.mxu1 %v3548_v17  ;;  %5147 = vst [vmem:[#allocation110_spill] sm:$0xff] %v3570_v48  ;;  %v233_v17 = vld [vmem:[#allocation4 + $0x10] sm:$0xff]  ;;  %v238_v49 = vld [vmem:[#allocation4 + $0x38] sm:$0xff]  ;;  %5149 = vst [vmem:[#allocation112_spill] sm:$0xff] %v3576_v18 }
  0xec   :  { %v237_v34 = vld [vmem:[#allocation4 + $0x30] sm:$0xff]  ;;  %v3584_v59 = vcombine.high %v234_v32, %v238_v49  ;;  %v3590_v0 = vcombine.low %v234_v32, %v238_v49 }
  0xed   :  { %v3582_v3 = vcombine.high %v233_v17, %v237_v34  ;;  %v3588_v1 = vcombine.low %v233_v17, %v237_v34 }
  0xee   :  { %1090 = vmatpush1.bf16.msra.mxu0 %v3552_v51  ;;  %1131 = vmatpush1.bf16.msra.mxu1 %v3554_v21  ;;  %5152 = vst [vmem:[#allocation115_spill] sm:$0xff] %v3584_v59  ;;  %v354_v21 = vld [vmem:[#allocation4 + $0x3d8] sm:$0xff]  ;;  %5154 = vst [vmem:[#allocation117_spill] sm:$0xff] %v3590_v0 }
  0xef   :  { %1091 = vmatprep.subr.bf16.mxu0 %v3558_v20  ;;  %1132 = vmatprep.subr.bf16.mxu1 %v3560_v43  ;;  %5151 = vst [vmem:[#allocation114_spill] sm:$0xff] %v3582_v3  ;;  %v353_v43 = vld [vmem:[#allocation4 + $0x3d0] sm:$0xff]  ;;  %v358_v51 = vld [vmem:[#allocation4 + $0x3f8] sm:$0xff]  ;;  %5153 = vst [vmem:[#allocation116_spill] sm:$0xff] %v3588_v1 }
  0xf0   :  { %v357_v20 = vld [vmem:[#allocation4 + $0x3f0] sm:$0xff]  ;;  %v3596_v57 = vcombine.high %v354_v21, %v358_v51  ;;  %v3602_v49 = vcombine.low %v354_v21, %v358_v51 }
  0xf1   :  { %v3594_v35 = vcombine.high %v353_v43, %v357_v20  ;;  %v3600_v34 = vcombine.low %v353_v43, %v357_v20 }
  0xf2   :  { %1092 = vmatpush1.bf16.msra.mxu0 %v3564_v58  ;;  %1133 = vmatpush1.bf16.msra.mxu1 %v3566_v42  ;;  %5156 = vst [vmem:[#allocation119_spill] sm:$0xff] %v3596_v57  ;;  %v346_v42 = vld [vmem:[#allocation4 + $0x398] sm:$0xff]  ;;  %5158 = vst [vmem:[#allocation121_spill] sm:$0xff] %v3602_v49 }
  0xf3   :  { %1093 = vmatprep.subr.bf16.mxu0 %v3570_v48  ;;  %1134 = vmatprep.subr.bf16.mxu1 %v3572_v6  ;;  %5155 = vst [vmem:[#allocation118_spill] sm:$0xff] %v3594_v35  ;;  %v345_v6 = vld [vmem:[#allocation4 + $0x390] sm:$0xff]  ;;  %v350_v58 = vld [vmem:[#allocation4 + $0x3b8] sm:$0xff]  ;;  %5157 = vst [vmem:[#allocation120_spill] sm:$0xff] %v3600_v34 }
  0xf4   :  { %v349_v48 = vld [vmem:[#allocation4 + $0x3b0] sm:$0xff]  ;;  %v3608_v17 = vcombine.high %v346_v42, %v350_v58  ;;  %v3614_v51 = vcombine.low %v346_v42, %v350_v58 }
  0xf5   :  { %v3606_v32 = vcombine.high %v345_v6, %v349_v48  ;;  %v3612_v20 = vcombine.low %v345_v6, %v349_v48 }
  0xf6   :  { %1094 = vmatpush1.bf16.msra.mxu0 %v3576_v18  ;;  %1135 = vmatpush1.bf16.msra.mxu1 %v3578_v56  ;;  %5160 = vst [vmem:[#allocation123_spill] sm:$0xff] %v3608_v17  ;;  %v338_v56 = vld [vmem:[#allocation4 + $0x358] sm:$0xff]  ;;  %5162 = vst [vmem:[#allocation125_spill] sm:$0xff] %v3614_v51 }
  0xf7   :  { %1095 = vmatprep.subr.bf16.mxu0 %v3582_v3  ;;  %1136 = vmatprep.subr.bf16.mxu1 %v3584_v59  ;;  %5159 = vst [vmem:[#allocation122_spill] sm:$0xff] %v3606_v32  ;;  %v337_v59 = vld [vmem:[#allocation4 + $0x350] sm:$0xff]  ;;  %v342_v18 = vld [vmem:[#allocation4 + $0x378] sm:$0xff]  ;;  %5161 = vst [vmem:[#allocation124_spill] sm:$0xff] %v3612_v20 }
  0xf8   :  { %v341_v3 = vld [vmem:[#allocation4 + $0x370] sm:$0xff]  ;;  %v3620_v43 = vcombine.high %v338_v56, %v342_v18  ;;  %v3626_v58 = vcombine.low %v338_v56, %v342_v18 }
  0xf9   :  { %v3618_v21 = vcombine.high %v337_v59, %v341_v3  ;;  %v3624_v48 = vcombine.low %v337_v59, %v341_v3 }
  0xfa   :  { %1096 = vmatpush1.bf16.msra.mxu0 %v3588_v1  ;;  %1137 = vmatpush1.bf16.msra.mxu1 %v3590_v0  ;;  %5164 = vst [vmem:[#allocation127_spill] sm:$0xff] %v3620_v43  ;;  %v330_v0 = vld [vmem:[#allocation4 + $0x318] sm:$0xff]  ;;  %5166 = vst [vmem:[#allocation129_spill] sm:$0xff] %v3626_v58 }
  0xfb   :  { %1097 = vmatprep.subr.bf16.mxu0 %v3594_v35  ;;  %1138 = vmatprep.subr.bf16.mxu1 %v3596_v57  ;;  %5163 = vst [vmem:[#allocation126_spill] sm:$0xff] %v3618_v21  ;;  %v329_v57 = vld [vmem:[#allocation4 + $0x310] sm:$0xff]  ;;  %v334_v1 = vld [vmem:[#allocation4 + $0x338] sm:$0xff]  ;;  %5165 = vst [vmem:[#allocation128_spill] sm:$0xff] %v3624_v48 }
  0xfc   :  { %v333_v35 = vld [vmem:[#allocation4 + $0x330] sm:$0xff]  ;;  %v3632_v6 = vcombine.high %v330_v0, %v334_v1  ;;  %v3638_v18 = vcombine.low %v330_v0, %v334_v1 }
  0xfd   :  { %v3630_v42 = vcombine.high %v329_v57, %v333_v35  ;;  %v3636_v3 = vcombine.low %v329_v57, %v333_v35 }
  0xfe   :  { %1098 = vmatpush2.bf16.msra.mxu0 %v3600_v34  ;;  %1139 = vmatpush2.bf16.msra.mxu1 %v3602_v49  ;;  %5168 = vst [vmem:[#allocation131_spill] sm:$0xff] %v3632_v6  ;;  %v322_v49 = vld [vmem:[#allocation4 + $0x2d8] sm:$0xff]  ;;  %5170 = vst [vmem:[#allocation133_spill] sm:$0xff] %v3638_v18 }
  0xff   :  { %1099 = vmatprep.subr.bf16.mxu0 %v3606_v32  ;;  %1140 = vmatprep.subr.bf16.mxu1 %v3608_v17  ;;  %5167 = vst [vmem:[#allocation130_spill] sm:$0xff] %v3630_v42  ;;  %v321_v17 = vld [vmem:[#allocation4 + $0x2d0] sm:$0xff]  ;;  %v326_v34 = vld [vmem:[#allocation4 + $0x2f8] sm:$0xff]  ;;  %5169 = vst [vmem:[#allocation132_spill] sm:$0xff] %v3636_v3 }
 0x100   :  { %v325_v32 = vld [vmem:[#allocation4 + $0x2f0] sm:$0xff]  ;;  %v3644_v59 = vcombine.high %v322_v49, %v326_v34  ;;  %v3650_v1 = vcombine.low %v322_v49, %v326_v34 }
 0x101   :  { %v3642_v56 = vcombine.high %v321_v17, %v325_v32  ;;  %v3648_v35 = vcombine.low %v321_v17, %v325_v32 }
 0x102   :  { %1100 = vmatpush2.bf16.msra.mxu0 %v3612_v20  ;;  %1141 = vmatpush2.bf16.msra.mxu1 %v3614_v51  ;;  %5172 = vst [vmem:[#allocation135_spill] sm:$0xff] %v3644_v59  ;;  %v314_v51 = vld [vmem:[#allocation4 + $0x298] sm:$0xff]  ;;  %5174 = vst [vmem:[#allocation137_spill] sm:$0xff] %v3650_v1 }
 0x103   :  { %1101 = vmatprep.subr.bf16.mxu0 %v3618_v21  ;;  %1142 = vmatprep.subr.bf16.mxu1 %v3620_v43  ;;  %5171 = vst [vmem:[#allocation134_spill] sm:$0xff] %v3642_v56  ;;  %v313_v43 = vld [vmem:[#allocation4 + $0x290] sm:$0xff]  ;;  %v318_v20 = vld [vmem:[#allocation4 + $0x2b8] sm:$0xff]  ;;  %5173 = vst [vmem:[#allocation136_spill] sm:$0xff] %v3648_v35 }
 0x104   :  { %v317_v21 = vld [vmem:[#allocation4 + $0x2b0] sm:$0xff]  ;;  %v3656_v57 = vcombine.high %v314_v51, %v318_v20  ;;  %v3662_v34 = vcombine.low %v314_v51, %v318_v20 }
 0x105   :  { %v3654_v0 = vcombine.high %v313_v43, %v317_v21  ;;  %v3660_v32 = vcombine.low %v313_v43, %v317_v21 }
 0x106   :  { %1102 = vmatpush2.bf16.msra.mxu0 %v3624_v48  ;;  %1143 = vmatpush2.bf16.msra.mxu1 %v3626_v58  ;;  %5176 = vst [vmem:[#allocation139_spill] sm:$0xff] %v3656_v57  ;;  %v306_v58 = vld [vmem:[#allocation4 + $0x258] sm:$0xff]  ;;  %5178 = vst [vmem:[#allocation141_spill] sm:$0xff] %v3662_v34 }
 0x107   :  { %1103 = vmatprep.subr.bf16.mxu0 %v3630_v42  ;;  %1144 = vmatprep.subr.bf16.mxu1 %v3632_v6  ;;  %5175 = vst [vmem:[#allocation138_spill] sm:$0xff] %v3654_v0  ;;  %v305_v6 = vld [vmem:[#allocation4 + $0x250] sm:$0xff]  ;;  %v310_v48 = vld [vmem:[#allocation4 + $0x278] sm:$0xff]  ;;  %5177 = vst [vmem:[#allocation140_spill] sm:$0xff] %v3660_v32 }
 0x108   :  { %v309_v42 = vld [vmem:[#allocation4 + $0x270] sm:$0xff]  ;;  %v3668_v17 = vcombine.high %v306_v58, %v310_v48  ;;  %v3674_v20 = vcombine.low %v306_v58, %v310_v48  ;;  %v5188_v48 = vld [vmem:[#allocation50_spill] sm:$0xff] }
 0x109   :  { %v3666_v49 = vcombine.high %v305_v6, %v309_v42  ;;  %v3672_v21 = vcombine.low %v305_v6, %v309_v42  ;;  %v5189_v58 = vld [vmem:[#allocation51_spill] sm:$0xff]  ;;  %v5190_v42 = vld [vmem:[#allocation52_spill] sm:$0xff]  ;;  %v5191_v6 = vld [vmem:[#allocation53_spill] sm:$0xff] }
 0x10a   :  { %1104 = vmatpush2.bf16.msra.mxu0 %v3636_v3  ;;  %1145 = vmatpush2.bf16.msra.mxu1 %v3638_v18  ;;  %5180 = vst [vmem:[#allocation143_spill] sm:$0xff] %v3668_v17  ;;  %v298_v18 = vld [vmem:[#allocation4 + $0x218] sm:$0xff]  ;;  %5182 = vst [vmem:[#allocation145_spill] sm:$0xff] %v3674_v20 }
 0x10b   :  { %1105 = vmatprep.subr.bf16.mxu0 %v3642_v56  ;;  %1146 = vmatprep.subr.bf16.mxu1 %v3644_v59  ;;  %5179 = vst [vmem:[#allocation142_spill] sm:$0xff] %v3666_v49  ;;  %v297_v59 = vld [vmem:[#allocation4 + $0x210] sm:$0xff]  ;;  %v302_v3 = vld [vmem:[#allocation4 + $0x238] sm:$0xff]  ;;  %5181 = vst [vmem:[#allocation144_spill] sm:$0xff] %v3672_v21 }
 0x10c   :  { %v301_v56 = vld [vmem:[#allocation4 + $0x230] sm:$0xff]  ;;  %v3680_v43 = vcombine.high %v298_v18, %v302_v3 }
 0x10d   :  { %v3678_v51 = vcombine.high %v297_v59, %v301_v56 }
 0x10e   :  { %1106 = vmatpush2.bf16.msra.mxu0 %v3648_v35  ;;  %1147 = vmatpush2.bf16.msra.mxu1 %v3650_v1  ;;  %5184 = vst [vmem:[#allocation147_spill] sm:$0xff] %v3680_v43 }
 0x10f   :  { %1107 = vmatprep.subr.bf16.mxu0 %v3654_v0  ;;  %1148 = vmatprep.subr.bf16.mxu1 %v3656_v57  ;;  %5183 = vst [vmem:[#allocation146_spill] sm:$0xff] %v3678_v51  ;;  %v3684_v57 = vcombine.low %v297_v59, %v301_v56  ;;  %v5194_v56 = vld [vmem:[#allocation56_spill] sm:$0xff]  ;;  %v5195_v59 = vld [vmem:[#allocation57_spill] sm:$0xff] }
 0x111   :  { %5185 = vst [vmem:[#allocation148_spill] sm:$0xff] %v3684_v57 }
 0x112   :  { %1108 = vmatpush2.bf16.msra.mxu0 %v3660_v32  ;;  %1149 = vmatpush2.bf16.msra.mxu1 %v3662_v34  ;;  %v3686_v32 = vcombine.low %v298_v18, %v302_v3  ;;  %v5192_v3 = vld [vmem:[#allocation54_spill] sm:$0xff]  ;;  %v5193_v18 = vld [vmem:[#allocation55_spill] sm:$0xff] }
 0x113   :  { %1109 = vmatprep.subr.bf16.mxu0 %v3666_v49  ;;  %1150 = vmatprep.subr.bf16.mxu1 %v3668_v17 }
 0x114   :  { %5186 = vst [vmem:[#allocation149_spill] sm:$0xff] %v3686_v32 }
 0x116   :  { %1110 = vmatpush2.bf16.msra.mxu0 %v3672_v21  ;;  %1151 = vmatpush2.bf16.msra.mxu1 %v3674_v20 }
 0x117   :  { %1111 = vmatprep.subr.bf16.mxu0 %v3678_v51  ;;  %1152 = vmatprep.subr.bf16.mxu1 %v3680_v43 }
 0x11a   :  { %1112 = vmatpush2.bf16.msra.mxu0 %v3684_v57  ;;  %1153 = vmatpush2.bf16.msra.mxu1 %v3686_v32 }
 0x11b   :  { %1221 = vmatprep.subr.bf16.mxu0 %v3254_v4  ;;  %1262 = vmatprep.subr.bf16.mxu1 %v3258_v9 }
 0x11d   :  { %1114 = vmatmul.mubr.bf16.vlgmr.msra.gmra.mxu0 %v3504_v50  ;;  %1155 = vmatmul.mubr.bf16.vlgmr.msra.gmra.mxu1 %v3504_v50  ;;  %v5187_v50 = vld [vmem:[#allocation49_spill] sm:$0xff] }
 0x11e   :  { %1222 = vmatpush1.bf16.msra.mxu0 %v3256_v7  ;;  %1263 = vmatpush1.bf16.msra.mxu1 %v3260_v10 }
 0x11f   :  { %1223 = vmatprep.subr.bf16.mxu0 %v3263_v14  ;;  %1264 = vmatprep.subr.bf16.mxu1 %v3265_v15 }
 0x122   :  { %1224 = vmatpush1.bf16.msra.mxu0 %v3269_v16  ;;  %1265 = vmatpush1.bf16.msra.mxu1 %v3273_v19 }
 0x123   :  { %1225 = vmatprep.subr.bf16.mxu0 %v3276_v22  ;;  %1266 = vmatprep.subr.bf16.mxu1 %v3278_v23 }
 0x126   :  { %1226 = vmatpush1.bf16.msra.mxu0 %v3281_v28  ;;  %1267 = vmatpush1.bf16.msra.mxu1 %v3285_v29 }
 0x127   :  { %1227 = vmatprep.subr.bf16.mxu0 %v3287_v30  ;;  %1268 = vmatprep.subr.bf16.mxu1 %v3290_v31 }
 0x12a   :  { %1228 = vmatpush1.bf16.msra.mxu0 %v3293_v36  ;;  %1269 = vmatpush1.bf16.msra.mxu1 %v3297_v37 }
 0x12b   :  { %1229 = vmatprep.subr.bf16.mxu0 %v3299_v38  ;;  %1270 = vmatprep.subr.bf16.mxu1 %v3302_v39 }
 0x12e   :  { %1230 = vmatpush1.bf16.msra.mxu0 %v3305_v44  ;;  %1271 = vmatpush1.bf16.msra.mxu1 %v3309_v45 }
 0x12f   :  { %1231 = vmatprep.subr.bf16.mxu0 %v3311_v46  ;;  %1272 = vmatprep.subr.bf16.mxu1 %v3314_v47 }
 0x132   :  { %1232 = vmatpush1.bf16.msra.mxu0 %v3317_v52  ;;  %1273 = vmatpush1.bf16.msra.mxu1 %v3321_v53 }
 0x133   :  { %1233 = vmatprep.subr.bf16.mxu0 %v3323_v54  ;;  %1274 = vmatprep.subr.bf16.mxu1 %v3326_v55 }
 0x136   :  { %1234 = vmatpush1.bf16.msra.mxu0 %v3329_v60  ;;  %1275 = vmatpush1.bf16.msra.mxu1 %v3333_v61  ;;  %v5228_v60 = vld [vmem:[#allocation85_spill] sm:$0xff] }
 0x137   :  { %1235 = vmatprep.subr.bf16.mxu0 %v3335_v62  ;;  %1276 = vmatprep.subr.bf16.mxu1 %v3338_v63  ;;  %v5216_v63 = vld [vmem:[#allocation88_spill] sm:$0xff] }
 0x13a   :  { %1236 = vmatpush1.bf16.msra.mxu0 %v3341_v8  ;;  %1277 = vmatpush1.bf16.msra.mxu1 %v3345_v11 }
 0x13b   :  { %1237 = vmatprep.subr.bf16.mxu0 %v3347_v12  ;;  %1278 = vmatprep.subr.bf16.mxu1 %v3350_v13 }
 0x13e   :  { %1238 = vmatpush2.bf16.msra.mxu0 %v3353_v24  ;;  %1279 = vmatpush2.bf16.msra.mxu1 %v3357_v25 }
 0x13f   :  { %1239 = vmatprep.subr.bf16.mxu0 %v3359_v26  ;;  %1280 = vmatprep.subr.bf16.mxu1 %v3362_v27 }
 0x142   :  { %1240 = vmatpush2.bf16.msra.mxu0 %v3365_v40  ;;  %1281 = vmatpush2.bf16.msra.mxu1 %v3369_v41  ;;  %v5196_v40 = vld [vmem:[#allocation58_spill] sm:$0xff]  ;;  %v5197_v41 = vld [vmem:[#allocation59_spill] sm:$0xff] }
 0x143   :  { %1241 = vmatprep.subr.bf16.mxu0 %v5187_v50  ;;  %1282 = vmatprep.subr.bf16.mxu1 %v5188_v48  ;;  %v5198_v50 = vld [vmem:[#allocation60_spill] sm:$0xff]  ;;  %v5199_v48 = vld [vmem:[#allocation61_spill] sm:$0xff] }
 0x146   :  { %1242 = vmatpush2.bf16.msra.mxu0 %v5189_v58  ;;  %1283 = vmatpush2.bf16.msra.mxu1 %v5190_v42  ;;  %v5200_v58 = vld [vmem:[#allocation62_spill] sm:$0xff] }
 0x147   :  { %1243 = vmatprep.subr.bf16.mxu0 %v5191_v6  ;;  %1284 = vmatprep.subr.bf16.mxu1 %v5192_v3  ;;  %v5201_v3 = vld [vmem:[#allocation65_spill] sm:$0xff] }
 0x14a   :  { %1244 = vmatpush2.bf16.msra.mxu0 %v5193_v18  ;;  %1285 = vmatpush2.bf16.msra.mxu1 %v5194_v56  ;;  %v5202_v18 = vld [vmem:[#allocation66_spill] sm:$0xff]  ;;  %v5203_v56 = vld [vmem:[#allocation68_spill] sm:$0xff] }
 0x14b   :  { %1245 = vmatprep.subr.bf16.mxu0 %v5195_v59  ;;  %1286 = vmatprep.subr.bf16.mxu1 %v5196_v40  ;;  %v5204_v59 = vld [vmem:[#allocation69_spill] sm:$0xff]  ;;  %v5205_v40 = vld [vmem:[#allocation70_spill] sm:$0xff] }
 0x14e   :  { %1246 = vmatpush2.bf16.msra.mxu0 %v5197_v41  ;;  %1287 = vmatpush2.bf16.msra.mxu1 %v5198_v50  ;;  %v5206_v41 = vld [vmem:[#allocation71_spill] sm:$0xff]  ;;  %v5207_v50 = vld [vmem:[#allocation72_spill] sm:$0xff] }
 0x14f   :  { %1247 = vmatprep.subr.bf16.mxu0 %v5199_v48  ;;  %1288 = vmatprep.subr.bf16.mxu1 %v5200_v58  ;;  %v5208_v48 = vld [vmem:[#allocation73_spill] sm:$0xff]  ;;  %v5209_v58 = vld [vmem:[#allocation74_spill] sm:$0xff] }
 0x152   :  { %1248 = vmatpush2.bf16.msra.mxu0 %v3413_v2  ;;  %1289 = vmatpush2.bf16.msra.mxu1 %v3417_v5  ;;  %v5210_v2 = vld [vmem:[#allocation75_spill] sm:$0xff]  ;;  %v120_v5 = vpop.permute.xlu0 %119 }
 0x153   :  { %1249 = vmatprep.subr.bf16.mxu0 %v5201_v3  ;;  %1290 = vmatprep.subr.bf16.mxu1 %v5202_v18  ;;  %v5211_v3 = vld [vmem:[#allocation79_spill] sm:$0xff]  ;;  %v5212_v18 = vld [vmem:[#allocation80_spill] sm:$0xff] }
 0x154   :  { %v122_v6 = vmul.f32 %v120_v5, %v5211_v3  ;;  %v123_v42 = vmul.f32 %v120_v5, %v5212_v18  ;;  %v5215_v3 = vld [vmem:[#allocation87_spill] sm:$0xff] }
 0x155   :  { %v124_v18 = vmul.f32 %v120_v5, %v5215_v3  ;;  %v5226_v3 = vld [vmem:[#allocation83_spill] sm:$0xff] }
 0x156   :  { %1250 = vmatpush2.bf16.msra.mxu0 %v5203_v56  ;;  %1291 = vmatpush2.bf16.msra.mxu1 %v5204_v59  ;;  %v5213_v56 = vld [vmem:[#allocation81_spill] sm:$0xff]  ;;  %v5214_v59 = vld [vmem:[#allocation82_spill] sm:$0xff] }
 0x157   :  { %1251 = vmatprep.subr.bf16.mxu0 %v5205_v40  ;;  %1292 = vmatprep.subr.bf16.mxu1 %v5206_v41  ;;  %v126_v27 = vadd.f32 %v122_v6, %v5213_v56  ;;  %v127_v26 = vadd.f32 %v123_v42, %v5214_v59  ;;  %v128_v6 = vadd.f32 %v124_v18, %v5216_v63  ;;  %v3773_v18 = vld [vmem:[#allocation2] sm:$0x3]  ;;  %v5225_v63 = vld [vmem:[#allocation86_spill] sm:$0xff] }
 0x15a   :  { %1252 = vmatpush2.bf16.msra.mxu0 %v5207_v50  ;;  %1293 = vmatpush2.bf16.msra.mxu1 %v5208_v48 }
 0x15b   :  { %1303 = vmatprep.subr.bf16.mxu0 %v5209_v58  ;;  %1344 = vmatprep.subr.bf16.mxu1 %v5210_v2 }
 0x19d   :  { %v1033_v40 = vpop.f32.mrf.mxu0  ;;  %v1074_v25 = vpop.f32.mrf.mxu1 }
 0x19e   :  { %v1192_v41 = vadd.f32 %v1033_v40, %v126_v27  ;;  %v1194_v56 = vadd.f32 %v1074_v25, %v128_v6  ;;  %v5217_v40 = vld [vmem:[#allocation89_spill] sm:$0xff]  ;;  %v3213_v25 = vmov 2  }
 0x19f   :  { %v1035_v24 = vpop.f32.mrf.mxu0  ;;  %v1076_v50 = vpop.f32.mrf.mxu1  ;;  %2876 = vset.pattern.permute.xlu1 %v3213_v25 }
 0x1a0   :  { %v2819_v13 = vmul.f32 -1.442695, %v1192_v41  ;;  %v1193_v48 = vadd.f32 %v1035_v24, %v127_v26  ;;  %v5218_v41 = vld [vmem:[#allocation76_spill] sm:$0xff]  ;;  %131 = vperm.xlu1 %2876, %v3773_v18  }
 0x1a1   :  { %v1037_v12 = vpop.f32.mrf.mxu0  ;;  %v1078_v58 = vpop.f32.mrf.mxu1 }
 0x1a2   :  { %2899 = vpow2.f32 %v2819_v13  ;;  %v2820_v2 = vmul.f32 -1.442695, %v1193_v48  ;;  %v5219_v48 = vld [vmem:[#allocation77_spill] sm:$0xff] }
 0x1a3   :  { %v1038_v11 = vpop.f32.mrf.mxu0  ;;  %v1079_v8 = vpop.f32.mrf.mxu1  ;;  %5221 = vst [vmem:[#allocation77_spill] sm:$0xff] %v3773_v18 }
 0x1a4   :  { %2901 = vpow2.f32 %v2820_v2  ;;  %v91_v2 = vsub.s32 2, %v5218_v41 }
 0x1a5   :  { %2903 = vtanh.f32 %v1194_v56 }
 0x1a6   :  { %v3771_v58 = vrot.slane %v5219_v48, %v91_v2  ;;  %v3784_v61 = vrot.slane %v5226_v3, %v91_v2 }
 0x1a8   :  { %5220 = vst [vmem:[#allocation89_spill] sm:$0xff] %v3771_v58  ;;  %5227 = vst [vmem:[#allocation83_spill] sm:$0xff] %v3784_v61 }
 0x1af   :  { %v2900_v42 = vpop.eup %2899 }
 0x1b0   :  { %v1199_v59 = vadd.f32 1.0, %v2900_v42 }
 0x1b1   :  { %v2902_v62 = vpop.eup %2901 }
 0x1b2   :  { %2905 = vrcp.f32 %v1199_v59  ;;  %v1205_v27 = vadd.f32 1.0, %v2902_v62  ;;  %v2904_v24 = vpop.eup %2903  ;;  %v5222_v62 = vld [vmem:[#allocation78_spill] sm:$0xff] }
 0x1b3   :  { %v3777_v56 = vrot.slane %v5222_v62, %v91_v2 }
 0x1b4   :  { %2907 = vrcp.f32 %v1205_v27 }
 0x1b5   :  { %5223 = vst [vmem:[#allocation78_spill] sm:$0xff] %v3777_v56 }
 0x1bf   :  { %v2906_v12 = vpop.eup %2905 }
 0x1c0   :  { %v1216_v26 = vmul.f32 %v2906_v12, %v2904_v24  ;;  %v5224_v12 = vld [vmem:[#allocation84_spill] sm:$0xff] }
 0x1c1   :  { %v2908_v13 = vpop.eup %2907 }
 0x1c2   :  { %v1215_v11 = vmul.f32 %v2908_v13, %v5217_v40 }
 0x1c4   :  { %v3767_v8 = vadd.f32 %v1216_v26, %v1215_v11  ;;  %v125_v26 = vmul.f32 %v120_v5, %v5224_v12  ;;  %v3788_v5 = vrot.slane %v5228_v60, %v91_v2 }
 0x1c6   :  { %v129_v62 = vadd.f32 %v125_v26, %v5225_v63  ;;  %5229 = vst [vmem:[#allocation85_spill] sm:$0xff] %v3788_v5 }
 0x1dd   :  { %v1115_v59 = vpop.f32.mrf.mxu0  ;;  %v1156_v6 = vpop.f32.mrf.mxu1 }
 0x1de   :  { %v1163_v42 = vadd.f32 %v1115_v59, %v3771_v58  ;;  %v1195_v59 = vadd.f32 %v1076_v50, %v129_v62 }
 0x1df   :  { %v1117_v27 = vpop.f32.mrf.mxu0  ;;  %v1158_v24 = vpop.f32.mrf.mxu1 }
 0x1e0   :  { %v2816_v13 = vmul.f32 -1.442695, %v1163_v42  ;;  %v1164_v40 = vadd.f32 %v1117_v27, %v3777_v56  ;;  %v1166_v58 = vadd.f32 %v1158_v24, %v3784_v61  ;;  %v2821_v42 = vmul.f32 -1.442695, %v1195_v59 }
 0x1e1   :  { %v1119_v11 = vpop.f32.mrf.mxu0  ;;  %v1160_v48 = vpop.f32.mrf.mxu1 }
 0x1e2   :  { %2909 = vpow2.f32 %v2816_v13  ;;  %v2817_v25 = vmul.f32 -1.442695, %v1164_v40  ;;  %v2818_v27 = vmul.f32 -1.442695, %v1166_v58  ;;  %v1165_v13 = vadd.f32 %v1156_v6, %v3788_v5 }
 0x1e3   :  { %v1120_v41 = vpop.f32.mrf.mxu0  ;;  %v1161_v18 = vpop.f32.mrf.mxu1 }
 0x1e4   :  { %2911 = vpow2.f32 %v2817_v25 }
 0x1e5   :  { %2913 = vpow2.f32 %v2821_v42 }
 0x1e6   :  { %2915 = vpow2.f32 %v2818_v27 }
 0x1ef   :  { %v2910_v11 = vpop.eup %2909 }
 0x1f0   :  { %v1170_v41 = vadd.f32 1.0, %v2910_v11 }
 0x1f1   :  { %v2912_v18 = vpop.eup %2911 }
 0x1f2   :  { %2917 = vrcp.f32 %v1170_v41  ;;  %v1176_v26 = vadd.f32 1.0, %v2912_v18  ;;  %v2914_v3 = vpop.eup %2913 }
 0x1f3   :  { %2919 = vtanh.f32 %v1165_v13  ;;  %v2916_v50 = vpop.eup %2915  ;;  %v1212_v48 = vadd.f32 1.0, %v2914_v3  ;;  %v5231_v3 = vld [vmem:[#allocation90_spill] sm:$0xff] }
 0x1f4   :  { %2921 = vrcp.f32 %v1176_v26  ;;  %v1183_v2 = vadd.f32 1.0, %v2916_v50  ;;  %v5230_v26 = vld [vmem:[#allocation67_spill] sm:$0xff] }
 0x1f5   :  { %2923 = vtanh.f32 %v3767_v8  ;;  %v5232_v50 = vld [vmem:[#allocation91_spill] sm:$0xff] }
 0x1f6   :  { %2925 = vrcp.f32 %v1212_v48  ;;  %v5235_v48 = vld [vmem:[#allocation94_spill] sm:$0xff] }
 0x1f7   :  { %2927 = vrcp.f32 %v1183_v2  ;;  %v5237_v2 = vld [vmem:[#allocation96_spill] sm:$0xff] }
 0x1ff   :  { %v2918_v40 = vpop.eup %2917 }
 0x200   :  { %v2920_v24 = vpop.eup %2919 }
 0x201   :  { %v2922_v60 = vpop.eup %2921  ;;  %v1187_v58 = vmul.f32 %v2920_v24, %v2918_v40  ;;  %v5233_v40 = vld [vmem:[#allocation92_spill] sm:$0xff]  ;;  %v5234_v24 = vld [vmem:[#allocation93_spill] sm:$0xff] }
 0x202   :  { %v1186_v25 = vmul.f32 0.0, %v2922_v60  ;;  %v2924_v62 = vpop.eup %2923  ;;  %v5236_v60 = vld [vmem:[#allocation95_spill] sm:$0xff] }
 0x203   :  { %v2926_v59 = vpop.eup %2925 }
 0x204   :  { %v3792_v6 = vadd.f32 %v1187_v58, %v1186_v25  ;;  %v2928_v42 = vpop.eup %2927  ;;  %v1219_v11 = vmul.f32 %v2926_v59, %v2924_v62  ;;  %v5238_v25 = vld [vmem:[#allocation97_spill] sm:$0xff]  ;;  %v5239_v58 = vld [vmem:[#allocation98_spill] sm:$0xff]  ;;  %v5240_v62 = vld [vmem:[#allocation99_spill] sm:$0xff] }
 0x205   :  { %v5241_v59 = vld [vmem:[#allocation100_spill] sm:$0xff] }
 0x206   :  { %2929 = vtanh.f32 %v3792_v6  ;;  %v3795_v18 = vpack.c.bf16 %v1219_v11, %v1219_v11  ;;  %v5244_v11 = vld [vmem:[#allocation103_spill] sm:$0xff] }
 0x213   :  { %v2930_v27 = vpop.eup %2929 }
 0x214   :  { %v1190_v13 = vmul.f32 %v2930_v27, %v2928_v42  ;;  %v5242_v42 = vld [vmem:[#allocation101_spill] sm:$0xff]  ;;  %v5243_v27 = vld [vmem:[#allocation102_spill] sm:$0xff] }
 0x216   :  { %v1191_v41 = vpack.c.bf16 %v1190_v13, %v1190_v13  ;;  %v5245_v13 = vld [vmem:[#allocation104_spill] sm:$0xff] }
 0x218   :  { %1253 = vmatprep.mubr.bf16.mxu0 %v1191_v41  ;;  %1294 = vmatprep.mubr.bf16.mxu1 %v1191_v41 }
 0x219   :  { %1254 = vmatmul.mubr.bf16.vlgmr.msra.gmra.mxu0 %v3795_v18  ;;  %1295 = vmatmul.mubr.bf16.vlgmr.msra.gmra.mxu1 %v3795_v18 }
 0x21a   :  { %1304 = vmatpush1.bf16.msra.mxu0 %v3424_v33  ;;  %1345 = vmatpush1.bf16.msra.mxu1 %v5230_v26 }
 0x21b   :  { %1335 = vmatprep.mubr.bf16.mxu0 %v1191_v41  ;;  %1376 = vmatprep.mubr.bf16.mxu1 %v1191_v41  ;;  %v5246_v41 = vld [vmem:[#allocation105_spill] sm:$0xff] }
 0x21c   :  { %1305 = vmatprep.subr.bf16.mxu0 %v5231_v3  ;;  %1346 = vmatprep.subr.bf16.mxu1 %v5232_v50 }
 0x21e   :  { %1306 = vmatpush1.bf16.msra.mxu0 %v5233_v40  ;;  %1347 = vmatpush1.bf16.msra.mxu1 %v5234_v24 }
 0x21f   :  { %1307 = vmatprep.subr.bf16.mxu0 %v5235_v48  ;;  %1348 = vmatprep.subr.bf16.mxu1 %v5236_v60  ;;  %v5247_v60 = vld [vmem:[#allocation106_spill] sm:$0xff] }
 0x222   :  { %1308 = vmatpush1.bf16.msra.mxu0 %v5237_v2  ;;  %1349 = vmatpush1.bf16.msra.mxu1 %v5238_v25  ;;  %v5248_v2 = vld [vmem:[#allocation107_spill] sm:$0xff]  ;;  %v5249_v25 = vld [vmem:[#allocation108_spill] sm:$0xff] }
 0x223   :  { %1309 = vmatprep.subr.bf16.mxu0 %v5239_v58  ;;  %1350 = vmatprep.subr.bf16.mxu1 %v5240_v62  ;;  %v5250_v58 = vld [vmem:[#allocation109_spill] sm:$0xff]  ;;  %v5251_v62 = vld [vmem:[#allocation110_spill] sm:$0xff] }
 0x226   :  { %1310 = vmatpush1.bf16.msra.mxu0 %v5241_v59  ;;  %1351 = vmatpush1.bf16.msra.mxu1 %v5242_v42  ;;  %v5252_v59 = vld [vmem:[#allocation111_spill] sm:$0xff]  ;;  %v5253_v42 = vld [vmem:[#allocation112_spill] sm:$0xff] }
 0x227   :  { %1311 = vmatprep.subr.bf16.mxu0 %v5243_v27  ;;  %1352 = vmatprep.subr.bf16.mxu1 %v5244_v11  ;;  %v5254_v27 = vld [vmem:[#allocation113_spill] sm:$0xff]  ;;  %v5255_v11 = vld [vmem:[#allocation114_spill] sm:$0xff] }
 0x22a   :  { %1312 = vmatpush1.bf16.msra.mxu0 %v5245_v13  ;;  %1353 = vmatpush1.bf16.msra.mxu1 %v5246_v41  ;;  %v5256_v13 = vld [vmem:[#allocation115_spill] sm:$0xff]  ;;  %v5257_v41 = vld [vmem:[#allocation116_spill] sm:$0xff] }
 0x22b   :  { %1313 = vmatprep.subr.bf16.mxu0 %v5247_v60  ;;  %1354 = vmatprep.subr.bf16.mxu1 %v5248_v2  ;;  %v5258_v60 = vld [vmem:[#allocation117_spill] sm:$0xff]  ;;  %v5259_v2 = vld [vmem:[#allocation118_spill] sm:$0xff] }
 0x22e   :  { %1314 = vmatpush1.bf16.msra.mxu0 %v5249_v25  ;;  %1355 = vmatpush1.bf16.msra.mxu1 %v5250_v58  ;;  %v5260_v25 = vld [vmem:[#allocation119_spill] sm:$0xff]  ;;  %v5261_v58 = vld [vmem:[#allocation120_spill] sm:$0xff] }
 0x22f   :  { %1315 = vmatprep.subr.bf16.mxu0 %v5251_v62  ;;  %1356 = vmatprep.subr.bf16.mxu1 %v5252_v59  ;;  %v5262_v62 = vld [vmem:[#allocation121_spill] sm:$0xff]  ;;  %v5263_v59 = vld [vmem:[#allocation122_spill] sm:$0xff] }
 0x232   :  { %1316 = vmatpush1.bf16.msra.mxu0 %v5253_v42  ;;  %1357 = vmatpush1.bf16.msra.mxu1 %v5254_v27  ;;  %v5264_v42 = vld [vmem:[#allocation123_spill] sm:$0xff]  ;;  %v5265_v27 = vld [vmem:[#allocation124_spill] sm:$0xff] }
 0x233   :  { %1317 = vmatprep.subr.bf16.mxu0 %v5255_v11  ;;  %1358 = vmatprep.subr.bf16.mxu1 %v5256_v13  ;;  %v5266_v11 = vld [vmem:[#allocation125_spill] sm:$0xff]  ;;  %v5267_v13 = vld [vmem:[#allocation126_spill] sm:$0xff] }
 0x236   :  { %1318 = vmatpush1.bf16.msra.mxu0 %v5257_v41  ;;  %1359 = vmatpush1.bf16.msra.mxu1 %v5258_v60  ;;  %v5268_v41 = vld [vmem:[#allocation127_spill] sm:$0xff]  ;;  %v5269_v60 = vld [vmem:[#allocation128_spill] sm:$0xff] }
 0x237   :  { %1319 = vmatprep.subr.bf16.mxu0 %v5259_v2  ;;  %1360 = vmatprep.subr.bf16.mxu1 %v5260_v25  ;;  %v5270_v2 = vld [vmem:[#allocation129_spill] sm:$0xff]  ;;  %v5271_v25 = vld [vmem:[#allocation130_spill] sm:$0xff] }
 0x23a   :  { %1320 = vmatpush2.bf16.msra.mxu0 %v5261_v58  ;;  %1361 = vmatpush2.bf16.msra.mxu1 %v5262_v62  ;;  %v5272_v58 = vld [vmem:[#allocation131_spill] sm:$0xff]  ;;  %v5273_v62 = vld [vmem:[#allocation132_spill] sm:$0xff] }
 0x23b   :  { %1321 = vmatprep.subr.bf16.mxu0 %v5263_v59  ;;  %1362 = vmatprep.subr.bf16.mxu1 %v5264_v42  ;;  %v5274_v59 = vld [vmem:[#allocation133_spill] sm:$0xff]  ;;  %v5275_v42 = vld [vmem:[#allocation134_spill] sm:$0xff] }
 0x23e   :  { %1322 = vmatpush2.bf16.msra.mxu0 %v5265_v27  ;;  %1363 = vmatpush2.bf16.msra.mxu1 %v5266_v11  ;;  %v5276_v27 = vld [vmem:[#allocation135_spill] sm:$0xff] }
 0x23f   :  { %1323 = vmatprep.subr.bf16.mxu0 %v5267_v13  ;;  %1364 = vmatprep.subr.bf16.mxu1 %v5268_v41 }
 0x242   :  { %1324 = vmatpush2.bf16.msra.mxu0 %v5269_v60  ;;  %1365 = vmatpush2.bf16.msra.mxu1 %v5270_v2  ;;  %v5277_v60 = vld [vmem:[#allocation139_spill] sm:$0xff]  ;;  %v5278_v2 = vld [vmem:[#allocation140_spill] sm:$0xff] }
 0x243   :  { %1325 = vmatprep.subr.bf16.mxu0 %v5271_v25  ;;  %1366 = vmatprep.subr.bf16.mxu1 %v5272_v58 }
 0x246   :  { %1326 = vmatpush2.bf16.msra.mxu0 %v5273_v62  ;;  %1367 = vmatpush2.bf16.msra.mxu1 %v5274_v59 }
 0x247   :  { %1327 = vmatprep.subr.bf16.mxu0 %v5275_v42  ;;  %1368 = vmatprep.subr.bf16.mxu1 %v5276_v27 }
 0x24a   :  { %1328 = vmatpush2.bf16.msra.mxu0 %v3648_v35  ;;  %1369 = vmatpush2.bf16.msra.mxu1 %v3650_v1 }
 0x24b   :  { %1329 = vmatprep.subr.bf16.mxu0 %v3654_v0  ;;  %1370 = vmatprep.subr.bf16.mxu1 %v5277_v60 }
 0x24e   :  { %1330 = vmatpush2.bf16.msra.mxu0 %v5278_v2  ;;  %1371 = vmatpush2.bf16.msra.mxu1 %v3662_v34 }
 0x24f   :  { %1331 = vmatprep.subr.bf16.mxu0 %v3666_v49  ;;  %1372 = vmatprep.subr.bf16.mxu1 %v3668_v17 }
 0x252   :  { %1332 = vmatpush2.bf16.msra.mxu0 %v3672_v21  ;;  %1373 = vmatpush2.bf16.msra.mxu1 %v3674_v20 }
 0x253   :  { %1333 = vmatprep.subr.bf16.mxu0 %v3678_v51  ;;  %1374 = vmatprep.subr.bf16.mxu1 %v3680_v43 }
 0x256   :  { %1334 = vmatpush2.bf16.msra.mxu0 %v3684_v57  ;;  %1375 = vmatpush2.bf16.msra.mxu1 %v3686_v32 }
 0x257   :  { %1443 = vmatprep.subr.bf16.mxu0 %v3254_v4  ;;  %1484 = vmatprep.subr.bf16.mxu1 %v3258_v9 }
 0x259   :  { %1336 = vmatmul.mubr.bf16.vlgmr.msra.gmra.mxu0 %v3795_v18  ;;  %1377 = vmatmul.mubr.bf16.vlgmr.msra.gmra.mxu1 %v3795_v18  ;;  %v5279_v18 = vld [vmem:[#allocation35_spill] sm:$0xff] }
 0x25a   :  { %1444 = vmatpush1.bf16.msra.mxu0 %v3256_v7  ;;  %1485 = vmatpush1.bf16.msra.mxu1 %v3260_v10 }
 0x25b   :  { %1445 = vmatprep.subr.bf16.mxu0 %v3263_v14  ;;  %1486 = vmatprep.subr.bf16.mxu1 %v3265_v15  ;;  %v5324_v15 = vld [vmem:[#allocation88_spill] sm:$0xff] }
 0x25e   :  { %1446 = vmatpush1.bf16.msra.mxu0 %v3269_v16  ;;  %1487 = vmatpush1.bf16.msra.mxu1 %v3273_v19 }
 0x25f   :  { %1447 = vmatprep.subr.bf16.mxu0 %v3276_v22  ;;  %1488 = vmatprep.subr.bf16.mxu1 %v3278_v23 }
 0x262   :  { %1448 = vmatpush1.bf16.msra.mxu0 %v3281_v28  ;;  %1489 = vmatpush1.bf16.msra.mxu1 %v3285_v29 }
 0x263   :  { %1449 = vmatprep.subr.bf16.mxu0 %v3287_v30  ;;  %1490 = vmatprep.subr.bf16.mxu1 %v3290_v31 }
 0x266   :  { %1450 = vmatpush1.bf16.msra.mxu0 %v3293_v36  ;;  %1491 = vmatpush1.bf16.msra.mxu1 %v3297_v37 }
 0x267   :  { %1451 = vmatprep.subr.bf16.mxu0 %v3299_v38  ;;  %1492 = vmatprep.subr.bf16.mxu1 %v3302_v39  ;;  %v5280_v38 = vld [vmem:[#allocation36_spill] sm:$0xff]  ;;  %v5281_v39 = vld [vmem:[#allocation37_spill] sm:$0xff] }
 0x26a   :  { %1452 = vmatpush1.bf16.msra.mxu0 %v3305_v44  ;;  %1493 = vmatpush1.bf16.msra.mxu1 %v3309_v45  ;;  %v5282_v44 = vld [vmem:[#allocation38_spill] sm:$0xff]  ;;  %v5283_v45 = vld [vmem:[#allocation39_spill] sm:$0xff] }
 0x26b   :  { %1453 = vmatprep.subr.bf16.mxu0 %v3311_v46  ;;  %1494 = vmatprep.subr.bf16.mxu1 %v3314_v47  ;;  %v5284_v46 = vld [vmem:[#allocation40_spill] sm:$0xff]  ;;  %v5285_v47 = vld [vmem:[#allocation41_spill] sm:$0xff] }
 0x26e   :  { %1454 = vmatpush1.bf16.msra.mxu0 %v3317_v52  ;;  %1495 = vmatpush1.bf16.msra.mxu1 %v3321_v53  ;;  %v5286_v52 = vld [vmem:[#allocation42_spill] sm:$0xff]  ;;  %v5287_v53 = vld [vmem:[#allocation43_spill] sm:$0xff] }
 0x26f   :  { %1455 = vmatprep.subr.bf16.mxu0 %v3323_v54  ;;  %1496 = vmatprep.subr.bf16.mxu1 %v3326_v55  ;;  %v5288_v54 = vld [vmem:[#allocation44_spill] sm:$0xff]  ;;  %v5289_v55 = vld [vmem:[#allocation45_spill] sm:$0xff] }
 0x272   :  { %1456 = vmatpush1.bf16.msra.mxu0 %v5279_v18  ;;  %1497 = vmatpush1.bf16.msra.mxu1 %v5280_v38  ;;  %v5290_v18 = vld [vmem:[#allocation46_spill] sm:$0xff]  ;;  %v5291_v38 = vld [vmem:[#allocation47_spill] sm:$0xff] }
 0x273   :  { %1457 = vmatprep.subr.bf16.mxu0 %v5281_v39  ;;  %1498 = vmatprep.subr.bf16.mxu1 %v5282_v44  ;;  %v5292_v39 = vld [vmem:[#allocation48_spill] sm:$0xff]  ;;  %v5293_v44 = vld [vmem:[#allocation49_spill] sm:$0xff] }
 0x276   :  { %1458 = vmatpush1.bf16.msra.mxu0 %v5283_v45  ;;  %1499 = vmatpush1.bf16.msra.mxu1 %v5284_v46  ;;  %v5294_v45 = vld [vmem:[#allocation50_spill] sm:$0xff]  ;;  %v5295_v46 = vld [vmem:[#allocation51_spill] sm:$0xff] }
 0x277   :  { %1459 = vmatprep.subr.bf16.mxu0 %v5285_v47  ;;  %1500 = vmatprep.subr.bf16.mxu1 %v5286_v52  ;;  %v5296_v47 = vld [vmem:[#allocation52_spill] sm:$0xff]  ;;  %v5297_v52 = vld [vmem:[#allocation53_spill] sm:$0xff] }
 0x27a   :  { %1460 = vmatpush2.bf16.msra.mxu0 %v5287_v53  ;;  %1501 = vmatpush2.bf16.msra.mxu1 %v5288_v54  ;;  %v5298_v53 = vld [vmem:[#allocation54_spill] sm:$0xff]  ;;  %v5299_v54 = vld [vmem:[#allocation55_spill] sm:$0xff] }
 0x27b   :  { %1461 = vmatprep.subr.bf16.mxu0 %v5289_v55  ;;  %1502 = vmatprep.subr.bf16.mxu1 %v5290_v18  ;;  %v5300_v55 = vld [vmem:[#allocation56_spill] sm:$0xff]  ;;  %v5301_v18 = vld [vmem:[#allocation57_spill] sm:$0xff] }
 0x27e   :  { %1462 = vmatpush2.bf16.msra.mxu0 %v5291_v38  ;;  %1503 = vmatpush2.bf16.msra.mxu1 %v5292_v39  ;;  %v5302_v38 = vld [vmem:[#allocation58_spill] sm:$0xff]  ;;  %v5303_v39 = vld [vmem:[#allocation59_spill] sm:$0xff] }
 0x27f   :  { %1463 = vmatprep.subr.bf16.mxu0 %v5293_v44  ;;  %1504 = vmatprep.subr.bf16.mxu1 %v5294_v45  ;;  %v5304_v44 = vld [vmem:[#allocation60_spill] sm:$0xff]  ;;  %v5305_v45 = vld [vmem:[#allocation61_spill] sm:$0xff] }
 0x282   :  { %1464 = vmatpush2.bf16.msra.mxu0 %v5295_v46  ;;  %1505 = vmatpush2.bf16.msra.mxu1 %v5296_v47  ;;  %v5306_v46 = vld [vmem:[#allocation62_spill] sm:$0xff]  ;;  %v5307_v47 = vld [vmem:[#allocation63_spill] sm:$0xff] }
 0x283   :  { %1465 = vmatprep.subr.bf16.mxu0 %v5297_v52  ;;  %1506 = vmatprep.subr.bf16.mxu1 %v5298_v53  ;;  %v5308_v52 = vld [vmem:[#allocation64_spill] sm:$0xff]  ;;  %v5309_v53 = vld [vmem:[#allocation65_spill] sm:$0xff] }
 0x286   :  { %1466 = vmatpush2.bf16.msra.mxu0 %v5299_v54  ;;  %1507 = vmatpush2.bf16.msra.mxu1 %v5300_v55  ;;  %v5310_v54 = vld [vmem:[#allocation66_spill] sm:$0xff]  ;;  %v5311_v55 = vld [vmem:[#allocation68_spill] sm:$0xff] }
 0x287   :  { %1467 = vmatprep.subr.bf16.mxu0 %v5301_v18  ;;  %1508 = vmatprep.subr.bf16.mxu1 %v5302_v38  ;;  %v5312_v18 = vld [vmem:[#allocation69_spill] sm:$0xff]  ;;  %v5313_v38 = vld [vmem:[#allocation70_spill] sm:$0xff] }
 0x28a   :  { %1468 = vmatpush2.bf16.msra.mxu0 %v5303_v39  ;;  %1509 = vmatpush2.bf16.msra.mxu1 %v5304_v44  ;;  %v5314_v39 = vld [vmem:[#allocation71_spill] sm:$0xff]  ;;  %v5315_v44 = vld [vmem:[#allocation72_spill] sm:$0xff] }
 0x28b   :  { %1469 = vmatprep.subr.bf16.mxu0 %v5305_v45  ;;  %1510 = vmatprep.subr.bf16.mxu1 %v5306_v46  ;;  %v5316_v45 = vld [vmem:[#allocation73_spill] sm:$0xff]  ;;  %v5317_v46 = vld [vmem:[#allocation74_spill] sm:$0xff] }
 0x28e   :  { %1470 = vmatpush2.bf16.msra.mxu0 %v5307_v47  ;;  %1511 = vmatpush2.bf16.msra.mxu1 %v5308_v52  ;;  %v5318_v47 = vld [vmem:[#allocation75_spill] sm:$0xff]  ;;  %v132_v52 = vpop.permute.xlu1 %131 }
 0x28f   :  { %1471 = vmatprep.subr.bf16.mxu0 %v5309_v53  ;;  %1512 = vmatprep.subr.bf16.mxu1 %v5310_v54  ;;  %v5319_v53 = vld [vmem:[#allocation79_spill] sm:$0xff]  ;;  %v5320_v54 = vld [vmem:[#allocation80_spill] sm:$0xff] }
 0x290   :  { %v134_v37 = vmul.f32 %v132_v52, %v5319_v53  ;;  %v135_v36 = vmul.f32 %v132_v52, %v5320_v54  ;;  %v5323_v53 = vld [vmem:[#allocation87_spill] sm:$0xff] }
 0x291   :  { %v136_v54 = vmul.f32 %v132_v52, %v5323_v53 }
 0x292   :  { %1472 = vmatpush2.bf16.msra.mxu0 %v5311_v55  ;;  %1513 = vmatpush2.bf16.msra.mxu1 %v5312_v18  ;;  %v5321_v55 = vld [vmem:[#allocation81_spill] sm:$0xff]  ;;  %v5322_v18 = vld [vmem:[#allocation82_spill] sm:$0xff] }
 0x293   :  { %1473 = vmatprep.subr.bf16.mxu0 %v5313_v38  ;;  %1514 = vmatprep.subr.bf16.mxu1 %v5314_v39  ;;  %v138_v31 = vadd.f32 %v134_v37, %v5321_v55  ;;  %v139_v30 = vadd.f32 %v135_v36, %v5322_v18  ;;  %v140_v37 = vadd.f32 %v136_v54, %v5324_v15 }
 0x296   :  { %1474 = vmatpush2.bf16.msra.mxu0 %v5315_v44  ;;  %1515 = vmatpush2.bf16.msra.mxu1 %v5316_v45 }
 0x297   :  { %1525 = vmatprep.subr.bf16.mxu0 %v5317_v46  ;;  %1566 = vmatprep.subr.bf16.mxu1 %v5318_v47 }
 0x2d9   :  { %v1255_v38 = vpop.f32.mrf.mxu0  ;;  %v1296_v29 = vpop.f32.mrf.mxu1 }
 0x2da   :  { %v1414_v39 = vadd.f32 %v1255_v38, %v138_v31  ;;  %v1416_v55 = vadd.f32 %v1296_v29, %v140_v37  ;;  %v3214_v38 = vmov 3  }
 0x2db   :  { %v1257_v28 = vpop.f32.mrf.mxu0  ;;  %v1298_v44 = vpop.f32.mrf.mxu1  ;;  %2877 = vset.pattern.permute.xlu1 %v3214_v38 }
 0x2dc   :  { %v2825_v23 = vmul.f32 -1.442695, %v1414_v39  ;;  %v1415_v45 = vadd.f32 %v1257_v28, %v139_v30  ;;  %v5325_v39 = vld [vmem:[#allocation77_spill] sm:$0xff] }
 0x2dd   :  { %v1259_v22 = vpop.f32.mrf.mxu0  ;;  %v1300_v46 = vpop.f32.mrf.mxu1  ;;  %143 = vperm.xlu1 %2877, %v5325_v39  }
 0x2de   :  { %2931 = vpow2.f32 %v2825_v23  ;;  %v2826_v47 = vmul.f32 -1.442695, %v1415_v45  ;;  %v5326_v46 = vld [vmem:[#allocation89_spill] sm:$0xff] }
 0x2df   :  { %v1260_v19 = vpop.f32.mrf.mxu0  ;;  %v1301_v16 = vpop.f32.mrf.mxu1 }
 0x2e0   :  { %2933 = vpow2.f32 %v2826_v47 }
 0x2e1   :  { %2935 = vtanh.f32 %v1416_v55 }
 0x2eb   :  { %v2932_v36 = vpop.eup %2931 }
 0x2ec   :  { %v1421_v18 = vadd.f32 1.0, %v2932_v36 }
 0x2ed   :  { %v2934_v14 = vpop.eup %2933 }
 0x2ee   :  { %2937 = vrcp.f32 %v1421_v18  ;;  %v1427_v31 = vadd.f32 1.0, %v2934_v14  ;;  %v2936_v28 = vpop.eup %2935  ;;  %v137_v14 = vmul.f32 %v132_v52, %v5224_v12 }
 0x2f0   :  { %2939 = vrcp.f32 %v1427_v31 }
 0x2fb   :  { %v2938_v22 = vpop.eup %2937 }
 0x2fc   :  { %v1438_v30 = vmul.f32 %v2938_v22, %v2936_v28 }
 0x2fd   :  { %v2940_v23 = vpop.eup %2939 }
 0x2fe   :  { %v1437_v19 = vmul.f32 %v2940_v23, %v3767_v8 }
 0x300   :  { %v3936_v16 = vadd.f32 %v1438_v30, %v1437_v19  ;;  %v141_v30 = vadd.f32 %v137_v14, %v5225_v63 }
 0x302   :  { %v1417_v23 = vadd.f32 %v1298_v44, %v141_v30 }
 0x304   :  { %v2827_v38 = vmul.f32 -1.442695, %v1417_v23 }
 0x319   :  { %v1337_v29 = vpop.f32.mrf.mxu0  ;;  %v1378_v45 = vpop.f32.mrf.mxu1 }
 0x31a   :  { %v1385_v47 = vadd.f32 %v1337_v29, %v5326_v46  ;;  %v1387_v52 = vadd.f32 %v1378_v45, %v3788_v5 }
 0x31b   :  { %v1339_v54 = vpop.f32.mrf.mxu0  ;;  %v1380_v55 = vpop.f32.mrf.mxu1 }
 0x31c   :  { %v2822_v18 = vmul.f32 -1.442695, %v1385_v47  ;;  %v1386_v37 = vadd.f32 %v1339_v54, %v3777_v56  ;;  %v1388_v19 = vadd.f32 %v1380_v55, %v3784_v61 }
 0x31d   :  { %v1341_v36 = vpop.f32.mrf.mxu0  ;;  %v1382_v31 = vpop.f32.mrf.mxu1 }
 0x31e   :  { %2941 = vpow2.f32 %v2822_v18  ;;  %v2823_v8 = vmul.f32 -1.442695, %v1386_v37  ;;  %v2824_v29 = vmul.f32 -1.442695, %v1388_v19 }
 0x31f   :  { %v1342_v28 = vpop.f32.mrf.mxu0  ;;  %v1383_v22 = vpop.f32.mrf.mxu1 }
 0x320   :  { %2943 = vpow2.f32 %v2823_v8 }
 0x321   :  { %2945 = vpow2.f32 %v2827_v38 }
 0x322   :  { %2947 = vpow2.f32 %v2824_v29 }
 0x32b   :  { %v2942_v46 = vpop.eup %2941 }
 0x32c   :  { %v1392_v47 = vadd.f32 1.0, %v2942_v46 }
 0x32d   :  { %v2944_v54 = vpop.eup %2943 }
 0x32e   :  { %2949 = vrcp.f32 %v1392_v47  ;;  %v1398_v18 = vadd.f32 1.0, %v2944_v54  ;;  %v2946_v37 = vpop.eup %2945  ;;  %v5328_v54 = vld [vmem:[#allocation96_spill] sm:$0xff] }
 0x32f   :  { %2951 = vtanh.f32 %v1387_v52  ;;  %v2948_v36 = vpop.eup %2947  ;;  %v1434_v44 = vadd.f32 1.0, %v2946_v37  ;;  %v5330_v37 = vld [vmem:[#allocation98_spill] sm:$0xff] }
 0x330   :  { %2953 = vrcp.f32 %v1398_v18  ;;  %v1405_v55 = vadd.f32 1.0, %v2948_v36  ;;  %v5329_v18 = vld [vmem:[#allocation97_spill] sm:$0xff]  ;;  %v5331_v36 = vld [vmem:[#allocation99_spill] sm:$0xff] }
 0x331   :  { %2955 = vtanh.f32 %v3936_v16 }
 0x332   :  { %2957 = vrcp.f32 %v1434_v44  ;;  %v5334_v44 = vld [vmem:[#allocation102_spill] sm:$0xff] }
 0x333   :  { %2959 = vrcp.f32 %v1405_v55  ;;  %v5336_v55 = vld [vmem:[#allocation104_spill] sm:$0xff] }
 0x33b   :  { %v2950_v14 = vpop.eup %2949 }
 0x33c   :  { %v2952_v31 = vpop.eup %2951 }
 0x33d   :  { %v2954_v8 = vpop.eup %2953  ;;  %v1409_v28 = vmul.f32 %v2952_v31, %v2950_v14  ;;  %v5332_v14 = vld [vmem:[#allocation100_spill] sm:$0xff]  ;;  %v5333_v31 = vld [vmem:[#allocation101_spill] sm:$0xff] }
 0x33e   :  { %v1408_v22 = vmul.f32 %v2954_v8, %v3792_v6  ;;  %v2956_v46 = vpop.eup %2955  ;;  %v5327_v6 = vld [vmem:[#allocation95_spill] sm:$0xff] }
 0x33f   :  { %v2958_v30 = vpop.eup %2957  ;;  %v5335_v8 = vld [vmem:[#allocation103_spill] sm:$0xff] }
 0x340   :  { %v3947_v45 = vadd.f32 %v1409_v28, %v1408_v22  ;;  %v2960_v23 = vpop.eup %2959  ;;  %v1441_v38 = vmul.f32 %v2958_v30, %v2956_v46  ;;  %v5337_v28 = vld [vmem:[#allocation105_spill] sm:$0xff]  ;;  %v5338_v22 = vld [vmem:[#allocation106_spill] sm:$0xff]  ;;  %v5339_v46 = vld [vmem:[#allocation107_spill] sm:$0xff] }
 0x341   :  { %v5340_v30 = vld [vmem:[#allocation108_spill] sm:$0xff] }
 0x342   :  { %2961 = vtanh.f32 %v3947_v45  ;;  %v3950_v47 = vpack.c.bf16 %v1441_v38, %v1441_v38  ;;  %v5343_v38 = vld [vmem:[#allocation111_spill] sm:$0xff] }
 0x34f   :  { %v2962_v19 = vpop.eup %2961 }
 0x350   :  { %v1412_v29 = vmul.f32 %v2962_v19, %v2960_v23  ;;  %v5341_v23 = vld [vmem:[#allocation109_spill] sm:$0xff]  ;;  %v5342_v19 = vld [vmem:[#allocation110_spill] sm:$0xff] }
 0x352   :  { %v1413_v52 = vpack.c.bf16 %v1412_v29, %v1412_v29  ;;  %v5344_v29 = vld [vmem:[#allocation112_spill] sm:$0xff] }
 0x354   :  { %1475 = vmatprep.mubr.bf16.mxu0 %v1413_v52  ;;  %1516 = vmatprep.mubr.bf16.mxu1 %v1413_v52 }
 0x355   :  { %1476 = vmatmul.mubr.bf16.vlgmr.msra.gmra.mxu0 %v3950_v47  ;;  %1517 = vmatmul.mubr.bf16.vlgmr.msra.gmra.mxu1 %v3950_v47 }
 0x356   :  { %1526 = vmatpush1.bf16.msra.mxu0 %v3424_v33  ;;  %1567 = vmatpush1.bf16.msra.mxu1 %v5230_v26 }
 0x357   :  { %1557 = vmatprep.mubr.bf16.mxu0 %v1413_v52  ;;  %1598 = vmatprep.mubr.bf16.mxu1 %v1413_v52  ;;  %v5345_v52 = vld [vmem:[#allocation113_spill] sm:$0xff] }
 0x358   :  { %1527 = vmatprep.subr.bf16.mxu0 %v5231_v3  ;;  %1568 = vmatprep.subr.bf16.mxu1 %v5232_v50 }
 0x35a   :  { %1528 = vmatpush1.bf16.msra.mxu0 %v5233_v40  ;;  %1569 = vmatpush1.bf16.msra.mxu1 %v5234_v24 }
 0x35b   :  { %1529 = vmatprep.subr.bf16.mxu0 %v5235_v48  ;;  %1570 = vmatprep.subr.bf16.mxu1 %v5327_v6 }
 0x35e   :  { %1530 = vmatpush1.bf16.msra.mxu0 %v5328_v54  ;;  %1571 = vmatpush1.bf16.msra.mxu1 %v5329_v18 }
 0x35f   :  { %1531 = vmatprep.subr.bf16.mxu0 %v5330_v37  ;;  %1572 = vmatprep.subr.bf16.mxu1 %v5331_v36 }
 0x362   :  { %1532 = vmatpush1.bf16.msra.mxu0 %v5332_v14  ;;  %1573 = vmatpush1.bf16.msra.mxu1 %v5333_v31 }
 0x363   :  { %1533 = vmatprep.subr.bf16.mxu0 %v5334_v44  ;;  %1574 = vmatprep.subr.bf16.mxu1 %v5335_v8  ;;  %v5346_v8 = vld [vmem:[#allocation114_spill] sm:$0xff] }
 0x366   :  { %1534 = vmatpush1.bf16.msra.mxu0 %v5336_v55  ;;  %1575 = vmatpush1.bf16.msra.mxu1 %v5337_v28  ;;  %v5347_v55 = vld [vmem:[#allocation115_spill] sm:$0xff]  ;;  %v5348_v28 = vld [vmem:[#allocation116_spill] sm:$0xff] }
 0x367   :  { %1535 = vmatprep.subr.bf16.mxu0 %v5338_v22  ;;  %1576 = vmatprep.subr.bf16.mxu1 %v5339_v46  ;;  %v5349_v22 = vld [vmem:[#allocation117_spill] sm:$0xff]  ;;  %v5350_v46 = vld [vmem:[#allocation118_spill] sm:$0xff] }
 0x36a   :  { %1536 = vmatpush1.bf16.msra.mxu0 %v5340_v30  ;;  %1577 = vmatpush1.bf16.msra.mxu1 %v5341_v23  ;;  %v5351_v30 = vld [vmem:[#allocation119_spill] sm:$0xff]  ;;  %v5352_v23 = vld [vmem:[#allocation120_spill] sm:$0xff] }
 0x36b   :  { %1537 = vmatprep.subr.bf16.mxu0 %v5342_v19  ;;  %1578 = vmatprep.subr.bf16.mxu1 %v5343_v38  ;;  %v5353_v19 = vld [vmem:[#allocation121_spill] sm:$0xff]  ;;  %v5354_v38 = vld [vmem:[#allocation122_spill] sm:$0xff] }
 0x36e   :  { %1538 = vmatpush1.bf16.msra.mxu0 %v5344_v29  ;;  %1579 = vmatpush1.bf16.msra.mxu1 %v5345_v52  ;;  %v5355_v29 = vld [vmem:[#allocation123_spill] sm:$0xff]  ;;  %v5356_v52 = vld [vmem:[#allocation124_spill] sm:$0xff] }
 0x36f   :  { %1539 = vmatprep.subr.bf16.mxu0 %v5346_v8  ;;  %1580 = vmatprep.subr.bf16.mxu1 %v5347_v55 }
 0x372   :  { %1540 = vmatpush1.bf16.msra.mxu0 %v5348_v28  ;;  %1581 = vmatpush1.bf16.msra.mxu1 %v5349_v22  ;;  %v5357_v22 = vld [vmem:[#allocation128_spill] sm:$0xff] }
 0x373   :  { %1541 = vmatprep.subr.bf16.mxu0 %v5350_v46  ;;  %1582 = vmatprep.subr.bf16.mxu1 %v5351_v30  ;;  %v5358_v46 = vld [vmem:[#allocation129_spill] sm:$0xff] }
 0x376   :  { %1542 = vmatpush2.bf16.msra.mxu0 %v5352_v23  ;;  %1583 = vmatpush2.bf16.msra.mxu1 %v5353_v19 }
 0x377   :  { %1543 = vmatprep.subr.bf16.mxu0 %v5354_v38  ;;  %1584 = vmatprep.subr.bf16.mxu1 %v5355_v29 }
 0x37a   :  { %1544 = vmatpush2.bf16.msra.mxu0 %v5356_v52  ;;  %1585 = vmatpush2.bf16.msra.mxu1 %v5266_v11 }
 0x37b   :  { %1545 = vmatprep.subr.bf16.mxu0 %v5267_v13  ;;  %1586 = vmatprep.subr.bf16.mxu1 %v5268_v41 }
 0x37e   :  { %1546 = vmatpush2.bf16.msra.mxu0 %v5357_v22  ;;  %1587 = vmatpush2.bf16.msra.mxu1 %v5358_v46 }
 0x37f   :  { %1547 = vmatprep.subr.bf16.mxu0 %v5271_v25  ;;  %1588 = vmatprep.subr.bf16.mxu1 %v5272_v58 }
 0x382   :  { %1548 = vmatpush2.bf16.msra.mxu0 %v5273_v62  ;;  %1589 = vmatpush2.bf16.msra.mxu1 %v5274_v59 }
 0x383   :  { %1549 = vmatprep.subr.bf16.mxu0 %v5275_v42  ;;  %1590 = vmatprep.subr.bf16.mxu1 %v5276_v27 }
 0x386   :  { %1550 = vmatpush2.bf16.msra.mxu0 %v3648_v35  ;;  %1591 = vmatpush2.bf16.msra.mxu1 %v3650_v1 }
 0x387   :  { %1551 = vmatprep.subr.bf16.mxu0 %v3654_v0  ;;  %1592 = vmatprep.subr.bf16.mxu1 %v5277_v60 }
 0x38a   :  { %1552 = vmatpush2.bf16.msra.mxu0 %v5278_v2  ;;  %1593 = vmatpush2.bf16.msra.mxu1 %v3662_v34 }
 0x38b   :  { %1553 = vmatprep.subr.bf16.mxu0 %v3666_v49  ;;  %1594 = vmatprep.subr.bf16.mxu1 %v3668_v17 }
 0x38e   :  { %1554 = vmatpush2.bf16.msra.mxu0 %v3672_v21  ;;  %1595 = vmatpush2.bf16.msra.mxu1 %v3674_v20  ;;  %v5359_v20 = vld [vmem:[#allocation13_spill] sm:$0xff]  ;;  %v5366_v21 = vld [vmem:[#allocation20_spill] sm:$0xff] }
 0x38f   :  { %1555 = vmatprep.subr.bf16.mxu0 %v3678_v51  ;;  %1596 = vmatprep.subr.bf16.mxu1 %v3680_v43  ;;  %v5360_v51 = vld [vmem:[#allocation14_spill] sm:$0xff]  ;;  %v5361_v43 = vld [vmem:[#allocation15_spill] sm:$0xff] }
 0x392   :  { %1556 = vmatpush2.bf16.msra.mxu0 %v3684_v57  ;;  %1597 = vmatpush2.bf16.msra.mxu1 %v3686_v32  ;;  %v5362_v57 = vld [vmem:[#allocation16_spill] sm:$0xff]  ;;  %v5363_v32 = vld [vmem:[#allocation17_spill] sm:$0xff] }
 0x393   :  { %1665 = vmatprep.subr.bf16.mxu0 %v3254_v4  ;;  %1706 = vmatprep.subr.bf16.mxu1 %v3258_v9  ;;  %v5364_v4 = vld [vmem:[#allocation18_spill] sm:$0xff]  ;;  %v5365_v9 = vld [vmem:[#allocation19_spill] sm:$0xff] }
 0x395   :  { %1558 = vmatmul.mubr.bf16.vlgmr.msra.gmra.mxu0 %v3950_v47  ;;  %1599 = vmatmul.mubr.bf16.vlgmr.msra.gmra.mxu1 %v3950_v47  ;;  %v5367_v47 = vld [vmem:[#allocation21_spill] sm:$0xff] }
 0x396   :  { %1666 = vmatpush1.bf16.msra.mxu0 %v3256_v7  ;;  %1707 = vmatpush1.bf16.msra.mxu1 %v3260_v10  ;;  %v5368_v7 = vld [vmem:[#allocation22_spill] sm:$0xff]  ;;  %v5369_v10 = vld [vmem:[#allocation23_spill] sm:$0xff] }
 0x397   :  { %1667 = vmatprep.subr.bf16.mxu0 %v5359_v20  ;;  %1708 = vmatprep.subr.bf16.mxu1 %v5360_v51  ;;  %v5370_v20 = vld [vmem:[#allocation24_spill] sm:$0xff]  ;;  %v5371_v51 = vld [vmem:[#allocation25_spill] sm:$0xff] }
 0x39a   :  { %1668 = vmatpush1.bf16.msra.mxu0 %v5361_v43  ;;  %1709 = vmatpush1.bf16.msra.mxu1 %v5362_v57  ;;  %v5372_v43 = vld [vmem:[#allocation26_spill] sm:$0xff]  ;;  %v5373_v57 = vld [vmem:[#allocation27_spill] sm:$0xff] }
 0x39b   :  { %1669 = vmatprep.subr.bf16.mxu0 %v5363_v32  ;;  %1710 = vmatprep.subr.bf16.mxu1 %v5364_v4  ;;  %v5374_v32 = vld [vmem:[#allocation28_spill] sm:$0xff]  ;;  %v5375_v4 = vld [vmem:[#allocation29_spill] sm:$0xff] }
 0x39e   :  { %1670 = vmatpush1.bf16.msra.mxu0 %v5365_v9  ;;  %1711 = vmatpush1.bf16.msra.mxu1 %v5366_v21  ;;  %v5376_v9 = vld [vmem:[#allocation30_spill] sm:$0xff]  ;;  %v5377_v21 = vld [vmem:[#allocation31_spill] sm:$0xff] }
 0x39f   :  { %1671 = vmatprep.subr.bf16.mxu0 %v5367_v47  ;;  %1712 = vmatprep.subr.bf16.mxu1 %v5368_v7  ;;  %v5378_v47 = vld [vmem:[#allocation32_spill] sm:$0xff]  ;;  %v5379_v7 = vld [vmem:[#allocation33_spill] sm:$0xff] }
 0x3a2   :  { %1672 = vmatpush1.bf16.msra.mxu0 %v5369_v10  ;;  %1713 = vmatpush1.bf16.msra.mxu1 %v5370_v20  ;;  %v5380_v10 = vld [vmem:[#allocation34_spill] sm:$0xff]  ;;  %v5381_v20 = vld [vmem:[#allocation35_spill] sm:$0xff] }
 0x3a3   :  { %1673 = vmatprep.subr.bf16.mxu0 %v5371_v51  ;;  %1714 = vmatprep.subr.bf16.mxu1 %v5372_v43  ;;  %v5382_v51 = vld [vmem:[#allocation36_spill] sm:$0xff]  ;;  %v5383_v43 = vld [vmem:[#allocation37_spill] sm:$0xff] }
 0x3a6   :  { %1674 = vmatpush1.bf16.msra.mxu0 %v5373_v57  ;;  %1715 = vmatpush1.bf16.msra.mxu1 %v5374_v32  ;;  %v5384_v57 = vld [vmem:[#allocation38_spill] sm:$0xff]  ;;  %v5385_v32 = vld [vmem:[#allocation39_spill] sm:$0xff] }
 0x3a7   :  { %1675 = vmatprep.subr.bf16.mxu0 %v5375_v4  ;;  %1716 = vmatprep.subr.bf16.mxu1 %v5376_v9  ;;  %v5386_v4 = vld [vmem:[#allocation40_spill] sm:$0xff]  ;;  %v5387_v9 = vld [vmem:[#allocation41_spill] sm:$0xff] }
 0x3aa   :  { %1676 = vmatpush1.bf16.msra.mxu0 %v5377_v21  ;;  %1717 = vmatpush1.bf16.msra.mxu1 %v5378_v47  ;;  %v5388_v21 = vld [vmem:[#allocation42_spill] sm:$0xff]  ;;  %v5389_v47 = vld [vmem:[#allocation43_spill] sm:$0xff] }
 0x3ab   :  { %1677 = vmatprep.subr.bf16.mxu0 %v5379_v7  ;;  %1718 = vmatprep.subr.bf16.mxu1 %v5380_v10  ;;  %v5390_v7 = vld [vmem:[#allocation44_spill] sm:$0xff]  ;;  %v5391_v10 = vld [vmem:[#allocation45_spill] sm:$0xff] }
 0x3ae   :  { %1678 = vmatpush1.bf16.msra.mxu0 %v5381_v20  ;;  %1719 = vmatpush1.bf16.msra.mxu1 %v5382_v51  ;;  %v5392_v20 = vld [vmem:[#allocation46_spill] sm:$0xff]  ;;  %v5393_v51 = vld [vmem:[#allocation47_spill] sm:$0xff] }
 0x3af   :  { %1679 = vmatprep.subr.bf16.mxu0 %v5383_v43  ;;  %1720 = vmatprep.subr.bf16.mxu1 %v5384_v57  ;;  %v5394_v43 = vld [vmem:[#allocation48_spill] sm:$0xff]  ;;  %v5395_v57 = vld [vmem:[#allocation49_spill] sm:$0xff] }
 0x3b2   :  { %1680 = vmatpush1.bf16.msra.mxu0 %v5385_v32  ;;  %1721 = vmatpush1.bf16.msra.mxu1 %v5386_v4  ;;  %v5396_v32 = vld [vmem:[#allocation50_spill] sm:$0xff]  ;;  %v5397_v4 = vld [vmem:[#allocation51_spill] sm:$0xff] }
 0x3b3   :  { %1681 = vmatprep.subr.bf16.mxu0 %v5387_v9  ;;  %1722 = vmatprep.subr.bf16.mxu1 %v5388_v21  ;;  %v5398_v9 = vld [vmem:[#allocation52_spill] sm:$0xff]  ;;  %v5399_v21 = vld [vmem:[#allocation53_spill] sm:$0xff] }
 0x3b6   :  { %1682 = vmatpush2.bf16.msra.mxu0 %v5389_v47  ;;  %1723 = vmatpush2.bf16.msra.mxu1 %v5390_v7  ;;  %v5400_v47 = vld [vmem:[#allocation54_spill] sm:$0xff]  ;;  %v5401_v7 = vld [vmem:[#allocation55_spill] sm:$0xff] }
 0x3b7   :  { %1683 = vmatprep.subr.bf16.mxu0 %v5391_v10  ;;  %1724 = vmatprep.subr.bf16.mxu1 %v5392_v20  ;;  %v5402_v10 = vld [vmem:[#allocation56_spill] sm:$0xff]  ;;  %v5403_v20 = vld [vmem:[#allocation57_spill] sm:$0xff] }
 0x3ba   :  { %1684 = vmatpush2.bf16.msra.mxu0 %v5393_v51  ;;  %1725 = vmatpush2.bf16.msra.mxu1 %v5394_v43  ;;  %v5404_v51 = vld [vmem:[#allocation58_spill] sm:$0xff]  ;;  %v5405_v43 = vld [vmem:[#allocation59_spill] sm:$0xff] }
 0x3bb   :  { %1685 = vmatprep.subr.bf16.mxu0 %v5395_v57  ;;  %1726 = vmatprep.subr.bf16.mxu1 %v5396_v32  ;;  %v5406_v57 = vld [vmem:[#allocation60_spill] sm:$0xff]  ;;  %v5407_v32 = vld [vmem:[#allocation61_spill] sm:$0xff] }
 0x3be   :  { %1686 = vmatpush2.bf16.msra.mxu0 %v5397_v4  ;;  %1727 = vmatpush2.bf16.msra.mxu1 %v5398_v9  ;;  %v5408_v4 = vld [vmem:[#allocation62_spill] sm:$0xff]  ;;  %v5409_v9 = vld [vmem:[#allocation63_spill] sm:$0xff] }
 0x3bf   :  { %1687 = vmatprep.subr.bf16.mxu0 %v5399_v21  ;;  %1728 = vmatprep.subr.bf16.mxu1 %v5400_v47  ;;  %v5410_v21 = vld [vmem:[#allocation64_spill] sm:$0xff]  ;;  %v5411_v47 = vld [vmem:[#allocation65_spill] sm:$0xff] }
 0x3c2   :  { %1688 = vmatpush2.bf16.msra.mxu0 %v5401_v7  ;;  %1729 = vmatpush2.bf16.msra.mxu1 %v5402_v10  ;;  %v5412_v7 = vld [vmem:[#allocation66_spill] sm:$0xff]  ;;  %v5413_v10 = vld [vmem:[#allocation68_spill] sm:$0xff] }
 0x3c3   :  { %1689 = vmatprep.subr.bf16.mxu0 %v5403_v20  ;;  %1730 = vmatprep.subr.bf16.mxu1 %v5404_v51  ;;  %v5414_v20 = vld [vmem:[#allocation69_spill] sm:$0xff]  ;;  %v5415_v51 = vld [vmem:[#allocation70_spill] sm:$0xff] }
 0x3c6   :  { %1690 = vmatpush2.bf16.msra.mxu0 %v5405_v43  ;;  %1731 = vmatpush2.bf16.msra.mxu1 %v5406_v57  ;;  %v5416_v43 = vld [vmem:[#allocation71_spill] sm:$0xff]  ;;  %v5417_v57 = vld [vmem:[#allocation72_spill] sm:$0xff] }
 0x3c7   :  { %1691 = vmatprep.subr.bf16.mxu0 %v5407_v32  ;;  %1732 = vmatprep.subr.bf16.mxu1 %v5408_v4  ;;  %v5418_v32 = vld [vmem:[#allocation73_spill] sm:$0xff]  ;;  %v5419_v4 = vld [vmem:[#allocation74_spill] sm:$0xff] }
 0x3ca   :  { %1692 = vmatpush2.bf16.msra.mxu0 %v5409_v9  ;;  %1733 = vmatpush2.bf16.msra.mxu1 %v5410_v21  ;;  %v5420_v9 = vld [vmem:[#allocation75_spill] sm:$0xff]  ;;  %v144_v21 = vpop.permute.xlu1 %143 }
 0x3cb   :  { %1693 = vmatprep.subr.bf16.mxu0 %v5411_v47  ;;  %1734 = vmatprep.subr.bf16.mxu1 %v5412_v7  ;;  %v5421_v47 = vld [vmem:[#allocation79_spill] sm:$0xff]  ;;  %v5422_v7 = vld [vmem:[#allocation80_spill] sm:$0xff] }
 0x3cc   :  { %v146_v17 = vmul.f32 %v144_v21, %v5421_v47  ;;  %v147_v49 = vmul.f32 %v144_v21, %v5422_v7  ;;  %v148_v7 = vmul.f32 %v144_v21, %v5323_v53 }
 0x3ce   :  { %1694 = vmatpush2.bf16.msra.mxu0 %v5413_v10  ;;  %1735 = vmatpush2.bf16.msra.mxu1 %v5414_v20  ;;  %v5423_v10 = vld [vmem:[#allocation81_spill] sm:$0xff]  ;;  %v5424_v20 = vld [vmem:[#allocation82_spill] sm:$0xff] }
 0x3cf   :  { %1695 = vmatprep.subr.bf16.mxu0 %v5415_v51  ;;  %1736 = vmatprep.subr.bf16.mxu1 %v5416_v43  ;;  %v150_v34 = vadd.f32 %v146_v17, %v5423_v10  ;;  %v151_v2 = vadd.f32 %v147_v49, %v5424_v20  ;;  %v152_v17 = vadd.f32 %v148_v7, %v5324_v15 }
 0x3d2   :  { %1696 = vmatpush2.bf16.msra.mxu0 %v5417_v57  ;;  %1737 = vmatpush2.bf16.msra.mxu1 %v5418_v32 }
 0x3d3   :  { %1747 = vmatprep.subr.bf16.mxu0 %v5419_v4  ;;  %1788 = vmatprep.subr.bf16.mxu1 %v5420_v9 }
 0x415   :  { %v1477_v51 = vpop.f32.mrf.mxu0  ;;  %v1518_v60 = vpop.f32.mrf.mxu1 }
 0x416   :  { %v1636_v43 = vadd.f32 %v1477_v51, %v150_v34  ;;  %v1638_v10 = vadd.f32 %v1518_v60, %v152_v17  ;;  %v5425_v60 = vld [vmem:[#allocation89_spill] sm:$0xff] }
 0x417   :  { %v1479_v0 = vpop.f32.mrf.mxu0  ;;  %v1520_v57 = vpop.f32.mrf.mxu1 }
 0x418   :  { %v2831_v1 = vmul.f32 -1.442695, %v1636_v43  ;;  %v1637_v32 = vadd.f32 %v1479_v0, %v151_v2 }
 0x419   :  { %v1481_v35 = vpop.f32.mrf.mxu0  ;;  %v1522_v4 = vpop.f32.mrf.mxu1 }
 0x41a   :  { %2963 = vpow2.f32 %v2831_v1  ;;  %v2832_v9 = vmul.f32 -1.442695, %v1637_v32 }
 0x41b   :  { %v1482_v27 = vpop.f32.mrf.mxu0  ;;  %v1523_v42 = vpop.f32.mrf.mxu1 }
 0x41c   :  { %2965 = vpow2.f32 %v2832_v9  ;;  %v3215_v9 = vmov 4   ;;  %v149_v42 = vmul.f32 %v144_v21, %v5224_v12 }
 0x41d   :  { %2967 = vtanh.f32 %v1638_v10  ;;  %2878 = vset.pattern.permute.xlu1 %v3215_v9 }
 0x41e   :  { %155 = vperm.xlu1 %2878, %v5325_v39  }
 0x427   :  { %v2964_v49 = vpop.eup %2963 }
 0x428   :  { %v1643_v20 = vadd.f32 1.0, %v2964_v49 }
 0x429   :  { %v2966_v47 = vpop.eup %2965 }
 0x42a   :  { %2969 = vrcp.f32 %v1643_v20  ;;  %v1649_v34 = vadd.f32 1.0, %v2966_v47  ;;  %v2968_v0 = vpop.eup %2967 }
 0x42c   :  { %2971 = vrcp.f32 %v1649_v34 }
 0x437   :  { %v2970_v35 = vpop.eup %2969 }
 0x438   :  { %v1660_v4 = vmul.f32 %v2970_v35, %v2968_v0  ;;  %v153_v35 = vadd.f32 %v149_v42, %v5225_v63 }
 0x439   :  { %v2972_v1 = vpop.eup %2971 }
 0x43a   :  { %v1659_v32 = vmul.f32 %v2972_v1, %v3936_v16  ;;  %v1639_v39 = vadd.f32 %v1520_v57, %v153_v35 }
 0x43c   :  { %v4091_v51 = vadd.f32 %v1660_v4, %v1659_v32  ;;  %v2833_v1 = vmul.f32 -1.442695, %v1639_v39 }
 0x455   :  { %v1559_v7 = vpop.f32.mrf.mxu0  ;;  %v1600_v43 = vpop.f32.mrf.mxu1 }
 0x456   :  { %v1607_v2 = vadd.f32 %v1559_v7, %v5425_v60  ;;  %v1609_v21 = vadd.f32 %v1600_v43, %v3788_v5 }
 0x457   :  { %v1561_v10 = vpop.f32.mrf.mxu0  ;;  %v1602_v20 = vpop.f32.mrf.mxu1 }
 0x458   :  { %v2828_v27 = vmul.f32 -1.442695, %v1607_v2  ;;  %v1608_v47 = vadd.f32 %v1561_v10, %v3777_v56  ;;  %v1610_v4 = vadd.f32 %v1602_v20, %v3784_v61 }
 0x459   :  { %v1563_v17 = vpop.f32.mrf.mxu0  ;;  %v1604_v49 = vpop.f32.mrf.mxu1 }
 0x45a   :  { %2973 = vpow2.f32 %v2828_v27  ;;  %v2829_v16 = vmul.f32 -1.442695, %v1608_v47  ;;  %v2830_v32 = vmul.f32 -1.442695, %v1610_v4 }
 0x45b   :  { %v1564_v34 = vpop.f32.mrf.mxu0  ;;  %v1605_v0 = vpop.f32.mrf.mxu1 }
 0x45c   :  { %2975 = vpow2.f32 %v2829_v16 }
 0x45d   :  { %2977 = vpow2.f32 %v2833_v1 }
 0x45e   :  { %2979 = vpow2.f32 %v2830_v32 }
 0x467   :  { %v2974_v9 = vpop.eup %2973 }
 0x468   :  { %v1614_v7 = vadd.f32 1.0, %v2974_v9 }
 0x469   :  { %v2976_v2 = vpop.eup %2975 }
 0x46a   :  { %2981 = vrcp.f32 %v1614_v7  ;;  %v1620_v10 = vadd.f32 1.0, %v2976_v2  ;;  %v2978_v27 = vpop.eup %2977  ;;  %v5427_v7 = vld [vmem:[#allocation104_spill] sm:$0xff]  ;;  %v5428_v2 = vld [vmem:[#allocation105_spill] sm:$0xff] }
 0x46b   :  { %2983 = vtanh.f32 %v1609_v21  ;;  %v2980_v47 = vpop.eup %2979  ;;  %v1656_v57 = vadd.f32 1.0, %v2978_v27  ;;  %v5430_v27 = vld [vmem:[#allocation107_spill] sm:$0xff] }
 0x46c   :  { %2985 = vrcp.f32 %v1620_v10  ;;  %v1627_v20 = vadd.f32 1.0, %v2980_v47  ;;  %v5429_v10 = vld [vmem:[#allocation106_spill] sm:$0xff]  ;;  %v5431_v47 = vld [vmem:[#allocation108_spill] sm:$0xff] }
 0x46d   :  { %2987 = vtanh.f32 %v4091_v51 }
 0x46e   :  { %2989 = vrcp.f32 %v1656_v57  ;;  %v5434_v57 = vld [vmem:[#allocation111_spill] sm:$0xff] }
 0x46f   :  { %2991 = vrcp.f32 %v1627_v20  ;;  %v5436_v20 = vld [vmem:[#allocation113_spill] sm:$0xff] }
 0x477   :  { %v2982_v42 = vpop.eup %2981 }
 0x478   :  { %v2984_v17 = vpop.eup %2983 }
 0x479   :  { %v2986_v49 = vpop.eup %2985  ;;  %v1631_v16 = vmul.f32 %v2984_v17, %v2982_v42  ;;  %v5432_v42 = vld [vmem:[#allocation109_spill] sm:$0xff]  ;;  %v5433_v17 = vld [vmem:[#allocation110_spill] sm:$0xff] }
 0x47a   :  { %v1630_v34 = vmul.f32 %v2986_v49, %v3947_v45  ;;  %v2988_v0 = vpop.eup %2987  ;;  %v5426_v45 = vld [vmem:[#allocation103_spill] sm:$0xff]  ;;  %v5435_v49 = vld [vmem:[#allocation112_spill] sm:$0xff] }
 0x47b   :  { %v2990_v35 = vpop.eup %2989 }
 0x47c   :  { %v4102_v43 = vadd.f32 %v1631_v16, %v1630_v34  ;;  %v2992_v39 = vpop.eup %2991  ;;  %v1663_v1 = vmul.f32 %v2990_v35, %v2988_v0  ;;  %v5437_v16 = vld [vmem:[#allocation117_spill] sm:$0xff]  ;;  %v5438_v34 = vld [vmem:[#allocation118_spill] sm:$0xff]  ;;  %v5440_v35 = vld [vmem:[#allocation135_spill] sm:$0xff] }
 0x47d   :  { %v5439_v0 = vld [vmem:[#allocation134_spill] sm:$0xff] }
 0x47e   :  { %2993 = vtanh.f32 %v4102_v43  ;;  %v4105_v21 = vpack.c.bf16 %v1663_v1, %v1663_v1  ;;  %v5443_v1 = vld [vmem:[#allocation138_spill] sm:$0xff] }
 0x48b   :  { %v2994_v4 = vpop.eup %2993 }
 0x48c   :  { %v1634_v32 = vmul.f32 %v2994_v4, %v2992_v39  ;;  %v5441_v39 = vld [vmem:[#allocation136_spill] sm:$0xff]  ;;  %v5442_v4 = vld [vmem:[#allocation137_spill] sm:$0xff] }
 0x48e   :  { %v1635_v9 = vpack.c.bf16 %v1634_v32, %v1634_v32  ;;  %v5444_v32 = vld [vmem:[#allocation139_spill] sm:$0xff] }
 0x490   :  { %1697 = vmatprep.mubr.bf16.mxu0 %v1635_v9  ;;  %1738 = vmatprep.mubr.bf16.mxu1 %v1635_v9 }
 0x491   :  { %1698 = vmatmul.mubr.bf16.vlgmr.msra.gmra.mxu0 %v4105_v21  ;;  %1739 = vmatmul.mubr.bf16.vlgmr.msra.gmra.mxu1 %v4105_v21 }
 0x492   :  { %1748 = vmatpush1.bf16.msra.mxu0 %v3424_v33  ;;  %1789 = vmatpush1.bf16.msra.mxu1 %v5230_v26 }
 0x493   :  { %1779 = vmatprep.mubr.bf16.mxu0 %v1635_v9  ;;  %1820 = vmatprep.mubr.bf16.mxu1 %v1635_v9  ;;  %v5445_v9 = vld [vmem:[#allocation140_spill] sm:$0xff] }
 0x494   :  { %1749 = vmatprep.subr.bf16.mxu0 %v5231_v3  ;;  %1790 = vmatprep.subr.bf16.mxu1 %v5232_v50 }
 0x496   :  { %1750 = vmatpush1.bf16.msra.mxu0 %v5233_v40  ;;  %1791 = vmatpush1.bf16.msra.mxu1 %v5234_v24 }
 0x497   :  { %1751 = vmatprep.subr.bf16.mxu0 %v5235_v48  ;;  %1792 = vmatprep.subr.bf16.mxu1 %v5327_v6 }
 0x49a   :  { %1752 = vmatpush1.bf16.msra.mxu0 %v5328_v54  ;;  %1793 = vmatpush1.bf16.msra.mxu1 %v5329_v18 }
 0x49b   :  { %1753 = vmatprep.subr.bf16.mxu0 %v5330_v37  ;;  %1794 = vmatprep.subr.bf16.mxu1 %v5331_v36 }
 0x49e   :  { %1754 = vmatpush1.bf16.msra.mxu0 %v5332_v14  ;;  %1795 = vmatpush1.bf16.msra.mxu1 %v5333_v31 }
 0x49f   :  { %1755 = vmatprep.subr.bf16.mxu0 %v5334_v44  ;;  %1796 = vmatprep.subr.bf16.mxu1 %v5426_v45 }
 0x4a2   :  { %1756 = vmatpush1.bf16.msra.mxu0 %v5427_v7  ;;  %1797 = vmatpush1.bf16.msra.mxu1 %v5428_v2 }
 0x4a3   :  { %1757 = vmatprep.subr.bf16.mxu0 %v5429_v10  ;;  %1798 = vmatprep.subr.bf16.mxu1 %v5430_v27 }
 0x4a6   :  { %1758 = vmatpush1.bf16.msra.mxu0 %v5431_v47  ;;  %1799 = vmatpush1.bf16.msra.mxu1 %v5432_v42 }
 0x4a7   :  { %1759 = vmatprep.subr.bf16.mxu0 %v5433_v17  ;;  %1800 = vmatprep.subr.bf16.mxu1 %v5434_v57 }
 0x4aa   :  { %1760 = vmatpush1.bf16.msra.mxu0 %v5435_v49  ;;  %1801 = vmatpush1.bf16.msra.mxu1 %v5436_v20 }
 0x4ab   :  { %1761 = vmatprep.subr.bf16.mxu0 %v5346_v8  ;;  %1802 = vmatprep.subr.bf16.mxu1 %v5347_v55 }
 0x4ae   :  { %1762 = vmatpush1.bf16.msra.mxu0 %v5348_v28  ;;  %1803 = vmatpush1.bf16.msra.mxu1 %v5437_v16 }
 0x4af   :  { %1763 = vmatprep.subr.bf16.mxu0 %v5438_v34  ;;  %1804 = vmatprep.subr.bf16.mxu1 %v5351_v30 }
 0x4b2   :  { %1764 = vmatpush2.bf16.msra.mxu0 %v5352_v23  ;;  %1805 = vmatpush2.bf16.msra.mxu1 %v5353_v19 }
 0x4b3   :  { %1765 = vmatprep.subr.bf16.mxu0 %v5354_v38  ;;  %1806 = vmatprep.subr.bf16.mxu1 %v5355_v29 }
 0x4b6   :  { %1766 = vmatpush2.bf16.msra.mxu0 %v5356_v52  ;;  %1807 = vmatpush2.bf16.msra.mxu1 %v5266_v11 }
 0x4b7   :  { %1767 = vmatprep.subr.bf16.mxu0 %v5267_v13  ;;  %1808 = vmatprep.subr.bf16.mxu1 %v5268_v41 }
 0x4ba   :  { %1768 = vmatpush2.bf16.msra.mxu0 %v5357_v22  ;;  %1809 = vmatpush2.bf16.msra.mxu1 %v5358_v46 }
 0x4bb   :  { %1769 = vmatprep.subr.bf16.mxu0 %v5271_v25  ;;  %1810 = vmatprep.subr.bf16.mxu1 %v5272_v58  ;;  %v5446_v25 = vld [vmem:[#allocation141_spill] sm:$0xff]  ;;  %v5447_v58 = vld [vmem:[#allocation142_spill] sm:$0xff] }
 0x4be   :  { %1770 = vmatpush2.bf16.msra.mxu0 %v5273_v62  ;;  %1811 = vmatpush2.bf16.msra.mxu1 %v5274_v59  ;;  %v5448_v62 = vld [vmem:[#allocation143_spill] sm:$0xff]  ;;  %v5449_v59 = vld [vmem:[#allocation144_spill] sm:$0xff] }
 0x4bf   :  { %1771 = vmatprep.subr.bf16.mxu0 %v5439_v0  ;;  %1812 = vmatprep.subr.bf16.mxu1 %v5440_v35  ;;  %v5450_v0 = vld [vmem:[#allocation145_spill] sm:$0xff]  ;;  %v5451_v35 = vld [vmem:[#allocation146_spill] sm:$0xff] }
 0x4c2   :  { %1772 = vmatpush2.bf16.msra.mxu0 %v5441_v39  ;;  %1813 = vmatpush2.bf16.msra.mxu1 %v5442_v4  ;;  %v5452_v39 = vld [vmem:[#allocation147_spill] sm:$0xff]  ;;  %v5453_v4 = vld [vmem:[#allocation148_spill] sm:$0xff] }
 0x4c3   :  { %1773 = vmatprep.subr.bf16.mxu0 %v5443_v1  ;;  %1814 = vmatprep.subr.bf16.mxu1 %v5444_v32  ;;  %v5454_v1 = vld [vmem:[#allocation149_spill] sm:$0xff] }
 0x4c4   :  { %v5455_v32 = vld [vmem:[#allocation9_spill] sm:$0xff] }
 0x4c6   :  { %1774 = vmatpush2.bf16.msra.mxu0 %v5445_v9  ;;  %1815 = vmatpush2.bf16.msra.mxu1 %v5446_v25  ;;  %v5456_v9 = vld [vmem:[#allocation11_spill] sm:$0xff] }
 0x4c7   :  { %1775 = vmatprep.subr.bf16.mxu0 %v5447_v58  ;;  %1816 = vmatprep.subr.bf16.mxu1 %v5448_v62  ;;  %v5457_v62 = vld [vmem:[#allocation10_spill] sm:$0xff]  ;;  %v5466_v58 = vld [vmem:[#allocation20_spill] sm:$0xff] }
 0x4ca   :  { %1776 = vmatpush2.bf16.msra.mxu0 %v5449_v59  ;;  %1817 = vmatpush2.bf16.msra.mxu1 %v5450_v0  ;;  %v5458_v59 = vld [vmem:[#allocation12_spill] sm:$0xff]  ;;  %v5459_v0 = vld [vmem:[#allocation13_spill] sm:$0xff] }
 0x4cb   :  { %1777 = vmatprep.subr.bf16.mxu0 %v5451_v35  ;;  %1818 = vmatprep.subr.bf16.mxu1 %v5452_v39  ;;  %v5460_v35 = vld [vmem:[#allocation14_spill] sm:$0xff]  ;;  %v5461_v39 = vld [vmem:[#allocation15_spill] sm:$0xff] }
 0x4ce   :  { %1778 = vmatpush2.bf16.msra.mxu0 %v5453_v4  ;;  %1819 = vmatpush2.bf16.msra.mxu1 %v5454_v1  ;;  %v5462_v4 = vld [vmem:[#allocation16_spill] sm:$0xff]  ;;  %v5463_v1 = vld [vmem:[#allocation17_spill] sm:$0xff] }
 0x4cf   :  { %1887 = vmatprep.subr.bf16.mxu0 %v5455_v32  ;;  %1928 = vmatprep.subr.bf16.mxu1 %v5456_v9  ;;  %v5464_v32 = vld [vmem:[#allocation18_spill] sm:$0xff]  ;;  %v5465_v9 = vld [vmem:[#allocation19_spill] sm:$0xff] }
 0x4d1   :  { %1780 = vmatmul.mubr.bf16.vlgmr.msra.gmra.mxu0 %v4105_v21  ;;  %1821 = vmatmul.mubr.bf16.vlgmr.msra.gmra.mxu1 %v4105_v21  ;;  %v5467_v21 = vld [vmem:[#allocation21_spill] sm:$0xff] }
 0x4d2   :  { %1888 = vmatpush1.bf16.msra.mxu0 %v5457_v62  ;;  %1929 = vmatpush1.bf16.msra.mxu1 %v5458_v59  ;;  %v5468_v62 = vld [vmem:[#allocation22_spill] sm:$0xff]  ;;  %v5469_v59 = vld [vmem:[#allocation23_spill] sm:$0xff] }
 0x4d3   :  { %1889 = vmatprep.subr.bf16.mxu0 %v5459_v0  ;;  %1930 = vmatprep.subr.bf16.mxu1 %v5460_v35  ;;  %v5470_v0 = vld [vmem:[#allocation24_spill] sm:$0xff]  ;;  %v5471_v35 = vld [vmem:[#allocation25_spill] sm:$0xff] }
 0x4d6   :  { %1890 = vmatpush1.bf16.msra.mxu0 %v5461_v39  ;;  %1931 = vmatpush1.bf16.msra.mxu1 %v5462_v4  ;;  %v5472_v39 = vld [vmem:[#allocation26_spill] sm:$0xff]  ;;  %v5473_v4 = vld [vmem:[#allocation27_spill] sm:$0xff] }
 0x4d7   :  { %1891 = vmatprep.subr.bf16.mxu0 %v5463_v1  ;;  %1932 = vmatprep.subr.bf16.mxu1 %v5464_v32  ;;  %v5474_v1 = vld [vmem:[#allocation28_spill] sm:$0xff]  ;;  %v5475_v32 = vld [vmem:[#allocation29_spill] sm:$0xff] }
 0x4da   :  { %1892 = vmatpush1.bf16.msra.mxu0 %v5465_v9  ;;  %1933 = vmatpush1.bf16.msra.mxu1 %v5466_v58  ;;  %v5476_v9 = vld [vmem:[#allocation30_spill] sm:$0xff]  ;;  %v5477_v58 = vld [vmem:[#allocation31_spill] sm:$0xff] }
 0x4db   :  { %1893 = vmatprep.subr.bf16.mxu0 %v5467_v21  ;;  %1934 = vmatprep.subr.bf16.mxu1 %v5468_v62  ;;  %v5478_v21 = vld [vmem:[#allocation32_spill] sm:$0xff]  ;;  %v5479_v62 = vld [vmem:[#allocation33_spill] sm:$0xff] }
 0x4de   :  { %1894 = vmatpush1.bf16.msra.mxu0 %v5469_v59  ;;  %1935 = vmatpush1.bf16.msra.mxu1 %v5470_v0  ;;  %v5480_v59 = vld [vmem:[#allocation34_spill] sm:$0xff]  ;;  %v5481_v0 = vld [vmem:[#allocation35_spill] sm:$0xff] }
 0x4df   :  { %1895 = vmatprep.subr.bf16.mxu0 %v5471_v35  ;;  %1936 = vmatprep.subr.bf16.mxu1 %v5472_v39  ;;  %v5482_v35 = vld [vmem:[#allocation36_spill] sm:$0xff]  ;;  %v5483_v39 = vld [vmem:[#allocation37_spill] sm:$0xff] }
 0x4e2   :  { %1896 = vmatpush1.bf16.msra.mxu0 %v5473_v4  ;;  %1937 = vmatpush1.bf16.msra.mxu1 %v5474_v1  ;;  %v5484_v4 = vld [vmem:[#allocation38_spill] sm:$0xff]  ;;  %v5485_v1 = vld [vmem:[#allocation39_spill] sm:$0xff] }
 0x4e3   :  { %1897 = vmatprep.subr.bf16.mxu0 %v5475_v32  ;;  %1938 = vmatprep.subr.bf16.mxu1 %v5476_v9  ;;  %v5486_v32 = vld [vmem:[#allocation40_spill] sm:$0xff]  ;;  %v5487_v9 = vld [vmem:[#allocation41_spill] sm:$0xff] }
 0x4e6   :  { %1898 = vmatpush1.bf16.msra.mxu0 %v5477_v58  ;;  %1939 = vmatpush1.bf16.msra.mxu1 %v5478_v21  ;;  %v5488_v58 = vld [vmem:[#allocation42_spill] sm:$0xff]  ;;  %v5489_v21 = vld [vmem:[#allocation43_spill] sm:$0xff] }
 0x4e7   :  { %1899 = vmatprep.subr.bf16.mxu0 %v5479_v62  ;;  %1940 = vmatprep.subr.bf16.mxu1 %v5480_v59  ;;  %v5490_v62 = vld [vmem:[#allocation44_spill] sm:$0xff]  ;;  %v5491_v59 = vld [vmem:[#allocation45_spill] sm:$0xff] }
 0x4ea   :  { %1900 = vmatpush1.bf16.msra.mxu0 %v5481_v0  ;;  %1941 = vmatpush1.bf16.msra.mxu1 %v5482_v35  ;;  %v5492_v0 = vld [vmem:[#allocation46_spill] sm:$0xff]  ;;  %v5493_v35 = vld [vmem:[#allocation47_spill] sm:$0xff] }
 0x4eb   :  { %1901 = vmatprep.subr.bf16.mxu0 %v5483_v39  ;;  %1942 = vmatprep.subr.bf16.mxu1 %v5484_v4  ;;  %v5494_v39 = vld [vmem:[#allocation48_spill] sm:$0xff]  ;;  %v5495_v4 = vld [vmem:[#allocation49_spill] sm:$0xff] }
 0x4ee   :  { %1902 = vmatpush1.bf16.msra.mxu0 %v5485_v1  ;;  %1943 = vmatpush1.bf16.msra.mxu1 %v5486_v32  ;;  %v5496_v1 = vld [vmem:[#allocation50_spill] sm:$0xff]  ;;  %v5497_v32 = vld [vmem:[#allocation51_spill] sm:$0xff] }
 0x4ef   :  { %1903 = vmatprep.subr.bf16.mxu0 %v5487_v9  ;;  %1944 = vmatprep.subr.bf16.mxu1 %v5488_v58  ;;  %v5498_v9 = vld [vmem:[#allocation52_spill] sm:$0xff]  ;;  %v5499_v58 = vld [vmem:[#allocation53_spill] sm:$0xff] }
 0x4f2   :  { %1904 = vmatpush2.bf16.msra.mxu0 %v5489_v21  ;;  %1945 = vmatpush2.bf16.msra.mxu1 %v5490_v62  ;;  %v5500_v21 = vld [vmem:[#allocation54_spill] sm:$0xff]  ;;  %v5501_v62 = vld [vmem:[#allocation55_spill] sm:$0xff] }
 0x4f3   :  { %1905 = vmatprep.subr.bf16.mxu0 %v5491_v59  ;;  %1946 = vmatprep.subr.bf16.mxu1 %v5492_v0  ;;  %v5502_v59 = vld [vmem:[#allocation56_spill] sm:$0xff]  ;;  %v5503_v0 = vld [vmem:[#allocation57_spill] sm:$0xff] }
 0x4f6   :  { %1906 = vmatpush2.bf16.msra.mxu0 %v5493_v35  ;;  %1947 = vmatpush2.bf16.msra.mxu1 %v5494_v39  ;;  %v5504_v35 = vld [vmem:[#allocation58_spill] sm:$0xff]  ;;  %v5505_v39 = vld [vmem:[#allocation59_spill] sm:$0xff] }
 0x4f7   :  { %1907 = vmatprep.subr.bf16.mxu0 %v5495_v4  ;;  %1948 = vmatprep.subr.bf16.mxu1 %v5496_v1  ;;  %v5506_v4 = vld [vmem:[#allocation60_spill] sm:$0xff]  ;;  %v5507_v1 = vld [vmem:[#allocation61_spill] sm:$0xff] }
 0x4fa   :  { %1908 = vmatpush2.bf16.msra.mxu0 %v5497_v32  ;;  %1949 = vmatpush2.bf16.msra.mxu1 %v5498_v9  ;;  %v5508_v32 = vld [vmem:[#allocation62_spill] sm:$0xff]  ;;  %v5509_v9 = vld [vmem:[#allocation63_spill] sm:$0xff] }
 0x4fb   :  { %1909 = vmatprep.subr.bf16.mxu0 %v5499_v58  ;;  %1950 = vmatprep.subr.bf16.mxu1 %v5500_v21  ;;  %v5510_v58 = vld [vmem:[#allocation64_spill] sm:$0xff]  ;;  %v5511_v21 = vld [vmem:[#allocation65_spill] sm:$0xff] }
 0x4fe   :  { %1910 = vmatpush2.bf16.msra.mxu0 %v5501_v62  ;;  %1951 = vmatpush2.bf16.msra.mxu1 %v5502_v59  ;;  %v5512_v62 = vld [vmem:[#allocation66_spill] sm:$0xff]  ;;  %v5513_v59 = vld [vmem:[#allocation68_spill] sm:$0xff] }
 0x4ff   :  { %1911 = vmatprep.subr.bf16.mxu0 %v5503_v0  ;;  %1952 = vmatprep.subr.bf16.mxu1 %v5504_v35  ;;  %v5514_v0 = vld [vmem:[#allocation69_spill] sm:$0xff]  ;;  %v5515_v35 = vld [vmem:[#allocation70_spill] sm:$0xff] }
 0x502   :  { %1912 = vmatpush2.bf16.msra.mxu0 %v5505_v39  ;;  %1953 = vmatpush2.bf16.msra.mxu1 %v5506_v4  ;;  %v5516_v39 = vld [vmem:[#allocation71_spill] sm:$0xff]  ;;  %v5517_v4 = vld [vmem:[#allocation72_spill] sm:$0xff] }
 0x503   :  { %1913 = vmatprep.subr.bf16.mxu0 %v5507_v1  ;;  %1954 = vmatprep.subr.bf16.mxu1 %v5508_v32  ;;  %v5518_v1 = vld [vmem:[#allocation73_spill] sm:$0xff]  ;;  %v5519_v32 = vld [vmem:[#allocation74_spill] sm:$0xff] }
 0x506   :  { %1914 = vmatpush2.bf16.msra.mxu0 %v5509_v9  ;;  %1955 = vmatpush2.bf16.msra.mxu1 %v5510_v58  ;;  %v5520_v9 = vld [vmem:[#allocation75_spill] sm:$0xff]  ;;  %v156_v58 = vpop.permute.xlu1 %155 }
 0x507   :  { %1915 = vmatprep.subr.bf16.mxu0 %v5511_v21  ;;  %1956 = vmatprep.subr.bf16.mxu1 %v5512_v62  ;;  %v5521_v21 = vld [vmem:[#allocation79_spill] sm:$0xff]  ;;  %v5522_v62 = vld [vmem:[#allocation80_spill] sm:$0xff] }
 0x508   :  { %v158_v25 = vmul.f32 %v156_v58, %v5521_v21  ;;  %v159_v46 = vmul.f32 %v156_v58, %v5522_v62  ;;  %v160_v62 = vmul.f32 %v156_v58, %v5323_v53 }
 0x50a   :  { %1916 = vmatpush2.bf16.msra.mxu0 %v5513_v59  ;;  %1957 = vmatpush2.bf16.msra.mxu1 %v5514_v0  ;;  %v5523_v59 = vld [vmem:[#allocation81_spill] sm:$0xff]  ;;  %v5524_v0 = vld [vmem:[#allocation82_spill] sm:$0xff] }
 0x50b   :  { %1917 = vmatprep.subr.bf16.mxu0 %v5515_v35  ;;  %1958 = vmatprep.subr.bf16.mxu1 %v5516_v39  ;;  %v162_v22 = vadd.f32 %v158_v25, %v5523_v59  ;;  %v163_v41 = vadd.f32 %v159_v46, %v5524_v0  ;;  %v164_v25 = vadd.f32 %v160_v62, %v5324_v15 }
 0x50e   :  { %1918 = vmatpush2.bf16.msra.mxu0 %v5517_v4  ;;  %1959 = vmatpush2.bf16.msra.mxu1 %v5518_v1 }
 0x50f   :  { %1969 = vmatprep.subr.bf16.mxu0 %v5519_v32  ;;  %2010 = vmatprep.subr.bf16.mxu1 %v5520_v9 }
 0x551   :  { %v1699_v35 = vpop.f32.mrf.mxu0  ;;  %v1740_v13 = vpop.f32.mrf.mxu1 }
 0x552   :  { %v1858_v39 = vadd.f32 %v1699_v35, %v162_v22  ;;  %v1860_v59 = vadd.f32 %v1740_v13, %v164_v25  ;;  %v3216_v35 = vmov 5  }
 0x553   :  { %v1701_v11 = vpop.f32.mrf.mxu0  ;;  %v1742_v4 = vpop.f32.mrf.mxu1  ;;  %2879 = vset.pattern.permute.xlu0 %v3216_v35 }
 0x554   :  { %v2837_v52 = vmul.f32 -1.442695, %v1858_v39  ;;  %v1859_v1 = vadd.f32 %v1701_v11, %v163_v41  ;;  %v4248_v39 = vld [vmem:[#allocation2] sm:$0x3] }
 0x555   :  { %v1703_v29 = vpop.f32.mrf.mxu0  ;;  %v1744_v32 = vpop.f32.mrf.mxu1  ;;  %167 = vperm.xlu0 %2879, %v4248_v39  }
 0x556   :  { %2995 = vpow2.f32 %v2837_v52  ;;  %v2838_v9 = vmul.f32 -1.442695, %v1859_v1  ;;  %v161_v32 = vmul.f32 %v156_v58, %v5224_v12 }
 0x557   :  { %v1704_v38 = vpop.f32.mrf.mxu0  ;;  %v1745_v19 = vpop.f32.mrf.mxu1 }
 0x558   :  { %2997 = vpow2.f32 %v2838_v9 }
 0x559   :  { %2999 = vtanh.f32 %v1860_v59 }
 0x563   :  { %v2996_v46 = vpop.eup %2995 }
 0x564   :  { %v1865_v0 = vadd.f32 1.0, %v2996_v46 }
 0x565   :  { %v2998_v21 = vpop.eup %2997 }
 0x566   :  { %3001 = vrcp.f32 %v1865_v0  ;;  %v1871_v22 = vadd.f32 1.0, %v2998_v21  ;;  %v3000_v11 = vpop.eup %2999 }
 0x568   :  { %3003 = vrcp.f32 %v1871_v22 }
 0x573   :  { %v3002_v41 = vpop.eup %3001 }
 0x574   :  { %v1882_v29 = vmul.f32 %v3002_v41, %v3000_v11  ;;  %v165_v41 = vadd.f32 %v161_v32, %v5225_v63 }
 0x575   :  { %v3004_v52 = vpop.eup %3003 }
 0x576   :  { %v1881_v38 = vmul.f32 %v3004_v52, %v4091_v51 }
 0x578   :  { %v4246_v19 = vadd.f32 %v1882_v29, %v1881_v38  ;;  %v1861_v29 = vadd.f32 %v1742_v4, %v165_v41 }
 0x57a   :  { %v2839_v38 = vmul.f32 -1.442695, %v1861_v29 }
 0x591   :  { %v1781_v62 = vpop.f32.mrf.mxu0  ;;  %v1822_v13 = vpop.f32.mrf.mxu1 }
 0x592   :  { %v1829_v59 = vadd.f32 %v1781_v62, %v5425_v60  ;;  %v1831_v58 = vadd.f32 %v1822_v13, %v3788_v5 }
 0x593   :  { %v1783_v0 = vpop.f32.mrf.mxu0  ;;  %v1824_v1 = vpop.f32.mrf.mxu1 }
 0x594   :  { %v2834_v9 = vmul.f32 -1.442695, %v1829_v59  ;;  %v1830_v21 = vadd.f32 %v1783_v0, %v3777_v56  ;;  %v1832_v52 = vadd.f32 %v1824_v1, %v3784_v61 }
 0x595   :  { %v1785_v51 = vpop.f32.mrf.mxu0  ;;  %v1826_v25 = vpop.f32.mrf.mxu1 }
 0x596   :  { %3005 = vpow2.f32 %v2834_v9  ;;  %v2835_v46 = vmul.f32 -1.442695, %v1830_v21  ;;  %v2836_v35 = vmul.f32 -1.442695, %v1832_v52 }
 0x597   :  { %v1786_v22 = vpop.f32.mrf.mxu0  ;;  %v1827_v11 = vpop.f32.mrf.mxu1 }
 0x598   :  { %3007 = vpow2.f32 %v2835_v46 }
 0x599   :  { %3009 = vpow2.f32 %v2839_v38 }
 0x59a   :  { %3011 = vpow2.f32 %v2836_v35 }
 0x5a3   :  { %v3006_v62 = vpop.eup %3005 }
 0x5a4   :  { %v1836_v59 = vadd.f32 1.0, %v3006_v62 }
 0x5a5   :  { %v3008_v0 = vpop.eup %3007 }
 0x5a6   :  { %3013 = vrcp.f32 %v1836_v59  ;;  %v1842_v9 = vadd.f32 1.0, %v3008_v0  ;;  %v3010_v21 = vpop.eup %3009  ;;  %v5526_v0 = vld [vmem:[#allocation122_spill] sm:$0xff] }
 0x5a7   :  { %3015 = vtanh.f32 %v1831_v58  ;;  %v3012_v51 = vpop.eup %3011  ;;  %v1878_v4 = vadd.f32 1.0, %v3010_v21  ;;  %v5528_v21 = vld [vmem:[#allocation124_spill] sm:$0xff] }
 0x5a8   :  { %3017 = vrcp.f32 %v1842_v9  ;;  %v1849_v1 = vadd.f32 1.0, %v3012_v51  ;;  %v5527_v9 = vld [vmem:[#allocation123_spill] sm:$0xff]  ;;  %v5529_v51 = vld [vmem:[#allocation125_spill] sm:$0xff] }
 0x5a9   :  { %3019 = vtanh.f32 %v4246_v19 }
 0x5aa   :  { %3021 = vrcp.f32 %v1878_v4  ;;  %v5532_v4 = vld [vmem:[#allocation128_spill] sm:$0xff] }
 0x5ab   :  { %3023 = vrcp.f32 %v1849_v1  ;;  %v5534_v1 = vld [vmem:[#allocation130_spill] sm:$0xff] }
 0x5b3   :  { %v3014_v32 = vpop.eup %3013 }
 0x5b4   :  { %v3016_v25 = vpop.eup %3015 }
 0x5b5   :  { %v3018_v46 = vpop.eup %3017  ;;  %v1853_v22 = vmul.f32 %v3016_v25, %v3014_v32  ;;  %v5530_v32 = vld [vmem:[#allocation126_spill] sm:$0xff]  ;;  %v5531_v25 = vld [vmem:[#allocation127_spill] sm:$0xff] }
 0x5b6   :  { %v1852_v11 = vmul.f32 %v3018_v46, %v4102_v43  ;;  %v3020_v41 = vpop.eup %3019  ;;  %v5525_v43 = vld [vmem:[#allocation121_spill] sm:$0xff] }
 0x5b7   :  { %v3022_v29 = vpop.eup %3021  ;;  %v5533_v46 = vld [vmem:[#allocation129_spill] sm:$0xff] }
 0x5b8   :  { %v4259_v13 = vadd.f32 %v1853_v22, %v1852_v11  ;;  %v3024_v52 = vpop.eup %3023  ;;  %v1885_v35 = vmul.f32 %v3022_v29, %v3020_v41  ;;  %v5535_v22 = vld [vmem:[#allocation131_spill] sm:$0xff]  ;;  %v5536_v11 = vld [vmem:[#allocation132_spill] sm:$0xff]  ;;  %v5537_v41 = vld [vmem:[#allocation133_spill] sm:$0xff] }
 0x5b9   :  { %v5538_v29 = vld [vmem:[#allocation134_spill] sm:$0xff] }
 0x5ba   :  { %3025 = vtanh.f32 %v4259_v13  ;;  %v4262_v59 = vpack.c.bf16 %v1885_v35, %v1885_v35  ;;  %v5541_v35 = vld [vmem:[#allocation137_spill] sm:$0xff] }
 0x5c7   :  { %v3026_v38 = vpop.eup %3025 }
 0x5c8   :  { %v1856_v62 = vmul.f32 %v3026_v38, %v3024_v52  ;;  %v5539_v52 = vld [vmem:[#allocation135_spill] sm:$0xff]  ;;  %v5540_v38 = vld [vmem:[#allocation136_spill] sm:$0xff] }
 0x5ca   :  { %v1857_v58 = vpack.c.bf16 %v1856_v62, %v1856_v62  ;;  %v5542_v62 = vld [vmem:[#allocation138_spill] sm:$0xff] }
 0x5cc   :  { %1919 = vmatprep.mubr.bf16.mxu0 %v1857_v58  ;;  %1960 = vmatprep.mubr.bf16.mxu1 %v1857_v58 }
 0x5cd   :  { %1920 = vmatmul.mubr.bf16.vlgmr.msra.gmra.mxu0 %v4262_v59  ;;  %1961 = vmatmul.mubr.bf16.vlgmr.msra.gmra.mxu1 %v4262_v59 }
 0x5ce   :  { %1970 = vmatpush1.bf16.msra.mxu0 %v3424_v33  ;;  %2011 = vmatpush1.bf16.msra.mxu1 %v5230_v26 }
 0x5cf   :  { %2001 = vmatprep.mubr.bf16.mxu0 %v1857_v58  ;;  %2042 = vmatprep.mubr.bf16.mxu1 %v1857_v58  ;;  %v5543_v58 = vld [vmem:[#allocation139_spill] sm:$0xff] }
 0x5d0   :  { %1971 = vmatprep.subr.bf16.mxu0 %v5231_v3  ;;  %2012 = vmatprep.subr.bf16.mxu1 %v5232_v50 }
 0x5d2   :  { %1972 = vmatpush1.bf16.msra.mxu0 %v5233_v40  ;;  %2013 = vmatpush1.bf16.msra.mxu1 %v5234_v24 }
 0x5d3   :  { %1973 = vmatprep.subr.bf16.mxu0 %v5235_v48  ;;  %2014 = vmatprep.subr.bf16.mxu1 %v5327_v6 }
 0x5d6   :  { %1974 = vmatpush1.bf16.msra.mxu0 %v5328_v54  ;;  %2015 = vmatpush1.bf16.msra.mxu1 %v5329_v18 }
 0x5d7   :  { %1975 = vmatprep.subr.bf16.mxu0 %v5330_v37  ;;  %2016 = vmatprep.subr.bf16.mxu1 %v5331_v36 }
 0x5da   :  { %1976 = vmatpush1.bf16.msra.mxu0 %v5332_v14  ;;  %2017 = vmatpush1.bf16.msra.mxu1 %v5333_v31 }
 0x5db   :  { %1977 = vmatprep.subr.bf16.mxu0 %v5334_v44  ;;  %2018 = vmatprep.subr.bf16.mxu1 %v5426_v45 }
 0x5de   :  { %1978 = vmatpush1.bf16.msra.mxu0 %v5427_v7  ;;  %2019 = vmatpush1.bf16.msra.mxu1 %v5428_v2 }
 0x5df   :  { %1979 = vmatprep.subr.bf16.mxu0 %v5429_v10  ;;  %2020 = vmatprep.subr.bf16.mxu1 %v5430_v27 }
 0x5e2   :  { %1980 = vmatpush1.bf16.msra.mxu0 %v5431_v47  ;;  %2021 = vmatpush1.bf16.msra.mxu1 %v5432_v42 }
 0x5e3   :  { %1981 = vmatprep.subr.bf16.mxu0 %v5433_v17  ;;  %2022 = vmatprep.subr.bf16.mxu1 %v5434_v57 }
 0x5e6   :  { %1982 = vmatpush1.bf16.msra.mxu0 %v5435_v49  ;;  %2023 = vmatpush1.bf16.msra.mxu1 %v5436_v20 }
 0x5e7   :  { %1983 = vmatprep.subr.bf16.mxu0 %v5346_v8  ;;  %2024 = vmatprep.subr.bf16.mxu1 %v5347_v55 }
 0x5ea   :  { %1984 = vmatpush1.bf16.msra.mxu0 %v5348_v28  ;;  %2025 = vmatpush1.bf16.msra.mxu1 %v5437_v16 }
 0x5eb   :  { %1985 = vmatprep.subr.bf16.mxu0 %v5438_v34  ;;  %2026 = vmatprep.subr.bf16.mxu1 %v5351_v30 }
 0x5ee   :  { %1986 = vmatpush2.bf16.msra.mxu0 %v5352_v23  ;;  %2027 = vmatpush2.bf16.msra.mxu1 %v5525_v43 }
 0x5ef   :  { %1987 = vmatprep.subr.bf16.mxu0 %v5526_v0  ;;  %2028 = vmatprep.subr.bf16.mxu1 %v5527_v9 }
 0x5f2   :  { %1988 = vmatpush2.bf16.msra.mxu0 %v5528_v21  ;;  %2029 = vmatpush2.bf16.msra.mxu1 %v5529_v51 }
 0x5f3   :  { %1989 = vmatprep.subr.bf16.mxu0 %v5530_v32  ;;  %2030 = vmatprep.subr.bf16.mxu1 %v5531_v25 }
 0x5f6   :  { %1990 = vmatpush2.bf16.msra.mxu0 %v5532_v4  ;;  %2031 = vmatpush2.bf16.msra.mxu1 %v5533_v46  ;;  %v5544_v46 = vld [vmem:[#allocation140_spill] sm:$0xff] }
 0x5f7   :  { %1991 = vmatprep.subr.bf16.mxu0 %v5534_v1  ;;  %2032 = vmatprep.subr.bf16.mxu1 %v5535_v22  ;;  %v5545_v1 = vld [vmem:[#allocation141_spill] sm:$0xff]  ;;  %v5546_v22 = vld [vmem:[#allocation142_spill] sm:$0xff] }
 0x5fa   :  { %1992 = vmatpush2.bf16.msra.mxu0 %v5536_v11  ;;  %2033 = vmatpush2.bf16.msra.mxu1 %v5537_v41  ;;  %v5547_v11 = vld [vmem:[#allocation143_spill] sm:$0xff]  ;;  %v5548_v41 = vld [vmem:[#allocation144_spill] sm:$0xff] }
 0x5fb   :  { %1993 = vmatprep.subr.bf16.mxu0 %v5538_v29  ;;  %2034 = vmatprep.subr.bf16.mxu1 %v5539_v52  ;;  %v5549_v29 = vld [vmem:[#allocation145_spill] sm:$0xff]  ;;  %v5550_v52 = vld [vmem:[#allocation146_spill] sm:$0xff] }
 0x5fe   :  { %1994 = vmatpush2.bf16.msra.mxu0 %v5540_v38  ;;  %2035 = vmatpush2.bf16.msra.mxu1 %v5541_v35  ;;  %v5551_v38 = vld [vmem:[#allocation147_spill] sm:$0xff]  ;;  %v5552_v35 = vld [vmem:[#allocation148_spill] sm:$0xff] }
 0x5ff   :  { %1995 = vmatprep.subr.bf16.mxu0 %v5542_v62  ;;  %2036 = vmatprep.subr.bf16.mxu1 %v5543_v58  ;;  %v5553_v62 = vld [vmem:[#allocation149_spill] sm:$0xff] }
 0x600   :  { %v5554_v58 = vld [vmem:[#allocation9_spill] sm:$0xff] }
 0x602   :  { %1996 = vmatpush2.bf16.msra.mxu0 %v5544_v46  ;;  %2037 = vmatpush2.bf16.msra.mxu1 %v5545_v1  ;;  %v5555_v46 = vld [vmem:[#allocation11_spill] sm:$0xff] }
 0x603   :  { %1997 = vmatprep.subr.bf16.mxu0 %v5546_v22  ;;  %2038 = vmatprep.subr.bf16.mxu1 %v5547_v11  ;;  %v5556_v11 = vld [vmem:[#allocation10_spill] sm:$0xff]  ;;  %v5565_v22 = vld [vmem:[#allocation20_spill] sm:$0xff] }
 0x606   :  { %1998 = vmatpush2.bf16.msra.mxu0 %v5548_v41  ;;  %2039 = vmatpush2.bf16.msra.mxu1 %v5549_v29  ;;  %v5557_v41 = vld [vmem:[#allocation12_spill] sm:$0xff]  ;;  %v5558_v29 = vld [vmem:[#allocation13_spill] sm:$0xff] }
 0x607   :  { %1999 = vmatprep.subr.bf16.mxu0 %v5550_v52  ;;  %2040 = vmatprep.subr.bf16.mxu1 %v5551_v38  ;;  %v5559_v52 = vld [vmem:[#allocation14_spill] sm:$0xff]  ;;  %v5560_v38 = vld [vmem:[#allocation15_spill] sm:$0xff] }
 0x60a   :  { %2000 = vmatpush2.bf16.msra.mxu0 %v5552_v35  ;;  %2041 = vmatpush2.bf16.msra.mxu1 %v5553_v62  ;;  %v5561_v35 = vld [vmem:[#allocation16_spill] sm:$0xff]  ;;  %v5562_v62 = vld [vmem:[#allocation17_spill] sm:$0xff] }
 0x60b   :  { %2109 = vmatprep.subr.bf16.mxu0 %v5554_v58  ;;  %2150 = vmatprep.subr.bf16.mxu1 %v5555_v46  ;;  %v5563_v58 = vld [vmem:[#allocation18_spill] sm:$0xff]  ;;  %v5564_v46 = vld [vmem:[#allocation19_spill] sm:$0xff] }
 0x60d   :  { %2002 = vmatmul.mubr.bf16.vlgmr.msra.gmra.mxu0 %v4262_v59  ;;  %2043 = vmatmul.mubr.bf16.vlgmr.msra.gmra.mxu1 %v4262_v59  ;;  %v5566_v59 = vld [vmem:[#allocation21_spill] sm:$0xff] }
 0x60e   :  { %2110 = vmatpush1.bf16.msra.mxu0 %v5556_v11  ;;  %2151 = vmatpush1.bf16.msra.mxu1 %v5557_v41  ;;  %v5567_v11 = vld [vmem:[#allocation22_spill] sm:$0xff]  ;;  %v5568_v41 = vld [vmem:[#allocation23_spill] sm:$0xff] }
 0x60f   :  { %2111 = vmatprep.subr.bf16.mxu0 %v5558_v29  ;;  %2152 = vmatprep.subr.bf16.mxu1 %v5559_v52  ;;  %v5569_v29 = vld [vmem:[#allocation24_spill] sm:$0xff]  ;;  %v5570_v52 = vld [vmem:[#allocation25_spill] sm:$0xff] }
 0x612   :  { %2112 = vmatpush1.bf16.msra.mxu0 %v5560_v38  ;;  %2153 = vmatpush1.bf16.msra.mxu1 %v5561_v35  ;;  %v5571_v38 = vld [vmem:[#allocation26_spill] sm:$0xff]  ;;  %v5572_v35 = vld [vmem:[#allocation27_spill] sm:$0xff] }
 0x613   :  { %2113 = vmatprep.subr.bf16.mxu0 %v5562_v62  ;;  %2154 = vmatprep.subr.bf16.mxu1 %v5563_v58  ;;  %v5573_v62 = vld [vmem:[#allocation28_spill] sm:$0xff]  ;;  %v5574_v58 = vld [vmem:[#allocation29_spill] sm:$0xff] }
 0x616   :  { %2114 = vmatpush1.bf16.msra.mxu0 %v5564_v46  ;;  %2155 = vmatpush1.bf16.msra.mxu1 %v5565_v22  ;;  %v5575_v46 = vld [vmem:[#allocation30_spill] sm:$0xff]  ;;  %v5576_v22 = vld [vmem:[#allocation31_spill] sm:$0xff] }
 0x617   :  { %2115 = vmatprep.subr.bf16.mxu0 %v5566_v59  ;;  %2156 = vmatprep.subr.bf16.mxu1 %v5567_v11  ;;  %v5577_v59 = vld [vmem:[#allocation32_spill] sm:$0xff]  ;;  %v5578_v11 = vld [vmem:[#allocation33_spill] sm:$0xff] }
 0x61a   :  { %2116 = vmatpush1.bf16.msra.mxu0 %v5568_v41  ;;  %2157 = vmatpush1.bf16.msra.mxu1 %v5569_v29  ;;  %v5579_v41 = vld [vmem:[#allocation34_spill] sm:$0xff]  ;;  %v5580_v29 = vld [vmem:[#allocation35_spill] sm:$0xff] }
 0x61b   :  { %2117 = vmatprep.subr.bf16.mxu0 %v5570_v52  ;;  %2158 = vmatprep.subr.bf16.mxu1 %v5571_v38  ;;  %v5581_v52 = vld [vmem:[#allocation36_spill] sm:$0xff]  ;;  %v5582_v38 = vld [vmem:[#allocation37_spill] sm:$0xff] }
 0x61e   :  { %2118 = vmatpush1.bf16.msra.mxu0 %v5572_v35  ;;  %2159 = vmatpush1.bf16.msra.mxu1 %v5573_v62  ;;  %v5583_v35 = vld [vmem:[#allocation38_spill] sm:$0xff]  ;;  %v5584_v62 = vld [vmem:[#allocation39_spill] sm:$0xff] }
 0x61f   :  { %2119 = vmatprep.subr.bf16.mxu0 %v5574_v58  ;;  %2160 = vmatprep.subr.bf16.mxu1 %v5575_v46  ;;  %v5585_v58 = vld [vmem:[#allocation40_spill] sm:$0xff]  ;;  %v5586_v46 = vld [vmem:[#allocation41_spill] sm:$0xff] }
 0x622   :  { %2120 = vmatpush1.bf16.msra.mxu0 %v5576_v22  ;;  %2161 = vmatpush1.bf16.msra.mxu1 %v5577_v59  ;;  %v5587_v22 = vld [vmem:[#allocation42_spill] sm:$0xff]  ;;  %v5588_v59 = vld [vmem:[#allocation43_spill] sm:$0xff] }
 0x623   :  { %2121 = vmatprep.subr.bf16.mxu0 %v5578_v11  ;;  %2162 = vmatprep.subr.bf16.mxu1 %v5579_v41  ;;  %v5589_v11 = vld [vmem:[#allocation44_spill] sm:$0xff]  ;;  %v5590_v41 = vld [vmem:[#allocation45_spill] sm:$0xff] }
 0x626   :  { %2122 = vmatpush1.bf16.msra.mxu0 %v5580_v29  ;;  %2163 = vmatpush1.bf16.msra.mxu1 %v5581_v52  ;;  %v5591_v29 = vld [vmem:[#allocation46_spill] sm:$0xff]  ;;  %v5592_v52 = vld [vmem:[#allocation47_spill] sm:$0xff] }
 0x627   :  { %2123 = vmatprep.subr.bf16.mxu0 %v5582_v38  ;;  %2164 = vmatprep.subr.bf16.mxu1 %v5583_v35  ;;  %v5593_v38 = vld [vmem:[#allocation48_spill] sm:$0xff]  ;;  %v5594_v35 = vld [vmem:[#allocation49_spill] sm:$0xff] }
 0x62a   :  { %2124 = vmatpush1.bf16.msra.mxu0 %v5584_v62  ;;  %2165 = vmatpush1.bf16.msra.mxu1 %v5585_v58  ;;  %v5595_v62 = vld [vmem:[#allocation50_spill] sm:$0xff]  ;;  %v5596_v58 = vld [vmem:[#allocation51_spill] sm:$0xff] }
 0x62b   :  { %2125 = vmatprep.subr.bf16.mxu0 %v5586_v46  ;;  %2166 = vmatprep.subr.bf16.mxu1 %v5587_v22  ;;  %v5597_v46 = vld [vmem:[#allocation52_spill] sm:$0xff]  ;;  %v5598_v22 = vld [vmem:[#allocation53_spill] sm:$0xff] }
 0x62e   :  { %2126 = vmatpush2.bf16.msra.mxu0 %v5588_v59  ;;  %2167 = vmatpush2.bf16.msra.mxu1 %v5589_v11  ;;  %v5599_v59 = vld [vmem:[#allocation54_spill] sm:$0xff]  ;;  %v5600_v11 = vld [vmem:[#allocation55_spill] sm:$0xff] }
 0x62f   :  { %2127 = vmatprep.subr.bf16.mxu0 %v5590_v41  ;;  %2168 = vmatprep.subr.bf16.mxu1 %v5591_v29  ;;  %v5601_v41 = vld [vmem:[#allocation56_spill] sm:$0xff]  ;;  %v5602_v29 = vld [vmem:[#allocation57_spill] sm:$0xff] }
 0x632   :  { %2128 = vmatpush2.bf16.msra.mxu0 %v5592_v52  ;;  %2169 = vmatpush2.bf16.msra.mxu1 %v5593_v38  ;;  %v5603_v52 = vld [vmem:[#allocation58_spill] sm:$0xff]  ;;  %v5604_v38 = vld [vmem:[#allocation59_spill] sm:$0xff] }
 0x633   :  { %2129 = vmatprep.subr.bf16.mxu0 %v5594_v35  ;;  %2170 = vmatprep.subr.bf16.mxu1 %v5595_v62  ;;  %v5605_v35 = vld [vmem:[#allocation60_spill] sm:$0xff]  ;;  %v5606_v62 = vld [vmem:[#allocation61_spill] sm:$0xff] }
 0x636   :  { %2130 = vmatpush2.bf16.msra.mxu0 %v5596_v58  ;;  %2171 = vmatpush2.bf16.msra.mxu1 %v5597_v46  ;;  %v5607_v58 = vld [vmem:[#allocation62_spill] sm:$0xff]  ;;  %v5608_v46 = vld [vmem:[#allocation63_spill] sm:$0xff] }
 0x637   :  { %2131 = vmatprep.subr.bf16.mxu0 %v5598_v22  ;;  %2172 = vmatprep.subr.bf16.mxu1 %v5599_v59  ;;  %v5609_v22 = vld [vmem:[#allocation64_spill] sm:$0xff]  ;;  %v5610_v59 = vld [vmem:[#allocation65_spill] sm:$0xff] }
 0x63a   :  { %2132 = vmatpush2.bf16.msra.mxu0 %v5600_v11  ;;  %2173 = vmatpush2.bf16.msra.mxu1 %v5601_v41  ;;  %v5611_v11 = vld [vmem:[#allocation66_spill] sm:$0xff]  ;;  %v5612_v41 = vld [vmem:[#allocation68_spill] sm:$0xff] }
 0x63b   :  { %2133 = vmatprep.subr.bf16.mxu0 %v5602_v29  ;;  %2174 = vmatprep.subr.bf16.mxu1 %v5603_v52  ;;  %v5613_v29 = vld [vmem:[#allocation69_spill] sm:$0xff]  ;;  %v5614_v52 = vld [vmem:[#allocation70_spill] sm:$0xff] }
 0x63e   :  { %2134 = vmatpush2.bf16.msra.mxu0 %v5604_v38  ;;  %2175 = vmatpush2.bf16.msra.mxu1 %v5605_v35  ;;  %v5615_v38 = vld [vmem:[#allocation71_spill] sm:$0xff]  ;;  %v5616_v35 = vld [vmem:[#allocation72_spill] sm:$0xff] }
 0x63f   :  { %2135 = vmatprep.subr.bf16.mxu0 %v5606_v62  ;;  %2176 = vmatprep.subr.bf16.mxu1 %v5607_v58  ;;  %v5617_v62 = vld [vmem:[#allocation73_spill] sm:$0xff]  ;;  %v5618_v58 = vld [vmem:[#allocation74_spill] sm:$0xff] }
 0x642   :  { %2136 = vmatpush2.bf16.msra.mxu0 %v5608_v46  ;;  %2177 = vmatpush2.bf16.msra.mxu1 %v5609_v22  ;;  %v5619_v46 = vld [vmem:[#allocation75_spill] sm:$0xff]  ;;  %v168_v22 = vpop.permute.xlu0 %167 }
 0x643   :  { %2137 = vmatprep.subr.bf16.mxu0 %v5610_v59  ;;  %2178 = vmatprep.subr.bf16.mxu1 %v5611_v11  ;;  %v5620_v59 = vld [vmem:[#allocation79_spill] sm:$0xff]  ;;  %v5621_v11 = vld [vmem:[#allocation80_spill] sm:$0xff] }
 0x644   :  { %v170_v1 = vmul.f32 %v168_v22, %v5620_v59  ;;  %v171_v4 = vmul.f32 %v168_v22, %v5621_v11  ;;  %v172_v11 = vmul.f32 %v168_v22, %v5323_v53 }
 0x646   :  { %2138 = vmatpush2.bf16.msra.mxu0 %v5612_v41  ;;  %2179 = vmatpush2.bf16.msra.mxu1 %v5613_v29  ;;  %v5622_v41 = vld [vmem:[#allocation81_spill] sm:$0xff]  ;;  %v5623_v29 = vld [vmem:[#allocation82_spill] sm:$0xff] }
 0x647   :  { %2139 = vmatprep.subr.bf16.mxu0 %v5614_v52  ;;  %2180 = vmatprep.subr.bf16.mxu1 %v5615_v38  ;;  %v174_v25 = vadd.f32 %v170_v1, %v5622_v41  ;;  %v175_v32 = vadd.f32 %v171_v4, %v5623_v29  ;;  %v176_v1 = vadd.f32 %v172_v11, %v5324_v15 }
 0x64a   :  { %2140 = vmatpush2.bf16.msra.mxu0 %v5616_v35  ;;  %2181 = vmatpush2.bf16.msra.mxu1 %v5617_v62 }
 0x64b   :  { %2191 = vmatprep.subr.bf16.mxu0 %v5618_v58  ;;  %2232 = vmatprep.subr.bf16.mxu1 %v5619_v46 }
 0x68d   :  { %v1921_v52 = vpop.f32.mrf.mxu0  ;;  %v1962_v51 = vpop.f32.mrf.mxu1 }
 0x68e   :  { %v2080_v38 = vadd.f32 %v1921_v52, %v174_v25  ;;  %v2082_v41 = vadd.f32 %v1962_v51, %v176_v1 }
 0x68f   :  { %v1923_v21 = vpop.f32.mrf.mxu0  ;;  %v1964_v35 = vpop.f32.mrf.mxu1 }
 0x690   :  { %v2843_v9 = vmul.f32 -1.442695, %v2080_v38  ;;  %v2081_v62 = vadd.f32 %v1923_v21, %v175_v32  ;;  %v173_v38 = vmul.f32 %v168_v22, %v5224_v12 }
 0x691   :  { %v1925_v0 = vpop.f32.mrf.mxu0  ;;  %v1966_v58 = vpop.f32.mrf.mxu1 }
 0x692   :  { %3027 = vpow2.f32 %v2843_v9  ;;  %v2844_v46 = vmul.f32 -1.442695, %v2081_v62 }
 0x693   :  { %v1926_v43 = vpop.f32.mrf.mxu0  ;;  %v1967_v23 = vpop.f32.mrf.mxu1 }
 0x694   :  { %3029 = vpow2.f32 %v2844_v46  ;;  %v3217_v46 = vmov 6  }
 0x695   :  { %3031 = vtanh.f32 %v2082_v41  ;;  %2880 = vset.pattern.permute.xlu1 %v3217_v46 }
 0x696   :  { %179 = vperm.xlu1 %2880, %v4248_v39  }
 0x69f   :  { %v3028_v4 = vpop.eup %3027 }
 0x6a0   :  { %v2087_v29 = vadd.f32 1.0, %v3028_v4 }
 0x6a1   :  { %v3030_v59 = vpop.eup %3029 }
 0x6a2   :  { %3033 = vrcp.f32 %v2087_v29  ;;  %v2093_v25 = vadd.f32 1.0, %v3030_v59  ;;  %v3032_v21 = vpop.eup %3031 }
 0x6a4   :  { %3035 = vrcp.f32 %v2093_v25 }
 0x6af   :  { %v3034_v0 = vpop.eup %3033 }
 0x6b0   :  { %v2104_v32 = vmul.f32 %v3034_v0, %v3032_v21  ;;  %v177_v21 = vadd.f32 %v173_v38, %v5225_v63 }
 0x6b1   :  { %v3036_v9 = vpop.eup %3035 }
 0x6b2   :  { %v2103_v43 = vmul.f32 %v3036_v9, %v4246_v19  ;;  %v2083_v0 = vadd.f32 %v1964_v35, %v177_v21 }
 0x6b4   :  { %v4403_v23 = vadd.f32 %v2104_v32, %v2103_v43  ;;  %v2845_v9 = vmul.f32 -1.442695, %v2083_v0 }
 0x6cd   :  { %v2003_v51 = vpop.f32.mrf.mxu0  ;;  %v2044_v11 = vpop.f32.mrf.mxu1 }
 0x6ce   :  { %v2051_v52 = vadd.f32 %v2003_v51, %v5425_v60  ;;  %v2053_v22 = vadd.f32 %v2044_v11, %v3788_v5 }
 0x6cf   :  { %v2005_v41 = vpop.f32.mrf.mxu0  ;;  %v2046_v29 = vpop.f32.mrf.mxu1 }
 0x6d0   :  { %v2840_v62 = vmul.f32 -1.442695, %v2051_v52  ;;  %v2052_v58 = vadd.f32 %v2005_v41, %v3777_v56  ;;  %v2054_v32 = vadd.f32 %v2046_v29, %v3784_v61 }
 0x6d1   :  { %v2007_v59 = vpop.f32.mrf.mxu0  ;;  %v2048_v1 = vpop.f32.mrf.mxu1 }
 0x6d2   :  { %3037 = vpow2.f32 %v2840_v62  ;;  %v2841_v19 = vmul.f32 -1.442695, %v2052_v58  ;;  %v2842_v43 = vmul.f32 -1.442695, %v2054_v32 }
 0x6d3   :  { %v2008_v4 = vpop.f32.mrf.mxu0  ;;  %v2049_v25 = vpop.f32.mrf.mxu1 }
 0x6d4   :  { %3039 = vpow2.f32 %v2841_v19 }
 0x6d5   :  { %3041 = vpow2.f32 %v2845_v9 }
 0x6d6   :  { %3043 = vpow2.f32 %v2842_v43 }
 0x6df   :  { %v3038_v46 = vpop.eup %3037 }
 0x6e0   :  { %v2058_v51 = vadd.f32 1.0, %v3038_v46 }
 0x6e1   :  { %v3040_v52 = vpop.eup %3039 }
 0x6e2   :  { %3045 = vrcp.f32 %v2058_v51  ;;  %v2064_v41 = vadd.f32 1.0, %v3040_v52  ;;  %v3042_v62 = vpop.eup %3041  ;;  %v5625_v51 = vld [vmem:[#allocation121_spill] sm:$0xff]  ;;  %v5626_v52 = vld [vmem:[#allocation122_spill] sm:$0xff] }
 0x6e3   :  { %3047 = vtanh.f32 %v2053_v22  ;;  %v3044_v58 = vpop.eup %3043  ;;  %v2100_v35 = vadd.f32 1.0, %v3042_v62  ;;  %v5628_v62 = vld [vmem:[#allocation124_spill] sm:$0xff] }
 0x6e4   :  { %3049 = vrcp.f32 %v2064_v41  ;;  %v2071_v29 = vadd.f32 1.0, %v3044_v58  ;;  %v5627_v41 = vld [vmem:[#allocation123_spill] sm:$0xff]  ;;  %v5629_v58 = vld [vmem:[#allocation125_spill] sm:$0xff] }
 0x6e5   :  { %3051 = vtanh.f32 %v4403_v23 }
 0x6e6   :  { %3053 = vrcp.f32 %v2100_v35  ;;  %v5632_v35 = vld [vmem:[#allocation128_spill] sm:$0xff] }
 0x6e7   :  { %3055 = vrcp.f32 %v2071_v29  ;;  %v5634_v29 = vld [vmem:[#allocation130_spill] sm:$0xff] }
 0x6ef   :  { %v3046_v38 = vpop.eup %3045 }
 0x6f0   :  { %v3048_v59 = vpop.eup %3047 }
 0x6f1   :  { %v3050_v1 = vpop.eup %3049  ;;  %v2075_v19 = vmul.f32 %v3048_v59, %v3046_v38  ;;  %v5630_v38 = vld [vmem:[#allocation126_spill] sm:$0xff]  ;;  %v5631_v59 = vld [vmem:[#allocation127_spill] sm:$0xff] }
 0x6f2   :  { %v2074_v4 = vmul.f32 %v3050_v1, %v4259_v13  ;;  %v3052_v25 = vpop.eup %3051  ;;  %v5624_v13 = vld [vmem:[#allocation120_spill] sm:$0xff]  ;;  %v5633_v1 = vld [vmem:[#allocation129_spill] sm:$0xff] }
 0x6f3   :  { %v3054_v21 = vpop.eup %3053 }
 0x6f4   :  { %v4414_v11 = vadd.f32 %v2075_v19, %v2074_v4  ;;  %v3056_v0 = vpop.eup %3055  ;;  %v2107_v9 = vmul.f32 %v3054_v21, %v3052_v25  ;;  %v5635_v19 = vld [vmem:[#allocation131_spill] sm:$0xff]  ;;  %v5636_v4 = vld [vmem:[#allocation132_spill] sm:$0xff]  ;;  %v5637_v25 = vld [vmem:[#allocation133_spill] sm:$0xff] }
 0x6f5   :  { %v5638_v21 = vld [vmem:[#allocation134_spill] sm:$0xff] }
 0x6f6   :  { %3057 = vtanh.f32 %v4414_v11  ;;  %v4417_v22 = vpack.c.bf16 %v2107_v9, %v2107_v9  ;;  %v5641_v9 = vld [vmem:[#allocation137_spill] sm:$0xff] }
 0x703   :  { %v3058_v32 = vpop.eup %3057 }
 0x704   :  { %v2078_v43 = vmul.f32 %v3058_v32, %v3056_v0  ;;  %v5639_v0 = vld [vmem:[#allocation135_spill] sm:$0xff]  ;;  %v5640_v32 = vld [vmem:[#allocation136_spill] sm:$0xff] }
 0x706   :  { %v2079_v46 = vpack.c.bf16 %v2078_v43, %v2078_v43  ;;  %v5642_v43 = vld [vmem:[#allocation138_spill] sm:$0xff] }
 0x708   :  { %2141 = vmatprep.mubr.bf16.mxu0 %v2079_v46  ;;  %2182 = vmatprep.mubr.bf16.mxu1 %v2079_v46 }
 0x709   :  { %2142 = vmatmul.mubr.bf16.vlgmr.msra.gmra.mxu0 %v4417_v22  ;;  %2183 = vmatmul.mubr.bf16.vlgmr.msra.gmra.mxu1 %v4417_v22 }
 0x70a   :  { %2192 = vmatpush1.bf16.msra.mxu0 %v3424_v33  ;;  %2233 = vmatpush1.bf16.msra.mxu1 %v5230_v26 }
 0x70b   :  { %2223 = vmatprep.mubr.bf16.mxu0 %v2079_v46  ;;  %2264 = vmatprep.mubr.bf16.mxu1 %v2079_v46  ;;  %v5643_v46 = vld [vmem:[#allocation139_spill] sm:$0xff] }
 0x70c   :  { %2193 = vmatprep.subr.bf16.mxu0 %v5231_v3  ;;  %2234 = vmatprep.subr.bf16.mxu1 %v5232_v50 }
 0x70e   :  { %2194 = vmatpush1.bf16.msra.mxu0 %v5233_v40  ;;  %2235 = vmatpush1.bf16.msra.mxu1 %v5234_v24 }
 0x70f   :  { %2195 = vmatprep.subr.bf16.mxu0 %v5235_v48  ;;  %2236 = vmatprep.subr.bf16.mxu1 %v5327_v6 }
 0x712   :  { %2196 = vmatpush1.bf16.msra.mxu0 %v5328_v54  ;;  %2237 = vmatpush1.bf16.msra.mxu1 %v5329_v18 }
 0x713   :  { %2197 = vmatprep.subr.bf16.mxu0 %v5330_v37  ;;  %2238 = vmatprep.subr.bf16.mxu1 %v5331_v36 }
 0x716   :  { %2198 = vmatpush1.bf16.msra.mxu0 %v5332_v14  ;;  %2239 = vmatpush1.bf16.msra.mxu1 %v5333_v31 }
 0x717   :  { %2199 = vmatprep.subr.bf16.mxu0 %v5334_v44  ;;  %2240 = vmatprep.subr.bf16.mxu1 %v5426_v45 }
 0x71a   :  { %2200 = vmatpush1.bf16.msra.mxu0 %v5427_v7  ;;  %2241 = vmatpush1.bf16.msra.mxu1 %v5428_v2 }
 0x71b   :  { %2201 = vmatprep.subr.bf16.mxu0 %v5429_v10  ;;  %2242 = vmatprep.subr.bf16.mxu1 %v5430_v27 }
 0x71e   :  { %2202 = vmatpush1.bf16.msra.mxu0 %v5431_v47  ;;  %2243 = vmatpush1.bf16.msra.mxu1 %v5432_v42 }
 0x71f   :  { %2203 = vmatprep.subr.bf16.mxu0 %v5433_v17  ;;  %2244 = vmatprep.subr.bf16.mxu1 %v5434_v57 }
 0x722   :  { %2204 = vmatpush1.bf16.msra.mxu0 %v5435_v49  ;;  %2245 = vmatpush1.bf16.msra.mxu1 %v5436_v20 }
 0x723   :  { %2205 = vmatprep.subr.bf16.mxu0 %v5346_v8  ;;  %2246 = vmatprep.subr.bf16.mxu1 %v5347_v55 }
 0x726   :  { %2206 = vmatpush1.bf16.msra.mxu0 %v5348_v28  ;;  %2247 = vmatpush1.bf16.msra.mxu1 %v5437_v16 }
 0x727   :  { %2207 = vmatprep.subr.bf16.mxu0 %v5438_v34  ;;  %2248 = vmatprep.subr.bf16.mxu1 %v5351_v30 }
 0x72a   :  { %2208 = vmatpush2.bf16.msra.mxu0 %v5624_v13  ;;  %2249 = vmatpush2.bf16.msra.mxu1 %v5625_v51 }
 0x72b   :  { %2209 = vmatprep.subr.bf16.mxu0 %v5626_v52  ;;  %2250 = vmatprep.subr.bf16.mxu1 %v5627_v41 }
 0x72e   :  { %2210 = vmatpush2.bf16.msra.mxu0 %v5628_v62  ;;  %2251 = vmatpush2.bf16.msra.mxu1 %v5629_v58 }
 0x72f   :  { %2211 = vmatprep.subr.bf16.mxu0 %v5630_v38  ;;  %2252 = vmatprep.subr.bf16.mxu1 %v5631_v59 }
 0x732   :  { %2212 = vmatpush2.bf16.msra.mxu0 %v5632_v35  ;;  %2253 = vmatpush2.bf16.msra.mxu1 %v5633_v1  ;;  %v5644_v1 = vld [vmem:[#allocation140_spill] sm:$0xff] }
 0x733   :  { %2213 = vmatprep.subr.bf16.mxu0 %v5634_v29  ;;  %2254 = vmatprep.subr.bf16.mxu1 %v5635_v19  ;;  %v5645_v29 = vld [vmem:[#allocation141_spill] sm:$0xff]  ;;  %v5646_v19 = vld [vmem:[#allocation142_spill] sm:$0xff] }
 0x736   :  { %2214 = vmatpush2.bf16.msra.mxu0 %v5636_v4  ;;  %2255 = vmatpush2.bf16.msra.mxu1 %v5637_v25  ;;  %v5647_v4 = vld [vmem:[#allocation143_spill] sm:$0xff]  ;;  %v5648_v25 = vld [vmem:[#allocation144_spill] sm:$0xff] }
 0x737   :  { %2215 = vmatprep.subr.bf16.mxu0 %v5638_v21  ;;  %2256 = vmatprep.subr.bf16.mxu1 %v5639_v0  ;;  %v5649_v21 = vld [vmem:[#allocation145_spill] sm:$0xff]  ;;  %v5650_v0 = vld [vmem:[#allocation146_spill] sm:$0xff] }
 0x73a   :  { %2216 = vmatpush2.bf16.msra.mxu0 %v5640_v32  ;;  %2257 = vmatpush2.bf16.msra.mxu1 %v5641_v9  ;;  %v5651_v32 = vld [vmem:[#allocation147_spill] sm:$0xff]  ;;  %v5652_v9 = vld [vmem:[#allocation148_spill] sm:$0xff] }
 0x73b   :  { %2217 = vmatprep.subr.bf16.mxu0 %v5642_v43  ;;  %2258 = vmatprep.subr.bf16.mxu1 %v5643_v46  ;;  %v5653_v43 = vld [vmem:[#allocation149_spill] sm:$0xff] }
 0x73c   :  { %v5654_v46 = vld [vmem:[#allocation9_spill] sm:$0xff] }
 0x73e   :  { %2218 = vmatpush2.bf16.msra.mxu0 %v5644_v1  ;;  %2259 = vmatpush2.bf16.msra.mxu1 %v5645_v29  ;;  %v5655_v1 = vld [vmem:[#allocation11_spill] sm:$0xff] }
 0x73f   :  { %2219 = vmatprep.subr.bf16.mxu0 %v5646_v19  ;;  %2260 = vmatprep.subr.bf16.mxu1 %v5647_v4  ;;  %v5656_v4 = vld [vmem:[#allocation10_spill] sm:$0xff]  ;;  %v5665_v19 = vld [vmem:[#allocation20_spill] sm:$0xff] }
 0x742   :  { %2220 = vmatpush2.bf16.msra.mxu0 %v5648_v25  ;;  %2261 = vmatpush2.bf16.msra.mxu1 %v5649_v21  ;;  %v5657_v25 = vld [vmem:[#allocation12_spill] sm:$0xff]  ;;  %v5658_v21 = vld [vmem:[#allocation13_spill] sm:$0xff] }
 0x743   :  { %2221 = vmatprep.subr.bf16.mxu0 %v5650_v0  ;;  %2262 = vmatprep.subr.bf16.mxu1 %v5651_v32  ;;  %v5659_v0 = vld [vmem:[#allocation14_spill] sm:$0xff]  ;;  %v5660_v32 = vld [vmem:[#allocation15_spill] sm:$0xff] }
 0x746   :  { %2222 = vmatpush2.bf16.msra.mxu0 %v5652_v9  ;;  %2263 = vmatpush2.bf16.msra.mxu1 %v5653_v43  ;;  %v5661_v9 = vld [vmem:[#allocation16_spill] sm:$0xff]  ;;  %v5662_v43 = vld [vmem:[#allocation17_spill] sm:$0xff] }
 0x747   :  { %2331 = vmatprep.subr.bf16.mxu0 %v5654_v46  ;;  %2372 = vmatprep.subr.bf16.mxu1 %v5655_v1  ;;  %v5663_v46 = vld [vmem:[#allocation18_spill] sm:$0xff]  ;;  %v5664_v1 = vld [vmem:[#allocation19_spill] sm:$0xff] }
 0x749   :  { %2224 = vmatmul.mubr.bf16.vlgmr.msra.gmra.mxu0 %v4417_v22  ;;  %2265 = vmatmul.mubr.bf16.vlgmr.msra.gmra.mxu1 %v4417_v22  ;;  %v5666_v22 = vld [vmem:[#allocation21_spill] sm:$0xff] }
 0x74a   :  { %2332 = vmatpush1.bf16.msra.mxu0 %v5656_v4  ;;  %2373 = vmatpush1.bf16.msra.mxu1 %v5657_v25  ;;  %v5667_v4 = vld [vmem:[#allocation22_spill] sm:$0xff]  ;;  %v5668_v25 = vld [vmem:[#allocation23_spill] sm:$0xff] }
 0x74b   :  { %2333 = vmatprep.subr.bf16.mxu0 %v5658_v21  ;;  %2374 = vmatprep.subr.bf16.mxu1 %v5659_v0  ;;  %v5669_v21 = vld [vmem:[#allocation24_spill] sm:$0xff]  ;;  %v5670_v0 = vld [vmem:[#allocation25_spill] sm:$0xff] }
 0x74e   :  { %2334 = vmatpush1.bf16.msra.mxu0 %v5660_v32  ;;  %2375 = vmatpush1.bf16.msra.mxu1 %v5661_v9  ;;  %v5671_v32 = vld [vmem:[#allocation26_spill] sm:$0xff]  ;;  %v5672_v9 = vld [vmem:[#allocation27_spill] sm:$0xff] }
 0x74f   :  { %2335 = vmatprep.subr.bf16.mxu0 %v5662_v43  ;;  %2376 = vmatprep.subr.bf16.mxu1 %v5663_v46  ;;  %v5673_v43 = vld [vmem:[#allocation28_spill] sm:$0xff]  ;;  %v5674_v46 = vld [vmem:[#allocation29_spill] sm:$0xff] }
 0x752   :  { %2336 = vmatpush1.bf16.msra.mxu0 %v5664_v1  ;;  %2377 = vmatpush1.bf16.msra.mxu1 %v5665_v19  ;;  %v5675_v1 = vld [vmem:[#allocation30_spill] sm:$0xff]  ;;  %v5676_v19 = vld [vmem:[#allocation31_spill] sm:$0xff] }
 0x753   :  { %2337 = vmatprep.subr.bf16.mxu0 %v5666_v22  ;;  %2378 = vmatprep.subr.bf16.mxu1 %v5667_v4  ;;  %v5677_v22 = vld [vmem:[#allocation32_spill] sm:$0xff]  ;;  %v5678_v4 = vld [vmem:[#allocation33_spill] sm:$0xff] }
 0x756   :  { %2338 = vmatpush1.bf16.msra.mxu0 %v5668_v25  ;;  %2379 = vmatpush1.bf16.msra.mxu1 %v5669_v21  ;;  %v5679_v25 = vld [vmem:[#allocation34_spill] sm:$0xff]  ;;  %v5680_v21 = vld [vmem:[#allocation35_spill] sm:$0xff] }
 0x757   :  { %2339 = vmatprep.subr.bf16.mxu0 %v5670_v0  ;;  %2380 = vmatprep.subr.bf16.mxu1 %v5671_v32  ;;  %v5681_v0 = vld [vmem:[#allocation36_spill] sm:$0xff]  ;;  %v5682_v32 = vld [vmem:[#allocation37_spill] sm:$0xff] }
 0x75a   :  { %2340 = vmatpush1.bf16.msra.mxu0 %v5672_v9  ;;  %2381 = vmatpush1.bf16.msra.mxu1 %v5673_v43  ;;  %v5683_v9 = vld [vmem:[#allocation38_spill] sm:$0xff]  ;;  %v5684_v43 = vld [vmem:[#allocation39_spill] sm:$0xff] }
 0x75b   :  { %2341 = vmatprep.subr.bf16.mxu0 %v5674_v46  ;;  %2382 = vmatprep.subr.bf16.mxu1 %v5675_v1  ;;  %v5685_v46 = vld [vmem:[#allocation40_spill] sm:$0xff]  ;;  %v5686_v1 = vld [vmem:[#allocation41_spill] sm:$0xff] }
 0x75e   :  { %2342 = vmatpush1.bf16.msra.mxu0 %v5676_v19  ;;  %2383 = vmatpush1.bf16.msra.mxu1 %v5677_v22  ;;  %v5687_v19 = vld [vmem:[#allocation42_spill] sm:$0xff]  ;;  %v5688_v22 = vld [vmem:[#allocation43_spill] sm:$0xff] }
 0x75f   :  { %2343 = vmatprep.subr.bf16.mxu0 %v5678_v4  ;;  %2384 = vmatprep.subr.bf16.mxu1 %v5679_v25  ;;  %v5689_v4 = vld [vmem:[#allocation44_spill] sm:$0xff]  ;;  %v5690_v25 = vld [vmem:[#allocation45_spill] sm:$0xff] }
 0x762   :  { %2344 = vmatpush1.bf16.msra.mxu0 %v5680_v21  ;;  %2385 = vmatpush1.bf16.msra.mxu1 %v5681_v0  ;;  %v5691_v21 = vld [vmem:[#allocation46_spill] sm:$0xff]  ;;  %v5692_v0 = vld [vmem:[#allocation47_spill] sm:$0xff] }
 0x763   :  { %2345 = vmatprep.subr.bf16.mxu0 %v5682_v32  ;;  %2386 = vmatprep.subr.bf16.mxu1 %v5683_v9  ;;  %v5693_v32 = vld [vmem:[#allocation48_spill] sm:$0xff]  ;;  %v5694_v9 = vld [vmem:[#allocation49_spill] sm:$0xff] }
 0x766   :  { %2346 = vmatpush1.bf16.msra.mxu0 %v5684_v43  ;;  %2387 = vmatpush1.bf16.msra.mxu1 %v5685_v46  ;;  %v5695_v43 = vld [vmem:[#allocation50_spill] sm:$0xff]  ;;  %v5696_v46 = vld [vmem:[#allocation51_spill] sm:$0xff] }
 0x767   :  { %2347 = vmatprep.subr.bf16.mxu0 %v5686_v1  ;;  %2388 = vmatprep.subr.bf16.mxu1 %v5687_v19  ;;  %v5697_v1 = vld [vmem:[#allocation52_spill] sm:$0xff]  ;;  %v5698_v19 = vld [vmem:[#allocation53_spill] sm:$0xff] }
 0x76a   :  { %2348 = vmatpush2.bf16.msra.mxu0 %v5688_v22  ;;  %2389 = vmatpush2.bf16.msra.mxu1 %v5689_v4  ;;  %v5699_v22 = vld [vmem:[#allocation54_spill] sm:$0xff]  ;;  %v5700_v4 = vld [vmem:[#allocation55_spill] sm:$0xff] }
 0x76b   :  { %2349 = vmatprep.subr.bf16.mxu0 %v5690_v25  ;;  %2390 = vmatprep.subr.bf16.mxu1 %v5691_v21  ;;  %v5701_v25 = vld [vmem:[#allocation56_spill] sm:$0xff]  ;;  %v5702_v21 = vld [vmem:[#allocation57_spill] sm:$0xff] }
 0x76e   :  { %2350 = vmatpush2.bf16.msra.mxu0 %v5692_v0  ;;  %2391 = vmatpush2.bf16.msra.mxu1 %v5693_v32  ;;  %v5703_v0 = vld [vmem:[#allocation58_spill] sm:$0xff]  ;;  %v5704_v32 = vld [vmem:[#allocation59_spill] sm:$0xff] }
 0x76f   :  { %2351 = vmatprep.subr.bf16.mxu0 %v5694_v9  ;;  %2392 = vmatprep.subr.bf16.mxu1 %v5695_v43  ;;  %v5705_v9 = vld [vmem:[#allocation60_spill] sm:$0xff]  ;;  %v5706_v43 = vld [vmem:[#allocation61_spill] sm:$0xff] }
 0x772   :  { %2352 = vmatpush2.bf16.msra.mxu0 %v5696_v46  ;;  %2393 = vmatpush2.bf16.msra.mxu1 %v5697_v1  ;;  %v5707_v46 = vld [vmem:[#allocation62_spill] sm:$0xff]  ;;  %v5708_v1 = vld [vmem:[#allocation63_spill] sm:$0xff] }
 0x773   :  { %2353 = vmatprep.subr.bf16.mxu0 %v5698_v19  ;;  %2394 = vmatprep.subr.bf16.mxu1 %v5699_v22  ;;  %v5709_v19 = vld [vmem:[#allocation64_spill] sm:$0xff]  ;;  %v5710_v22 = vld [vmem:[#allocation65_spill] sm:$0xff] }
 0x776   :  { %2354 = vmatpush2.bf16.msra.mxu0 %v5700_v4  ;;  %2395 = vmatpush2.bf16.msra.mxu1 %v5701_v25  ;;  %v5711_v4 = vld [vmem:[#allocation66_spill] sm:$0xff]  ;;  %v5712_v25 = vld [vmem:[#allocation68_spill] sm:$0xff] }
 0x777   :  { %2355 = vmatprep.subr.bf16.mxu0 %v5702_v21  ;;  %2396 = vmatprep.subr.bf16.mxu1 %v5703_v0  ;;  %v5713_v21 = vld [vmem:[#allocation69_spill] sm:$0xff]  ;;  %v5714_v0 = vld [vmem:[#allocation70_spill] sm:$0xff] }
 0x77a   :  { %2356 = vmatpush2.bf16.msra.mxu0 %v5704_v32  ;;  %2397 = vmatpush2.bf16.msra.mxu1 %v5705_v9  ;;  %v5715_v32 = vld [vmem:[#allocation71_spill] sm:$0xff]  ;;  %v5716_v9 = vld [vmem:[#allocation72_spill] sm:$0xff] }
 0x77b   :  { %2357 = vmatprep.subr.bf16.mxu0 %v5706_v43  ;;  %2398 = vmatprep.subr.bf16.mxu1 %v5707_v46  ;;  %v5717_v43 = vld [vmem:[#allocation73_spill] sm:$0xff]  ;;  %v5718_v46 = vld [vmem:[#allocation74_spill] sm:$0xff] }
 0x77e   :  { %2358 = vmatpush2.bf16.msra.mxu0 %v5708_v1  ;;  %2399 = vmatpush2.bf16.msra.mxu1 %v5709_v19  ;;  %v5719_v1 = vld [vmem:[#allocation75_spill] sm:$0xff]  ;;  %v180_v19 = vpop.permute.xlu1 %179 }
 0x77f   :  { %2359 = vmatprep.subr.bf16.mxu0 %v5710_v22  ;;  %2400 = vmatprep.subr.bf16.mxu1 %v5711_v4  ;;  %v5720_v22 = vld [vmem:[#allocation79_spill] sm:$0xff]  ;;  %v5721_v4 = vld [vmem:[#allocation80_spill] sm:$0xff] }
 0x780   :  { %v182_v29 = vmul.f32 %v180_v19, %v5720_v22  ;;  %v183_v35 = vmul.f32 %v180_v19, %v5721_v4  ;;  %v184_v4 = vmul.f32 %v180_v19, %v5323_v53  ;;  %v5755_v53 = vld [vmem:[#allocation149_spill] sm:$0xff] }
 0x782   :  { %2360 = vmatpush2.bf16.msra.mxu0 %v5712_v25  ;;  %2401 = vmatpush2.bf16.msra.mxu1 %v5713_v21  ;;  %v5722_v25 = vld [vmem:[#allocation81_spill] sm:$0xff]  ;;  %v5723_v21 = vld [vmem:[#allocation82_spill] sm:$0xff] }
 0x783   :  { %2361 = vmatprep.subr.bf16.mxu0 %v5714_v0  ;;  %2402 = vmatprep.subr.bf16.mxu1 %v5715_v32  ;;  %v186_v59 = vadd.f32 %v182_v29, %v5722_v25  ;;  %v187_v38 = vadd.f32 %v183_v35, %v5723_v21  ;;  %v188_v29 = vadd.f32 %v184_v4, %v5324_v15  ;;  %v5753_v15 = vld [vmem:[#allocation147_spill] sm:$0xff] }
 0x786   :  { %2362 = vmatpush2.bf16.msra.mxu0 %v5716_v9  ;;  %2403 = vmatpush2.bf16.msra.mxu1 %v5717_v43 }
 0x787   :  { %2413 = vmatprep.subr.bf16.mxu0 %v5718_v46  ;;  %2454 = vmatprep.subr.bf16.mxu1 %v5719_v1 }
 0x7c9   :  { %v2143_v0 = vpop.f32.mrf.mxu0  ;;  %v2184_v58 = vpop.f32.mrf.mxu1 }
 0x7ca   :  { %v2302_v32 = vadd.f32 %v2143_v0, %v186_v59  ;;  %v2304_v25 = vadd.f32 %v2184_v58, %v188_v29 }
 0x7cb   :  { %v2145_v62 = vpop.f32.mrf.mxu0  ;;  %v2186_v9 = vpop.f32.mrf.mxu1 }
 0x7cc   :  { %v2849_v41 = vmul.f32 -1.442695, %v2302_v32  ;;  %v2303_v43 = vadd.f32 %v2145_v62, %v187_v38 }
 0x7cd   :  { %v2147_v52 = vpop.f32.mrf.mxu0  ;;  %v2188_v46 = vpop.f32.mrf.mxu1 }
 0x7ce   :  { %3059 = vpow2.f32 %v2849_v41  ;;  %v2850_v1 = vmul.f32 -1.442695, %v2303_v43  ;;  %v3218_v46 = vmov 7  }
 0x7cf   :  { %v2148_v51 = vpop.f32.mrf.mxu0  ;;  %v2189_v13 = vpop.f32.mrf.mxu1  ;;  %2881 = vset.pattern.permute.xlu1 %v3218_v46  ;;  %2882 = vset.pattern.permute.xlu0 %v3218_v46 }
 0x7d0   :  { %3061 = vpow2.f32 %v2850_v1  ;;  %191 = vperm.xlu1 %2881, %v4248_v39  }
 0x7d1   :  { %3063 = vtanh.f32 %v2304_v25 }
 0x7db   :  { %v3060_v35 = vpop.eup %3059 }
 0x7dc   :  { %v2309_v21 = vadd.f32 1.0, %v3060_v35 }
 0x7dd   :  { %v3062_v22 = vpop.eup %3061 }
 0x7de   :  { %3065 = vrcp.f32 %v2309_v21  ;;  %v2315_v59 = vadd.f32 1.0, %v3062_v22  ;;  %v3064_v62 = vpop.eup %3063  ;;  %v185_v21 = vmul.f32 %v180_v19, %v5224_v12  ;;  %v5756_v12 = vld [vmem:[#allocation74_spill] sm:$0xff] }
 0x7e0   :  { %3067 = vrcp.f32 %v2315_v59 }
 0x7eb   :  { %v3066_v52 = vpop.eup %3065 }
 0x7ec   :  { %v2326_v38 = vmul.f32 %v3066_v52, %v3064_v62  ;;  %v189_v62 = vadd.f32 %v185_v21, %v5225_v63  ;;  %v5754_v63 = vld [vmem:[#allocation148_spill] sm:$0xff] }
 0x7ed   :  { %v3068_v41 = vpop.eup %3067 }
 0x7ee   :  { %v2325_v51 = vmul.f32 %v3068_v41, %v4403_v23  ;;  %v2305_v39 = vadd.f32 %v2186_v9, %v189_v62 }
 0x7f0   :  { %v4558_v13 = vadd.f32 %v2326_v38, %v2325_v51  ;;  %v2851_v38 = vmul.f32 -1.442695, %v2305_v39 }
 0x7f2   :  { %5724 = vst [vmem:[#allocation67_spill] sm:$0xff] %v4558_v13 }
 0x809   :  { %v2225_v58 = vpop.f32.mrf.mxu0  ;;  %v2266_v1 = vpop.f32.mrf.mxu1 }
 0x80a   :  { %v2273_v4 = vadd.f32 %v2225_v58, %v5425_v60  ;;  %v2275_v19 = vadd.f32 %v2266_v1, %v3788_v5  ;;  %v5748_v5 = vld [vmem:[#allocation142_spill] sm:$0xff]  ;;  %v5751_v60 = vld [vmem:[#allocation145_spill] sm:$0xff] }
 0x80b   :  { %v2227_v25 = vpop.f32.mrf.mxu0  ;;  %v2268_v22 = vpop.f32.mrf.mxu1 }
 0x80c   :  { %v2846_v0 = vmul.f32 -1.442695, %v2273_v4  ;;  %v2274_v32 = vadd.f32 %v2227_v25, %v3777_v56  ;;  %v2276_v52 = vadd.f32 %v2268_v22, %v3784_v61  ;;  %v5749_v61 = vld [vmem:[#allocation143_spill] sm:$0xff]  ;;  %v5750_v56 = vld [vmem:[#allocation144_spill] sm:$0xff] }
 0x80d   :  { %v2229_v43 = vpop.f32.mrf.mxu0  ;;  %v2270_v23 = vpop.f32.mrf.mxu1 }
 0x80e   :  { %3069 = vpow2.f32 %v2846_v0  ;;  %v2847_v29 = vmul.f32 -1.442695, %v2274_v32  ;;  %v2848_v41 = vmul.f32 -1.442695, %v2276_v52 }
 0x80f   :  { %v2230_v35 = vpop.f32.mrf.mxu0  ;;  %v2271_v59 = vpop.f32.mrf.mxu1 }
 0x810   :  { %3071 = vpow2.f32 %v2847_v29 }
 0x811   :  { %3073 = vpow2.f32 %v2851_v38 }
 0x812   :  { %3075 = vpow2.f32 %v2848_v41 }
 0x81b   :  { %v3070_v51 = vpop.eup %3069 }
 0x81c   :  { %v2280_v46 = vadd.f32 1.0, %v3070_v51 }
 0x81d   :  { %v3072_v58 = vpop.eup %3071 }
 0x81e   :  { %3077 = vrcp.f32 %v2280_v46  ;;  %v2286_v4 = vadd.f32 1.0, %v3072_v58  ;;  %v3074_v25 = vpop.eup %3073  ;;  %v5728_v46 = vld [vmem:[#allocation122_spill] sm:$0xff]  ;;  %v5729_v58 = vld [vmem:[#allocation123_spill] sm:$0xff] }
 0x81f   :  { %3079 = vtanh.f32 %v2275_v19  ;;  %v3076_v0 = vpop.eup %3075  ;;  %v2322_v9 = vadd.f32 1.0, %v3074_v25  ;;  %v5727_v19 = vld [vmem:[#allocation121_spill] sm:$0xff] }
 0x820   :  { %3081 = vrcp.f32 %v2286_v4  ;;  %v2293_v22 = vadd.f32 1.0, %v3076_v0  ;;  %v5730_v4 = vld [vmem:[#allocation124_spill] sm:$0xff]  ;;  %v5731_v25 = vld [vmem:[#allocation125_spill] sm:$0xff]  ;;  %v5732_v0 = vld [vmem:[#allocation126_spill] sm:$0xff] }
 0x821   :  { %3083 = vtanh.f32 %v4558_v13  ;;  %v5752_v13 = vld [vmem:[#allocation146_spill] sm:$0xff] }
 0x822   :  { %3085 = vrcp.f32 %v2322_v9  ;;  %v5735_v9 = vld [vmem:[#allocation129_spill] sm:$0xff] }
 0x823   :  { %3087 = vrcp.f32 %v2293_v22  ;;  %v5737_v22 = vld [vmem:[#allocation131_spill] sm:$0xff] }
 0x82b   :  { %v3078_v21 = vpop.eup %3077 }
 0x82c   :  { %v3080_v32 = vpop.eup %3079 }
 0x82d   :  { %v3082_v43 = vpop.eup %3081  ;;  %v2297_v23 = vmul.f32 %v3080_v32, %v3078_v21  ;;  %v5733_v21 = vld [vmem:[#allocation127_spill] sm:$0xff]  ;;  %v5734_v32 = vld [vmem:[#allocation128_spill] sm:$0xff] }
 0x82e   :  { %v2296_v29 = vmul.f32 %v3082_v43, %v4414_v11  ;;  %v3084_v35 = vpop.eup %3083  ;;  %v5726_v11 = vld [vmem:[#allocation120_spill] sm:$0xff]  ;;  %v5736_v43 = vld [vmem:[#allocation130_spill] sm:$0xff] }
 0x82f   :  { %v3086_v59 = vpop.eup %3085 }
 0x830   :  { %v4569_v1 = vadd.f32 %v2297_v23, %v2296_v29  ;;  %v3088_v62 = vpop.eup %3087  ;;  %v2329_v52 = vmul.f32 %v3086_v59, %v3084_v35  ;;  %v5738_v23 = vld [vmem:[#allocation132_spill] sm:$0xff]  ;;  %v5739_v29 = vld [vmem:[#allocation133_spill] sm:$0xff]  ;;  %v5740_v35 = vld [vmem:[#allocation134_spill] sm:$0xff] }
 0x831   :  { %v5741_v59 = vld [vmem:[#allocation135_spill] sm:$0xff] }
 0x832   :  { %5725 = vst [vmem:[#allocation90_spill] sm:$0xff] %v4569_v1  ;;  %3089 = vtanh.f32 %v4569_v1  ;;  %v4572_v51 = vpack.c.bf16 %v2329_v52, %v2329_v52  ;;  %v5744_v52 = vld [vmem:[#allocation138_spill] sm:$0xff]  ;;  %v5747_v1 = vld [vmem:[#allocation141_spill] sm:$0xff] }
 0x83f   :  { %v3090_v39 = vpop.eup %3089 }
 0x840   :  { %v2300_v38 = vmul.f32 %v3090_v39, %v3088_v62  ;;  %v5742_v62 = vld [vmem:[#allocation136_spill] sm:$0xff]  ;;  %v5743_v39 = vld [vmem:[#allocation137_spill] sm:$0xff] }
 0x842   :  { %v2301_v41 = vpack.c.bf16 %v2300_v38, %v2300_v38  ;;  %v5745_v38 = vld [vmem:[#allocation139_spill] sm:$0xff] }
 0x844   :  { %2363 = vmatprep.mubr.bf16.mxu0 %v2301_v41  ;;  %2404 = vmatprep.mubr.bf16.mxu1 %v2301_v41 }
 0x845   :  { %2364 = vmatmul.mubr.bf16.vlgmr.msra.gmra.mxu0 %v4572_v51  ;;  %2405 = vmatmul.mubr.bf16.vlgmr.msra.gmra.mxu1 %v4572_v51 }
 0x846   :  { %2414 = vmatpush1.bf16.msra.mxu0 %v3424_v33  ;;  %2455 = vmatpush1.bf16.msra.mxu1 %v5230_v26 }
 0x847   :  { %2445 = vmatprep.mubr.bf16.mxu0 %v2301_v41  ;;  %2486 = vmatprep.mubr.bf16.mxu1 %v2301_v41  ;;  %v5746_v41 = vld [vmem:[#allocation140_spill] sm:$0xff] }
 0x848   :  { %2415 = vmatprep.subr.bf16.mxu0 %v5231_v3  ;;  %2456 = vmatprep.subr.bf16.mxu1 %v5232_v50 }
 0x84a   :  { %2416 = vmatpush1.bf16.msra.mxu0 %v5233_v40  ;;  %2457 = vmatpush1.bf16.msra.mxu1 %v5234_v24 }
 0x84b   :  { %2417 = vmatprep.subr.bf16.mxu0 %v5235_v48  ;;  %2458 = vmatprep.subr.bf16.mxu1 %v5327_v6 }
 0x84e   :  { %2418 = vmatpush1.bf16.msra.mxu0 %v5328_v54  ;;  %2459 = vmatpush1.bf16.msra.mxu1 %v5329_v18 }
 0x84f   :  { %2419 = vmatprep.subr.bf16.mxu0 %v5330_v37  ;;  %2460 = vmatprep.subr.bf16.mxu1 %v5331_v36 }
 0x852   :  { %2420 = vmatpush1.bf16.msra.mxu0 %v5332_v14  ;;  %2461 = vmatpush1.bf16.msra.mxu1 %v5333_v31 }
 0x853   :  { %2421 = vmatprep.subr.bf16.mxu0 %v5334_v44  ;;  %2462 = vmatprep.subr.bf16.mxu1 %v5426_v45 }
 0x856   :  { %2422 = vmatpush1.bf16.msra.mxu0 %v5427_v7  ;;  %2463 = vmatpush1.bf16.msra.mxu1 %v5428_v2 }
 0x857   :  { %2423 = vmatprep.subr.bf16.mxu0 %v5429_v10  ;;  %2464 = vmatprep.subr.bf16.mxu1 %v5430_v27 }
 0x85a   :  { %2424 = vmatpush1.bf16.msra.mxu0 %v5431_v47  ;;  %2465 = vmatpush1.bf16.msra.mxu1 %v5432_v42 }
 0x85b   :  { %2425 = vmatprep.subr.bf16.mxu0 %v5433_v17  ;;  %2466 = vmatprep.subr.bf16.mxu1 %v5434_v57 }
 0x85e   :  { %2426 = vmatpush1.bf16.msra.mxu0 %v5435_v49  ;;  %2467 = vmatpush1.bf16.msra.mxu1 %v5436_v20 }
 0x85f   :  { %2427 = vmatprep.subr.bf16.mxu0 %v5346_v8  ;;  %2468 = vmatprep.subr.bf16.mxu1 %v5347_v55 }
 0x862   :  { %2428 = vmatpush1.bf16.msra.mxu0 %v5348_v28  ;;  %2469 = vmatpush1.bf16.msra.mxu1 %v5437_v16 }
 0x863   :  { %2429 = vmatprep.subr.bf16.mxu0 %v5438_v34  ;;  %2470 = vmatprep.subr.bf16.mxu1 %v5351_v30 }
 0x866   :  { %2430 = vmatpush2.bf16.msra.mxu0 %v5726_v11  ;;  %2471 = vmatpush2.bf16.msra.mxu1 %v5727_v19 }
 0x867   :  { %2431 = vmatprep.subr.bf16.mxu0 %v5728_v46  ;;  %2472 = vmatprep.subr.bf16.mxu1 %v5729_v58 }
 0x86a   :  { %2432 = vmatpush2.bf16.msra.mxu0 %v5730_v4  ;;  %2473 = vmatpush2.bf16.msra.mxu1 %v5731_v25 }
 0x86b   :  { %2433 = vmatprep.subr.bf16.mxu0 %v5732_v0  ;;  %2474 = vmatprep.subr.bf16.mxu1 %v5733_v21 }
 0x86e   :  { %2434 = vmatpush2.bf16.msra.mxu0 %v5734_v32  ;;  %2475 = vmatpush2.bf16.msra.mxu1 %v5735_v9 }
 0x86f   :  { %2435 = vmatprep.subr.bf16.mxu0 %v5736_v43  ;;  %2476 = vmatprep.subr.bf16.mxu1 %v5737_v22 }
 0x872   :  { %2436 = vmatpush2.bf16.msra.mxu0 %v5738_v23  ;;  %2477 = vmatpush2.bf16.msra.mxu1 %v5739_v29 }
 0x873   :  { %2437 = vmatprep.subr.bf16.mxu0 %v5740_v35  ;;  %2478 = vmatprep.subr.bf16.mxu1 %v5741_v59 }
 0x876   :  { %2438 = vmatpush2.bf16.msra.mxu0 %v5742_v62  ;;  %2479 = vmatpush2.bf16.msra.mxu1 %v5743_v39 }
 0x877   :  { %2439 = vmatprep.subr.bf16.mxu0 %v5744_v52  ;;  %2480 = vmatprep.subr.bf16.mxu1 %v5745_v38 }
 0x87a   :  { %2440 = vmatpush2.bf16.msra.mxu0 %v5746_v41  ;;  %2481 = vmatpush2.bf16.msra.mxu1 %v5747_v1  ;;  %v5757_v41 = vld [vmem:[#allocation75_spill] sm:$0xff] }
 0x87b   :  { %2441 = vmatprep.subr.bf16.mxu0 %v5748_v5  ;;  %2482 = vmatprep.subr.bf16.mxu1 %v5749_v61 }
 0x87e   :  { %2442 = vmatpush2.bf16.msra.mxu0 %v5750_v56  ;;  %2483 = vmatpush2.bf16.msra.mxu1 %v5751_v60 }
 0x87f   :  { %2443 = vmatprep.subr.bf16.mxu0 %v5752_v13  ;;  %2484 = vmatprep.subr.bf16.mxu1 %v5753_v15 }
 0x882   :  { %2444 = vmatpush2.bf16.msra.mxu0 %v5754_v63  ;;  %2485 = vmatpush2.bf16.msra.mxu1 %v5755_v53 }
 0x883   :  { %2553 = vmatprep.subr.bf16.mxu0 %v5756_v12  ;;  %2594 = vmatprep.subr.bf16.mxu1 %v5757_v41  ;;  %v192_v12 = vpop.permute.xlu1 %191  ;;  %v5770_v41 = vld [vmem:[#allocation83_spill] sm:$0xff] }
 0x885   :  { %2446 = vmatmul.mubr.bf16.vlgmr.msra.gmra.mxu0 %v4572_v51  ;;  %2487 = vmatmul.mubr.bf16.vlgmr.msra.gmra.mxu1 %v4572_v51 }
 0x886   :  { %2554 = vmatpush1.bf16.msra.mxu0 %v3424_v33  ;;  %2595 = vmatpush1.bf16.msra.mxu1 %v5230_v26  ;;  %v5758_v33 = vld [vmem:[#allocation140_spill] sm:$0xff]  ;;  %v5759_v26 = vld [vmem:[#allocation79_spill] sm:$0xff] }
 0x887   :  { %2555 = vmatprep.subr.bf16.mxu0 %v5231_v3  ;;  %2596 = vmatprep.subr.bf16.mxu1 %v5232_v50  ;;  %v194_v3 = vmul.f32 %v192_v12, %v5759_v26  ;;  %v5760_v50 = vld [vmem:[#allocation80_spill] sm:$0xff] }
 0x88a   :  { %2556 = vmatpush1.bf16.msra.mxu0 %v5233_v40  ;;  %2597 = vmatpush1.bf16.msra.mxu1 %v5234_v24  ;;  %v195_v40 = vmul.f32 %v192_v12, %v5760_v50 }
 0x88b   :  { %2557 = vmatprep.subr.bf16.mxu0 %v5235_v48  ;;  %2598 = vmatprep.subr.bf16.mxu1 %v5327_v6 }
 0x88e   :  { %2558 = vmatpush1.bf16.msra.mxu0 %v5328_v54  ;;  %2599 = vmatpush1.bf16.msra.mxu1 %v5329_v18 }
 0x88f   :  { %2559 = vmatprep.subr.bf16.mxu0 %v5330_v37  ;;  %2600 = vmatprep.subr.bf16.mxu1 %v5331_v36 }
 0x892   :  { %2560 = vmatpush1.bf16.msra.mxu0 %v5332_v14  ;;  %2601 = vmatpush1.bf16.msra.mxu1 %v5333_v31  ;;  %v5763_v14 = vld [vmem:[#allocation84_spill] sm:$0xff] }
 0x893   :  { %2561 = vmatprep.subr.bf16.mxu0 %v5334_v44  ;;  %2602 = vmatprep.subr.bf16.mxu1 %v5426_v45 }
 0x896   :  { %2562 = vmatpush1.bf16.msra.mxu0 %v5427_v7  ;;  %2603 = vmatpush1.bf16.msra.mxu1 %v5428_v2  ;;  %v5766_v7 = vld [vmem:[#allocation88_spill] sm:$0xff] }
 0x897   :  { %2563 = vmatprep.subr.bf16.mxu0 %v5429_v10  ;;  %2604 = vmatprep.subr.bf16.mxu1 %v5430_v27 }
 0x89a   :  { %2564 = vmatpush1.bf16.msra.mxu0 %v5431_v47  ;;  %2605 = vmatpush1.bf16.msra.mxu1 %v5432_v42 }
 0x89b   :  { %2565 = vmatprep.subr.bf16.mxu0 %v5433_v17  ;;  %2606 = vmatprep.subr.bf16.mxu1 %v5434_v57 }
 0x89e   :  { %2566 = vmatpush1.bf16.msra.mxu0 %v5435_v49  ;;  %2607 = vmatpush1.bf16.msra.mxu1 %v5436_v20 }
 0x89f   :  { %2567 = vmatprep.subr.bf16.mxu0 %v5346_v8  ;;  %2608 = vmatprep.subr.bf16.mxu1 %v5347_v55 }
 0x8a2   :  { %2568 = vmatpush1.bf16.msra.mxu0 %v5348_v28  ;;  %2609 = vmatpush1.bf16.msra.mxu1 %v5437_v16  ;;  %v5764_v28 = vld [vmem:[#allocation87_spill] sm:$0xff] }
 0x8a3   :  { %2569 = vmatprep.subr.bf16.mxu0 %v5438_v34  ;;  %2610 = vmatprep.subr.bf16.mxu1 %v5351_v30  ;;  %v196_v30 = vmul.f32 %v192_v12, %v5764_v28 }
 0x8a5   :  { %v200_v2 = vadd.f32 %v196_v30, %v5766_v7 }
 0x8a6   :  { %2570 = vmatpush2.bf16.msra.mxu0 %v5726_v11  ;;  %2611 = vmatpush2.bf16.msra.mxu1 %v5727_v19  ;;  %v5767_v11 = vld [vmem:[#allocation67_spill] sm:$0xff] }
 0x8a7   :  { %2571 = vmatprep.subr.bf16.mxu0 %v5728_v46  ;;  %2612 = vmatprep.subr.bf16.mxu1 %v5729_v58 }
 0x8aa   :  { %2572 = vmatpush2.bf16.msra.mxu0 %v5730_v4  ;;  %2613 = vmatpush2.bf16.msra.mxu1 %v5731_v25 }
 0x8ab   :  { %2573 = vmatprep.subr.bf16.mxu0 %v5732_v0  ;;  %2614 = vmatprep.subr.bf16.mxu1 %v5733_v21 }
 0x8ae   :  { %2574 = vmatpush2.bf16.msra.mxu0 %v5734_v32  ;;  %2615 = vmatpush2.bf16.msra.mxu1 %v5735_v9  ;;  %v5768_v32 = vld [vmem:[#allocation89_spill] sm:$0xff] }
 0x8af   :  { %2575 = vmatprep.subr.bf16.mxu0 %v5736_v43  ;;  %2616 = vmatprep.subr.bf16.mxu1 %v5737_v22 }
 0x8b2   :  { %2576 = vmatpush2.bf16.msra.mxu0 %v5738_v23  ;;  %2617 = vmatpush2.bf16.msra.mxu1 %v5739_v29  ;;  %v5769_v29 = vld [vmem:[#allocation78_spill] sm:$0xff] }
 0x8b3   :  { %2577 = vmatprep.subr.bf16.mxu0 %v5740_v35  ;;  %2618 = vmatprep.subr.bf16.mxu1 %v5741_v59 }
 0x8b6   :  { %2578 = vmatpush2.bf16.msra.mxu0 %v5742_v62  ;;  %2619 = vmatpush2.bf16.msra.mxu1 %v5743_v39 }
 0x8b7   :  { %2579 = vmatprep.subr.bf16.mxu0 %v5744_v52  ;;  %2620 = vmatprep.subr.bf16.mxu1 %v5745_v38 }
 0x8ba   :  { %2580 = vmatpush2.bf16.msra.mxu0 %v5758_v33  ;;  %2621 = vmatpush2.bf16.msra.mxu1 %v5747_v1 }
 0x8bb   :  { %2581 = vmatprep.subr.bf16.mxu0 %v5748_v5  ;;  %2622 = vmatprep.subr.bf16.mxu1 %v5749_v61  ;;  %v5761_v5 = vld [vmem:[#allocation81_spill] sm:$0xff]  ;;  %v5762_v61 = vld [vmem:[#allocation82_spill] sm:$0xff] }
 0x8bc   :  { %v198_v24 = vadd.f32 %v194_v3, %v5761_v5  ;;  %v199_v48 = vadd.f32 %v195_v40, %v5762_v61  ;;  %v5771_v3 = vld [vmem:[#allocation85_spill] sm:$0xff] }
 0x8be   :  { %2582 = vmatpush2.bf16.msra.mxu0 %v5750_v56  ;;  %2623 = vmatpush2.bf16.msra.mxu1 %v5751_v60  ;;  %v5765_v60 = vld [vmem:[#allocation86_spill] sm:$0xff] }
 0x8bf   :  { %2583 = vmatprep.subr.bf16.mxu0 %v5752_v13  ;;  %2624 = vmatprep.subr.bf16.mxu1 %v5753_v15 }
 0x8c2   :  { %2584 = vmatpush2.bf16.msra.mxu0 %v5754_v63  ;;  %2625 = vmatpush2.bf16.msra.mxu1 %v5755_v53  ;;  %v197_v63 = vmul.f32 %v192_v12, %v5763_v14 }
 0x8c4   :  { %v201_v45 = vadd.f32 %v197_v63, %v5765_v60 }
 0x905   :  { %v2365_v56 = vpop.f32.mrf.mxu0  ;;  %v2406_v6 = vpop.f32.mrf.mxu1 }
 0x906   :  { %v2524_v54 = vadd.f32 %v2365_v56, %v198_v24  ;;  %v2526_v27 = vadd.f32 %v2406_v6, %v200_v2 }
 0x907   :  { %v2367_v18 = vpop.f32.mrf.mxu0  ;;  %v2408_v37 = vpop.f32.mrf.mxu1 }
 0x908   :  { %v2855_v36 = vmul.f32 -1.442695, %v2524_v54  ;;  %v2525_v15 = vadd.f32 %v2367_v18, %v199_v48  ;;  %v2527_v10 = vadd.f32 %v2408_v37, %v201_v45  ;;  %v5772_v37 = vld [vmem:[#allocation90_spill] sm:$0xff] }
 0x909   :  { %v2369_v31 = vpop.f32.mrf.mxu0  ;;  %v2410_v53 = vpop.f32.mrf.mxu1 }
 0x90a   :  { %3091 = vpow2.f32 %v2855_v36  ;;  %v2856_v44 = vmul.f32 -1.442695, %v2525_v15  ;;  %v2857_v47 = vmul.f32 -1.442695, %v2527_v10 }
 0x90b   :  { %v2370_v8 = vpop.f32.mrf.mxu0  ;;  %v2411_v55 = vpop.f32.mrf.mxu1 }
 0x90c   :  { %3093 = vpow2.f32 %v2856_v44 }
 0x90d   :  { %3095 = vtanh.f32 %v2526_v27 }
 0x90e   :  { %3097 = vpow2.f32 %v2857_v47 }
 0x917   :  { %v3092_v42 = vpop.eup %3091 }
 0x918   :  { %v2531_v17 = vadd.f32 1.0, %v3092_v42 }
 0x919   :  { %v3094_v57 = vpop.eup %3093 }
 0x91a   :  { %3099 = vrcp.f32 %v2531_v17  ;;  %v2537_v49 = vadd.f32 1.0, %v3094_v57  ;;  %v3096_v20 = vpop.eup %3095 }
 0x91b   :  { %v3098_v16 = vpop.eup %3097 }
 0x91c   :  { %3101 = vrcp.f32 %v2537_v49  ;;  %v2544_v51 = vadd.f32 1.0, %v3098_v16 }
 0x91e   :  { %3103 = vrcp.f32 %v2544_v51 }
 0x927   :  { %v3100_v34 = vpop.eup %3099 }
 0x928   :  { %v2548_v13 = vmul.f32 %v3100_v34, %v3096_v20 }
 0x929   :  { %v3102_v1 = vpop.eup %3101 }
 0x92a   :  { %v2547_v19 = vmul.f32 %v3102_v1, %v5767_v11 }
 0x92b   :  { %v3104_v58 = vpop.eup %3103 }
 0x92c   :  { %v2549_v46 = vadd.f32 %v2548_v13, %v2547_v19 }
 0x92e   :  { %3105 = vtanh.f32 %v2549_v46 }
 0x93b   :  { %v3106_v4 = vpop.eup %3105 }
 0x93c   :  { %v2551_v25 = vmul.f32 %v3106_v4, %v3104_v58 }
 0x93e   :  { %v2552_v44 = vpack.c.bf16 %v2551_v25, %v2551_v25 }
 0x945   :  { %v2447_v0 = vpop.f32.mrf.mxu0  ;;  %v2488_v21 = vpop.f32.mrf.mxu1 }
 0x946   :  { %v2495_v9 = vadd.f32 %v2447_v0, %v5768_v32  ;;  %v2497_v50 = vadd.f32 %v2488_v21, %v5771_v3  ;;  %v5773_v0 = vld [vmem:[#allocation76_spill] sm:$0xff] }
 0x947   :  { %v2449_v43 = vpop.f32.mrf.mxu0  ;;  %v2490_v22 = vpop.f32.mrf.mxu1  ;;  %v2665_v21 = vsub.s32 3, %v5773_v0 }
 0x948   :  { %v2852_v23 = vmul.f32 -1.442695, %v2495_v9  ;;  %v2496_v35 = vadd.f32 %v2449_v43, %v5769_v29  ;;  %v2498_v33 = vadd.f32 %v2490_v22, %v5770_v41  ;;  %v3141_v9 = vld [vmem:[#allocation6] sm:$0xff] }
 0x949   :  { %v2451_v59 = vpop.f32.mrf.mxu0  ;;  %v2492_v62 = vpop.f32.mrf.mxu1  ;;  %v2666_v43 = vrot.slane %v3141_v9, %v2665_v21 }
 0x94a   :  { %3107 = vpow2.f32 %v2852_v23  ;;  %v2853_v39 = vmul.f32 -1.442695, %v2496_v35  ;;  %v2854_v12 = vmul.f32 -1.442695, %v2498_v33  ;;  %v2674_v59 = vsub.s32 4, %v5773_v0 }
 0x94b   :  { %v2452_v52 = vpop.f32.mrf.mxu0  ;;  %v2493_v38 = vpop.f32.mrf.mxu1 }
 0x94c   :  { %3109 = vpow2.f32 %v2853_v39  ;;  %v2675_v62 = vrot.slane %v3141_v9, %v2674_v59 }
 0x94d   :  { %3111 = vpow2.f32 %v2854_v12 }
 0x957   :  { %v3108_v26 = vpop.eup %3107 }
 0x958   :  { %v2502_v40 = vadd.f32 1.0, %v3108_v26 }
 0x959   :  { %v3110_v5 = vpop.eup %3109 }
 0x95a   :  { %3113 = vrcp.f32 %v2502_v40  ;;  %v2508_v24 = vadd.f32 1.0, %v3110_v5  ;;  %v3112_v61 = vpop.eup %3111 }
 0x95b   :  { %3115 = vtanh.f32 %v2497_v50  ;;  %v2515_v54 = vadd.f32 1.0, %v3112_v61 }
 0x95c   :  { %3117 = vrcp.f32 %v2508_v24 }
 0x95d   :  { %3119 = vrcp.f32 %v2515_v54 }
 0x967   :  { %v3114_v48 = vpop.eup %3113 }
 0x968   :  { %v3116_v56 = vpop.eup %3115 }
 0x969   :  { %v3118_v6 = vpop.eup %3117  ;;  %v2519_v18 = vmul.f32 %v3116_v56, %v3114_v48 }
 0x96a   :  { %v2518_v36 = vmul.f32 %v3118_v6, %v5772_v37  ;;  %v3120_v14 = vpop.eup %3119 }
 0x96c   :  { %v2520_v15 = vadd.f32 %v2519_v18, %v2518_v36 }
 0x96e   :  { %3121 = vtanh.f32 %v2520_v15 }
 0x97b   :  { %v3122_v63 = vpop.eup %3121 }
 0x97c   :  { %v2522_v31 = vmul.f32 %v3122_v63, %v3120_v14 }
 0x97e   :  { %v2523_v53 = vpack.c.bf16 %v2522_v31, %v2522_v31 }
 0x980   :  { %2585 = vmatprep.mubr.bf16.mxu0 %v2523_v53  ;;  %2626 = vmatprep.mubr.bf16.mxu1 %v2523_v53 }
 0x981   :  { %2586 = vmatmul.mubr.bf16.vlgmr.msra.gmra.mxu0 %v2552_v44  ;;  %2627 = vmatmul.mubr.bf16.vlgmr.msra.gmra.mxu1 %v2552_v44 }
 0xa41   :  { %v2587_v8 = vpop.f32.mrf.mxu0  ;;  %v2628_v55 = vpop.f32.mrf.mxu1 }
 0xa42   :  { %v2635_v28 = vadd.f32 %v2587_v8, %v5768_v32  ;;  %v2637_v20 = vadd.f32 %v2628_v55, %v5771_v3 }
 0xa43   :  { %v2589_v30 = vpop.f32.mrf.mxu0  ;;  %v2630_v60 = vpop.f32.mrf.mxu1 }
 0xa44   :  { %v2858_v45 = vmul.f32 -1.442695, %v2635_v28  ;;  %v2636_v7 = vadd.f32 %v2589_v30, %v5769_v29  ;;  %v2638_v17 = vadd.f32 %v2630_v60, %v5770_v41 }
 0xa45   :  { %v2591_v2 = vpop.f32.mrf.mxu0  ;;  %v2632_v10 = vpop.f32.mrf.mxu1 }
 0xa46   :  { %3123 = vpow2.f32 %v2858_v45  ;;  %v2859_v27 = vmul.f32 -1.442695, %v2636_v7  ;;  %v2860_v57 = vmul.f32 -1.442695, %v2638_v17 }
 0xa47   :  { %v2592_v47 = vpop.f32.mrf.mxu0  ;;  %v2633_v42 = vpop.f32.mrf.mxu1 }
 0xa48   :  { %3125 = vpow2.f32 %v2859_v27 }
 0xa49   :  { %3127 = vpow2.f32 %v2860_v57 }
 0xa53   :  { %v3124_v49 = vpop.eup %3123 }
 0xa54   :  { %v2642_v16 = vadd.f32 1.0, %v3124_v49 }
 0xa55   :  { %v3126_v34 = vpop.eup %3125 }
 0xa56   :  { %3129 = vrcp.f32 %v2642_v16  ;;  %v2648_v13 = vadd.f32 1.0, %v3126_v34  ;;  %v3128_v1 = vpop.eup %3127 }
 0xa57   :  { %3131 = vtanh.f32 %v2637_v20  ;;  %v2655_v46 = vadd.f32 1.0, %v3128_v1 }
 0xa58   :  { %3133 = vrcp.f32 %v2648_v13 }
 0xa59   :  { %3135 = vrcp.f32 %v2655_v46 }
 0xa63   :  { %v3130_v51 = vpop.eup %3129 }
 0xa64   :  { %v3132_v11 = vpop.eup %3131 }
 0xa65   :  { %v3134_v19 = vpop.eup %3133  ;;  %v2659_v58 = vmul.f32 %v3132_v11, %v3130_v51 }
 0xa66   :  { %v2658_v4 = vmul.f32 %v3134_v19, %v2520_v15  ;;  %v3136_v32 = vpop.eup %3135 }
 0xa68   :  { %v2660_v25 = vadd.f32 %v2659_v58, %v2658_v4 }
 0xa6a   :  { %3137 = vtanh.f32 %v2660_v25 }
 0xa77   :  { %v3138_v22 = vpop.eup %3137 }
 0xa78   :  { %v2662_v23 = vmul.f32 %v3138_v22, %v3136_v32 }
 0xa7a   :  { %v2667_v29 = vmul.f32 %v2666_v43, %v2662_v23 }
 0xa7c   :  { %v2669_v35 = vsel %vm2668_vm0, %v2667_v29, 0.0 }
 0xa7d   :  { %2670 = vadd.xlane.f32.xlu0 %v2669_v35 }
 0xb06   :  { %v2671_v39 = vpop.xlane.xlu0 %2670 }
 0xb07   :  { %v2676_v52 = vadd.f32 %v2675_v62, %v2671_v39 }
 0xb09   :  { %2678 = vst.msk [vmem:[%s4730_s3] sm:$0x3] %vm2677_vm1, %v2676_v52 }
 0xb0a   :  { %2683 = vsyncpa [#allocation3], 1 }
 0xb0b   :  { %2684 = vsyncpa [#allocation5], 1 }

</bundles_post_ra>
